<compile_context>
chip_gen: v7x
topology: tpu7x:2x2x1
jax: 0.10.0
libtpu: 0.0.40
codegen_flags: <defaults>
</compile_context>

<pallas_src>
import math

import jax
import jax.numpy as jnp
from jax import lax
from jax.experimental import pallas as pl
from jax.experimental.pallas import tpu as pltpu

# ------------------------------ small config ---------------------------------
VOCAB    = 80     # text vocabulary
HID      = 32     # attention_dim of text encoder
NHEAD    = 2
DHEAD    = HID // NHEAD
FFN      = 64
NLAYERS  = 2
T_TEXT   = 16     # padded text length (dummy export inputs use 68; small here)
T_FEATS  = 64     # fixed frame count (original ONNX export hardcodes 512)
UPSAMPLE = 4      # decoder upsampling factor
C_DEC0   = 32
C_DEC1   = 16
ALPHA    = 1.0
# noise_scale / noise_scale_dur unused: this export sets z_p = m_p and the
# duration head is deterministic.

_VMEM = pl.BlockSpec(memory_space=pltpu.MemorySpace.VMEM)


# --------------------------- in-kernel helpers --------------------------------
def _mxdot(a, b):
    """MXU matmul: bf16 operands, f32 accumulation."""
    return jnp.dot(a.astype(jnp.bfloat16), b.astype(jnp.bfloat16),
                   preferred_element_type=jnp.float32)


def _mxdot_nt(a, b):
    """a @ b.T (contract last dims of both) on the MXU, bf16 in / f32 acc."""
    return lax.dot_general(a.astype(jnp.bfloat16), b.astype(jnp.bfloat16),
                           dimension_numbers=(((1,), (1,)), ((), ())),
                           preferred_element_type=jnp.float32)


def _layer_norm(v, g, b):
    mu = jnp.mean(v, axis=-1, keepdims=True)
    var = jnp.mean((v - mu) ** 2, axis=-1, keepdims=True)
    return (v - mu) * lax.rsqrt(var + 1e-5) * g + b


def _shift_mats(n):
    """(n,n) 0/1 shift matrices: (P@x)[i]=x[i-1], (N@x)[i]=x[i+1] (zero padded)."""
    r = lax.broadcasted_iota(jnp.int32, (n, n), 0)
    c = lax.broadcasted_iota(jnp.int32, (n, n), 1)
    prev = (r == c + 1).astype(jnp.float32)
    nxt = (c == r + 1).astype(jnp.float32)
    return prev, nxt


def _softmax_rows(s):
    s = s - jnp.max(s, axis=-1, keepdims=True)
    p = jnp.exp(s)
    return p * pl.reciprocal(jnp.sum(p, axis=-1, keepdims=True), approx=True)


# ------------------------------ Pallas kernels --------------------------------
def _text_side_kernel(x_ref, mcol_ref, mrow_ref,
                      aw_ref, vh_ref, w1_ref, w2_ref, b1_ref,
                      pw_ref, pb_ref,
                      dpw_ref, dpb1_ref, dpw2_ref, dpb2_ref,
                      mp_ref, logw_ref):
    """Fused text side: NLAYERS pre-norm encoder layers + proj(m) + duration head."""
    x = x_ref[...]                                 # (T, HID) f32
    mcol = mcol_ref[...]                           # (T, 1)
    mrow = mrow_ref[...]                           # (1, T)
    t = x.shape[0]
    neg = -1e9 * (1.0 - mrow)                      # additive key mask, f32
    scale = 1.0 / math.sqrt(DHEAD)
    lane = lax.broadcasted_iota(jnp.int32, (1, HID), 1)

    for l in range(NLAYERS):                       # static unroll; weights stay in VMEM
        aw = aw_ref[l]                             # (4, HID, HID) bf16: q,k,v,o
        vh = vh_ref[l]                             # (9, HID) f32 packed bias/LN slab
        bq, bk, bv, bo = vh[0:1], vh[1:2], vh[2:3], vh[3:4]
        g1, be1, g2, be2, bff2 = vh[4:5], vh[5:6], vh[6:7], vh[7:8], vh[8:9]

        # ---- pre-norm self-attention (heads via lane masks, no sub-tile slices)
        y = _layer_norm(x, g1, be1)
        q = _mxdot(y, aw[0]) + bq
        k = _mxdot(y, aw[1]) + bk
        v = _mxdot(y, aw[2]) + bv
        att = jnp.zeros((t, HID), jnp.float32)
        for h in range(NHEAD):                     # static unroll over heads
            hm = ((lane >= h * DHEAD) &
                  (lane < (h + 1) * DHEAD)).astype(jnp.float32)
            s = _mxdot_nt(q * hm, k) * scale + neg           # (T, T) f32
            p = _softmax_rows(s)                             # f32 softmax math
            att = att + _mxdot(p, v * hm)
        att = _mxdot(att, aw[3]) + bo
        x = x + att * mcol

        # ---- pre-norm feed forward
        y = _layer_norm(x, g2, be2)
        hdn = jnp.maximum(_mxdot(y, w1_ref[l]) + b1_ref[l], 0.0)
        x = (x + _mxdot(hdn, w2_ref[l]) + bff2) * mcol

    # ---- proj Conv1d(H, 2H, 1): only the m half (logs_p half is dead on this path)
    mp_ref[...] = (_mxdot(x, pw_ref[...]) + pb_ref[...]) * mcol

    # ---- duration predictor head: conv k=3 (taps via shift-matrix matmuls) + 1x1
    xm = x * mcol
    sp, sn = _shift_mats(t)
    prv = _mxdot(sp, xm)
    nxt = _mxdot(sn, xm)
    h = jnp.maximum(_mxdot(prv, dpw_ref[0]) + _mxdot(xm, dpw_ref[1]) +
                    _mxdot(nxt, dpw_ref[2]) + dpb1_ref[...], 0.0)
    logw_ref[...] = (jnp.sum(h * dpw2_ref[...], axis=-1, keepdims=True)
                     + dpb2_ref[...])


def _frame_side_kernel(attn_ref, mp_ref,
                       fw_ref, fb_ref,
                       prew_ref, preb_ref,
                       decA_ref, decb1_ref, decB_ref, decb2_ref,
                       wav_ref):
    """Fused frame side: path expansion + flow inverse + decoder (upsample fused)."""
    tf = T_FEATS

    # z_p = attn @ m_p  (monotonic path expansion; dead logs_p expansion removed)
    z_p = _mxdot(attn_ref[...], mp_ref[...])                     # (TF, HID)

    # flow inverse (one mean-only coupling layer): z = [x1, x2 - tanh(x1 W + b)]
    m = jnp.tanh(_mxdot(z_p, fw_ref[...]) + fb_ref[...])         # (TF, HID//2)
    z = z_p - jnp.concatenate(
        [jnp.zeros((tf, HID // 2), jnp.float32), m], axis=-1)

    # decoder: 1x1 pre-conv, then nearest-x4 upsample folded into both k=3 convs
    h0 = _mxdot(z, prew_ref[...]) + preb_ref[...]                # (TF, C0)
    sp, sn = _shift_mats(tf)
    h0p = _mxdot(sp, h0)                                         # frame t-1
    h0n = _mxdot(sn, h0)                                         # frame t+1
    h1 = (_mxdot(h0p, decA_ref[0]) + _mxdot(h0, decA_ref[1]) +
          _mxdot(h0n, decA_ref[2]) + decb1_ref[...])             # (TF, 4*C1)
    h1 = jnp.where(h1 > 0.0, h1, 0.1 * h1)                       # leaky relu (f32)
    h1p = _mxdot(sp, h1)
    h1n = _mxdot(sn, h1)
    wav = (_mxdot(h1p, decB_ref[0]) + _mxdot(h1, decB_ref[1]) +
           _mxdot(h1n, decB_ref[2]) + decb2_ref[...])            # (TF, UPSAMPLE)
    wav_ref[...] = jnp.tanh(wav)                                 # phase-packed wav


def text_side(x, mcol, mrow, pk):
    args = [x, mcol, mrow,
            pk["enc_aw"], pk["enc_vh"], pk["enc_w1"], pk["enc_w2"], pk["enc_b1"],
            pk["proj_w_m"], pk["proj_b_m"],
            pk["dp_w1"], pk["dp_b1"], pk["dp_w2"], pk["dp_b2"]]
    return pl.pallas_call(
        _text_side_kernel,
        out_shape=(jax.ShapeDtypeStruct((T_TEXT, HID), jnp.float32),
                   jax.ShapeDtypeStruct((T_TEXT, 1), jnp.float32)),
        in_specs=[_VMEM] * len(args),
        out_specs=(_VMEM, _VMEM),
    )(*args)


def frame_side(attn, m_p, pk):
    args = [attn, m_p,
            pk["flow_w_ext"], pk["flow_b"],
            pk["dec_pre_w"], pk["dec_pre_b"],
            pk["dec_A"], pk["dec_b1"], pk["dec_B"], pk["dec_b2"]]
    return pl.pallas_call(
        _frame_side_kernel,
        out_shape=jax.ShapeDtypeStruct((T_FEATS, UPSAMPLE), jnp.float32),
        in_specs=[_VMEM] * len(args),
        out_specs=_VMEM,
    )(*args)


# ------------------------------ parameters ------------------------------------
def init_params(key):
    keys = jax.random.split(key, 32)
    it = iter(keys)

    def nrm(shape, scale):
        return (scale * jax.random.normal(next(it), shape)).astype(jnp.float32)

    p = {"emb": nrm((VOCAB, HID), 0.1)}

    layers = []
    s = 1.0 / math.sqrt(HID)
    for _ in range(NLAYERS):
        lp = {
            "wq": nrm((HID, HID), s), "bq": jnp.zeros((1, HID), jnp.float32),
            "wk": nrm((HID, HID), s), "bk": jnp.zeros((1, HID), jnp.float32),
            "wv": nrm((HID, HID), s), "bv": jnp.zeros((1, HID), jnp.float32),
            "wo": nrm((HID, HID), s), "bo": jnp.zeros((1, HID), jnp.float32),
            "ln1g": jnp.ones((1, HID), jnp.float32),
            "ln1b": jnp.zeros((1, HID), jnp.float32),
            "ln2g": jnp.ones((1, HID), jnp.float32),
            "ln2b": jnp.zeros((1, HID), jnp.float32),
            "w1": nrm((HID, FFN), s), "b1": jnp.zeros((1, FFN), jnp.float32),
            "w2": nrm((FFN, HID), 1.0 / math.sqrt(FFN)),
            "b2": jnp.zeros((1, HID), jnp.float32),
        }
        layers.append(lp)
    p["layers"] = layers

    p["proj_w"] = nrm((HID, 2 * HID), s)
    p["proj_b"] = jnp.zeros((2 * HID,), jnp.float32)

    p["dp_w1"] = nrm((3, HID, HID), s)
    p["dp_b1"] = jnp.zeros((HID,), jnp.float32)
    p["dp_w2"] = nrm((HID, 1), s)
    p["dp_b2"] = 0.1 * jnp.ones((1,), jnp.float32)

    p["flow_w"] = nrm((HID // 2, HID // 2), 1.0 / math.sqrt(HID // 2))
    p["flow_b"] = jnp.zeros((HID // 2,), jnp.float32)

    p["dec_pre_w"] = nrm((HID, C_DEC0), s)
    p["dec_pre_b"] = jnp.zeros((C_DEC0,), jnp.float32)
    p["dec_w1"] = nrm((3, C_DEC0, C_DEC1), 1.0 / math.sqrt(3 * C_DEC0))
    p["dec_b1"] = jnp.zeros((C_DEC1,), jnp.float32)
    p["dec_w2"] = nrm((3, C_DEC1, 1), 1.0 / math.sqrt(3 * C_DEC1))
    p["dec_b2"] = jnp.zeros((1,), jnp.float32)
    return p


def pack_params(p):
    """Repack parameters into kernel-friendly stacked/bf16 slabs (done once)."""
    f32, bf16 = jnp.float32, jnp.bfloat16
    aw, vh, w1s, w2s, b1s = [], [], [], [], []
    for lp in p["layers"]:
        aw.append(jnp.stack([lp["wq"], lp["wk"], lp["wv"], lp["wo"]]))
        vh.append(jnp.concatenate(
            [lp["bq"], lp["bk"], lp["bv"], lp["bo"],
             lp["ln1g"], lp["ln1b"], lp["ln2g"], lp["ln2b"], lp["b2"]], axis=0))
        w1s.append(lp["w1"]); w2s.append(lp["w2"]); b1s.append(lp["b1"])

    # -- decoder conv1 (k=3) with nearest-x4 upsample folded in (phase r = 0..3):
    #    h1_r[t] = lrelu( h0[t-1] @ A_prev[:, r] + h0[t] @ A_cur[:, r] + h0[t+1] @ A_next[:, r] + b1 )
    w1d = p["dec_w1"]
    zA = jnp.zeros((C_DEC0, 3 * C_DEC1), f32)
    A_prev = jnp.concatenate([w1d[0], zA], axis=1)
    A_cur = jnp.concatenate([w1d[1] + w1d[2],
                             w1d[0] + w1d[1] + w1d[2],
                             w1d[0] + w1d[1] + w1d[2],
                             w1d[0] + w1d[1]], axis=1)
    A_next = jnp.concatenate([zA, w1d[2]], axis=1)

    # -- decoder conv2 (k=3) on the interleaved (upsampled) sequence, phase-packed
    w2d = p["dec_w2"]
    zB = jnp.zeros((C_DEC1, 1), f32)
    B_cur = jnp.concatenate([
        jnp.concatenate([w2d[1], w2d[2], zB, zB], axis=0),       # phase 0
        jnp.concatenate([w2d[0], w2d[1], w2d[2], zB], axis=0),   # phase 1
        jnp.concatenate([zB, w2d[0], w2d[1], w2d[2]], axis=0),   # phase 2
        jnp.concatenate([zB, zB, w2d[0], w2d[1]], axis=0)],      # phase 3
        axis=1)
    B_prev = jnp.zeros((4 * C_DEC1, 4), f32).at[3 * C_DEC1:, 0:1].set(w2d[0])
    B_next = jnp.zeros((4 * C_DEC1, 4), f32).at[:C_DEC1, 3:4].set(w2d[2])

    return {
        "emb": p["emb"],
        "enc_aw": jnp.stack(aw).astype(bf16),                    # (L, 4, H, H)
        "enc_vh": jnp.stack(vh),                                 # (L, 9, H) f32
        "enc_w1": jnp.stack(w1s).astype(bf16),                   # (L, H, FFN)
        "enc_w2": jnp.stack(w2s).astype(bf16),                   # (L, FFN, H)
        "enc_b1": jnp.stack(b1s),                                # (L, 1, FFN) f32
        "proj_w_m": p["proj_w"][:, :HID].astype(bf16),
        "proj_b_m": p["proj_b"][:HID].reshape(1, HID),
        "dp_w1": p["dp_w1"].astype(bf16),
        "dp_b1": p["dp_b1"].reshape(1, HID),
        "dp_w2": p["dp_w2"].reshape(1, HID),
        "dp_b2": p["dp_b2"].reshape(1, 1),
        "flow_w_ext": jnp.concatenate(
            [p["flow_w"], jnp.zeros((HID // 2, HID // 2), f32)], axis=0).astype(bf16),
        "flow_b": p["flow_b"].reshape(1, HID // 2),
        "dec_pre_w": p["dec_pre_w"].astype(bf16),
        "dec_pre_b": p["dec_pre_b"].reshape(1, C_DEC0),
        "dec_A": jnp.stack([A_prev, A_cur, A_next]).astype(bf16),
        "dec_b1": jnp.tile(p["dec_b1"], UPSAMPLE).reshape(1, 4 * C_DEC1),
        "dec_B": jnp.stack([B_prev, B_cur, B_next]).astype(bf16),
        "dec_b2": p["dec_b2"].reshape(1, 1),
    }


def sinusoidal_pe(t, d):
    pos = jnp.arange(t, dtype=jnp.float32)[:, None]
    div = jnp.exp(jnp.arange(0, d, 2, dtype=jnp.float32) * (-math.log(10000.0) / d))
    pe = jnp.zeros((t, d), jnp.float32)
    pe = pe.at[:, 0::2].set(jnp.sin(pos * div))
    pe = pe.at[:, 1::2].set(jnp.cos(pos * div))
    return pe


# ------------------------------ forward pass ----------------------------------
def vits_forward(pk, text, text_length):
    """text: (T_text,) int32, text_length: () int32 -> (wav (T_wav,), y_length ())."""
    t = text.shape[0]

    # ---- glue: embedding gather + positional encoding + pad mask (tiny)
    x = pk["emb"][text] * math.sqrt(HID)
    x = x + sinusoidal_pe(t, HID)
    x_mask = (jnp.arange(t) < text_length).astype(jnp.float32)  # 1 - make_pad_mask
    mcol = x_mask[:, None]
    mrow = x_mask[None, :]

    # ---- fused Pallas call 1: encoder stack + proj(m_p) + duration head
    m_p, logw = text_side(x, mcol, mrow, pk)

    # ---- glue: durations -> monotonic path (_generate_path), cheap elementwise
    w = jnp.exp(logw[:, 0]) * x_mask * ALPHA
    dur = jnp.ceil(w)
    y_lengths = jnp.maximum(jnp.sum(dur), 1.0).astype(jnp.int32)
    cum = jnp.cumsum(dur)
    frames = jnp.arange(T_FEATS, dtype=jnp.float32)[:, None]    # (TF, 1)
    attn = ((frames < cum[None, :]) & (frames >= (cum - dur)[None, :]))
    attn = attn.astype(jnp.float32) * x_mask[None, :]           # (TF, T)
    # NOTE: frame axis fixed at T_FEATS, mirroring the ONNX export's hardcoded
    # make_pad_mask([512]) (y_mask all ones); durations past T_FEATS truncate.

    # ---- fused Pallas call 2: attn@m_p + flow inverse + decoder (upsample fused)
    wav4 = frame_side(attn, m_p, pk)                            # (TF, UPSAMPLE)
    wav = wav4.reshape(-1)                                      # wav.view(-1)
    y_length = 256 * y_lengths
    return wav, y_length


# ------------------------------ main -------------------------------------------
if __name__ == "__main__":
    key = jax.random.PRNGKey(0)
    pkey, tkey = jax.random.split(key)
    params = init_params(pkey)
    packed = pack_params(params)

    # deterministic small inputs, consistent with the module's (text, text_lengths)
    text = jax.random.randint(tkey, (T_TEXT,), 0, VOCAB, dtype=jnp.int32)
    text_length = jnp.asarray(12, dtype=jnp.int32)              # 12 valid of 16 tokens

    fwd = jax.jit(vits_forward)
    wav, y_length = fwd(packed, text, text_length)
    jax.block_until_ready(wav)
    jax.block_until_ready(y_length)

    assert wav.shape == (T_FEATS * UPSAMPLE,)
    assert bool(jnp.all(jnp.isfinite(wav)))
    print("KERNEL_OK")
</pallas_src>

<mosaic_0001>
module attributes {stable_mosaic.version = 11 : i64} {
  func.func @_text_side_kernel(%arg0: memref<16x32xf32, #tpu.memory_space<vmem>>, %arg1: memref<16x1xf32, #tpu.memory_space<vmem>>, %arg2: memref<1x16xf32, #tpu.memory_space<vmem>>, %arg3: memref<2x4x32x32xbf16, #tpu.memory_space<vmem>>, %arg4: memref<2x9x32xf32, #tpu.memory_space<vmem>>, %arg5: memref<2x32x64xbf16, #tpu.memory_space<vmem>>, %arg6: memref<2x64x32xbf16, #tpu.memory_space<vmem>>, %arg7: memref<2x1x64xf32, #tpu.memory_space<vmem>>, %arg8: memref<32x32xbf16, #tpu.memory_space<vmem>>, %arg9: memref<1x32xf32, #tpu.memory_space<vmem>>, %arg10: memref<3x32x32xbf16, #tpu.memory_space<vmem>>, %arg11: memref<1x32xf32, #tpu.memory_space<vmem>>, %arg12: memref<1x32xf32, #tpu.memory_space<vmem>>, %arg13: memref<1x1xf32, #tpu.memory_space<vmem>>, %arg14: memref<16x32xf32, #tpu.memory_space<vmem>>, %arg15: memref<16x1xf32, #tpu.memory_space<vmem>>) attributes {dimension_semantics = [], scalar_prefetch = 0 : i64, scratch_operands = 0 : i64, tpu.core_type = #tpu.core_type<tc>} {
    %c0 = arith.constant 0 : index
    %c0_0 = arith.constant 0 : index
    %0 = vector.load %arg0[%c0, %c0_0] : memref<16x32xf32, #tpu.memory_space<vmem>>, vector<16x32xf32>
    %c0_1 = arith.constant 0 : index
    %c0_2 = arith.constant 0 : index
    %1 = vector.load %arg1[%c0_1, %c0_2] : memref<16x1xf32, #tpu.memory_space<vmem>>, vector<16x1xf32>
    %c0_3 = arith.constant 0 : index
    %c0_4 = arith.constant 0 : index
    %2 = vector.load %arg2[%c0_3, %c0_4] : memref<1x16xf32, #tpu.memory_space<vmem>>, vector<1x16xf32>
    %cst = arith.constant 1.000000e+00 : f32
    %3 = vector.broadcast %cst : f32 to vector<1x16xf32>
    %4 = arith.subf %3, %2 : vector<1x16xf32>
    %cst_5 = arith.constant -1.000000e+09 : f32
    %5 = vector.broadcast %cst_5 : f32 to vector<1x16xf32>
    %6 = arith.mulf %5, %4 : vector<1x16xf32>
    %7 = tpu.iota {dimensions = array<i32: 1>} : vector<1x32xi32>
    %c0_6 = arith.constant 0 : index
    %c0_7 = arith.constant 0 : index
    %c0_8 = arith.constant 0 : index
    %c0_9 = arith.constant 0 : index
    %8 = vector.load %arg3[%c0_6, %c0_7, %c0_8, %c0_9] : memref<2x4x32x32xbf16, #tpu.memory_space<vmem>>, vector<1x4x32x32xbf16>
    %9 = vector.shape_cast %8 : vector<1x4x32x32xbf16> to vector<4x32x32xbf16>
    %c0_10 = arith.constant 0 : index
    %c0_11 = arith.constant 0 : index
    %c0_12 = arith.constant 0 : index
    %10 = vector.load %arg4[%c0_10, %c0_11, %c0_12] : memref<2x9x32xf32, #tpu.memory_space<vmem>>, vector<1x9x32xf32>
    %11 = vector.shape_cast %10 : vector<1x9x32xf32> to vector<9x32xf32>
    %12 = vector.extract_strided_slice %11 {offsets = [0, 0], sizes = [1, 32], strides = [1, 1]} : vector<9x32xf32> to vector<1x32xf32>
    %13 = vector.extract_strided_slice %11 {offsets = [1, 0], sizes = [1, 32], strides = [1, 1]} : vector<9x32xf32> to vector<1x32xf32>
    %14 = vector.extract_strided_slice %11 {offsets = [2, 0], sizes = [1, 32], strides = [1, 1]} : vector<9x32xf32> to vector<1x32xf32>
    %15 = vector.extract_strided_slice %11 {offsets = [3, 0], sizes = [1, 32], strides = [1, 1]} : vector<9x32xf32> to vector<1x32xf32>
    %16 = vector.extract_strided_slice %11 {offsets = [4, 0], sizes = [1, 32], strides = [1, 1]} : vector<9x32xf32> to vector<1x32xf32>
    %17 = vector.extract_strided_slice %11 {offsets = [5, 0], sizes = [1, 32], strides = [1, 1]} : vector<9x32xf32> to vector<1x32xf32>
    %18 = vector.extract_strided_slice %11 {offsets = [6, 0], sizes = [1, 32], strides = [1, 1]} : vector<9x32xf32> to vector<1x32xf32>
    %19 = vector.extract_strided_slice %11 {offsets = [7, 0], sizes = [1, 32], strides = [1, 1]} : vector<9x32xf32> to vector<1x32xf32>
    %20 = vector.extract_strided_slice %11 {offsets = [8, 0], sizes = [1, 32], strides = [1, 1]} : vector<9x32xf32> to vector<1x32xf32>
    %cst_13 = arith.constant dense<0.000000e+00> : vector<16xf32>
    %21 = vector.multi_reduction <add>, %0, %cst_13 [1] : vector<16x32xf32> to vector<16xf32>
    %22 = vector.shape_cast %21 : vector<16xf32> to vector<16x1xf32>
    %cst_14 = arith.constant 3.200000e+01 : f32
    %23 = vector.broadcast %cst_14 : f32 to vector<16x1xf32>
    %24 = arith.divf %22, %23 : vector<16x1xf32>
    %25 = vector.broadcast %24 : vector<16x1xf32> to vector<16x32xf32>
    %26 = arith.subf %0, %25 : vector<16x32xf32>
    %27 = arith.mulf %26, %26 : vector<16x32xf32>
    %cst_15 = arith.constant dense<0.000000e+00> : vector<16xf32>
    %28 = vector.multi_reduction <add>, %27, %cst_15 [1] : vector<16x32xf32> to vector<16xf32>
    %29 = vector.shape_cast %28 : vector<16xf32> to vector<16x1xf32>
    %cst_16 = arith.constant 3.200000e+01 : f32
    %30 = vector.broadcast %cst_16 : f32 to vector<16x1xf32>
    %31 = arith.divf %29, %30 : vector<16x1xf32>
    %32 = vector.broadcast %24 : vector<16x1xf32> to vector<16x32xf32>
    %33 = arith.subf %0, %32 : vector<16x32xf32>
    %cst_17 = arith.constant 9.99999974E-6 : f32
    %34 = vector.broadcast %cst_17 : f32 to vector<16x1xf32>
    %35 = arith.addf %31, %34 : vector<16x1xf32>
    %36 = math.rsqrt %35 : vector<16x1xf32>
    %37 = vector.broadcast %36 : vector<16x1xf32> to vector<16x32xf32>
    %38 = arith.mulf %33, %37 : vector<16x32xf32>
    %39 = vector.broadcast %16 : vector<1x32xf32> to vector<16x32xf32>
    %40 = arith.mulf %38, %39 : vector<16x32xf32>
    %41 = vector.broadcast %17 : vector<1x32xf32> to vector<16x32xf32>
    %42 = arith.addf %40, %41 : vector<16x32xf32>
    %43 = vector.extract_strided_slice %9 {offsets = [0, 0, 0], sizes = [1, 32, 32], strides = [1, 1, 1]} : vector<4x32x32xbf16> to vector<1x32x32xbf16>
    %44 = vector.shape_cast %43 : vector<1x32x32xbf16> to vector<32x32xbf16>
    %45 = arith.truncf %42 : vector<16x32xf32> to vector<16x32xbf16>
    %cst_18 = arith.constant dense<0.000000e+00> : vector<16x32xf32>
    %46 = tpu.matmul %45, %44, %cst_18 {dimension_numbers = #tpu.dot_dimension_numbers<[1], [0], [0], [1], [0, 0, 1, 1], [], []>} : vector<16x32xbf16>, vector<32x32xbf16>, vector<16x32xf32> -> vector<16x32xf32>
    %47 = vector.broadcast %12 : vector<1x32xf32> to vector<16x32xf32>
    %48 = arith.addf %46, %47 : vector<16x32xf32>
    %49 = vector.extract_strided_slice %9 {offsets = [1, 0, 0], sizes = [1, 32, 32], strides = [1, 1, 1]} : vector<4x32x32xbf16> to vector<1x32x32xbf16>
    %50 = vector.shape_cast %49 : vector<1x32x32xbf16> to vector<32x32xbf16>
    %51 = arith.truncf %42 : vector<16x32xf32> to vector<16x32xbf16>
    %cst_19 = arith.constant dense<0.000000e+00> : vector<16x32xf32>
    %52 = tpu.matmul %51, %50, %cst_19 {dimension_numbers = #tpu.dot_dimension_numbers<[1], [0], [0], [1], [0, 0, 1, 1], [], []>} : vector<16x32xbf16>, vector<32x32xbf16>, vector<16x32xf32> -> vector<16x32xf32>
    %53 = vector.broadcast %13 : vector<1x32xf32> to vector<16x32xf32>
    %54 = arith.addf %52, %53 : vector<16x32xf32>
    %55 = vector.extract_strided_slice %9 {offsets = [2, 0, 0], sizes = [1, 32, 32], strides = [1, 1, 1]} : vector<4x32x32xbf16> to vector<1x32x32xbf16>
    %56 = vector.shape_cast %55 : vector<1x32x32xbf16> to vector<32x32xbf16>
    %57 = arith.truncf %42 : vector<16x32xf32> to vector<16x32xbf16>
    %cst_20 = arith.constant dense<0.000000e+00> : vector<16x32xf32>
    %58 = tpu.matmul %57, %56, %cst_20 {dimension_numbers = #tpu.dot_dimension_numbers<[1], [0], [0], [1], [0, 0, 1, 1], [], []>} : vector<16x32xbf16>, vector<32x32xbf16>, vector<16x32xf32> -> vector<16x32xf32>
    %59 = vector.broadcast %14 : vector<1x32xf32> to vector<16x32xf32>
    %60 = arith.addf %58, %59 : vector<16x32xf32>
    %cst_21 = arith.constant 0.000000e+00 : f32
    %61 = vector.broadcast %cst_21 : f32 to vector<16x32xf32>
    %c0_i32 = arith.constant 0 : i32
    %62 = vector.broadcast %c0_i32 : i32 to vector<1x32xi32>
    %63 = arith.cmpi sge, %7, %62 : vector<1x32xi32>
    %c16_i32 = arith.constant 16 : i32
    %64 = vector.broadcast %c16_i32 : i32 to vector<1x32xi32>
    %65 = arith.cmpi slt, %7, %64 : vector<1x32xi32>
    %66 = arith.andi %63, %65 : vector<1x32xi1>
    %67 = arith.extui %66 : vector<1x32xi1> to vector<1x32xi32>
    %68 = arith.sitofp %67 : vector<1x32xi32> to vector<1x32xf32>
    %69 = vector.broadcast %68 : vector<1x32xf32> to vector<16x32xf32>
    %70 = arith.mulf %48, %69 : vector<16x32xf32>
    %71 = arith.truncf %70 : vector<16x32xf32> to vector<16x32xbf16>
    %72 = arith.truncf %54 : vector<16x32xf32> to vector<16x32xbf16>
    %cst_22 = arith.constant dense<0.000000e+00> : vector<16x16xf32>
    %73 = tpu.matmul %71, %72, %cst_22 {dimension_numbers = #tpu.dot_dimension_numbers<[1], [1], [0], [0], [0, 0, 1, 0], [], []>} : vector<16x32xbf16>, vector<16x32xbf16>, vector<16x16xf32> -> vector<16x16xf32>
    %cst_23 = arith.constant 2.500000e-01 : f32
    %74 = vector.broadcast %cst_23 : f32 to vector<16x16xf32>
    %75 = arith.mulf %73, %74 : vector<16x16xf32>
    %76 = vector.broadcast %6 : vector<1x16xf32> to vector<16x16xf32>
    %77 = arith.addf %75, %76 : vector<16x16xf32>
    %cst_24 = arith.constant dense<0xFF800000> : vector<16xf32>
    %78 = vector.multi_reduction <maximumf>, %77, %cst_24 [1] : vector<16x16xf32> to vector<16xf32>
    %79 = vector.shape_cast %78 : vector<16xf32> to vector<16x1xf32>
    %80 = vector.broadcast %79 : vector<16x1xf32> to vector<16x16xf32>
    %81 = arith.subf %77, %80 : vector<16x16xf32>
    %82 = math.exp %81 : vector<16x16xf32>
    %cst_25 = arith.constant dense<0.000000e+00> : vector<16xf32>
    %83 = vector.multi_reduction <add>, %82, %cst_25 [1] : vector<16x16xf32> to vector<16xf32>
    %84 = vector.shape_cast %83 : vector<16xf32> to vector<16x1xf32>
    %85 = tpu.reciprocal %84 {approx = true} : vector<16x1xf32> -> vector<16x1xf32>
    %86 = vector.broadcast %85 : vector<16x1xf32> to vector<16x16xf32>
    %87 = arith.mulf %82, %86 : vector<16x16xf32>
    %88 = vector.broadcast %68 : vector<1x32xf32> to vector<16x32xf32>
    %89 = arith.mulf %60, %88 : vector<16x32xf32>
    %90 = arith.truncf %87 : vector<16x16xf32> to vector<16x16xbf16>
    %91 = arith.truncf %89 : vector<16x32xf32> to vector<16x32xbf16>
    %cst_26 = arith.constant dense<0.000000e+00> : vector<16x32xf32>
    %92 = tpu.matmul %90, %91, %cst_26 {dimension_numbers = #tpu.dot_dimension_numbers<[1], [0], [0], [1], [0, 0, 1, 1], [], []>} : vector<16x16xbf16>, vector<16x32xbf16>, vector<16x32xf32> -> vector<16x32xf32>
    %93 = arith.addf %61, %92 : vector<16x32xf32>
    %c16_i32_27 = arith.constant 16 : i32
    %94 = vector.broadcast %c16_i32_27 : i32 to vector<1x32xi32>
    %95 = arith.cmpi sge, %7, %94 : vector<1x32xi32>
    %c32_i32 = arith.constant 32 : i32
    %96 = vector.broadcast %c32_i32 : i32 to vector<1x32xi32>
    %97 = arith.cmpi slt, %7, %96 : vector<1x32xi32>
    %98 = arith.andi %95, %97 : vector<1x32xi1>
    %99 = arith.extui %98 : vector<1x32xi1> to vector<1x32xi32>
    %100 = arith.sitofp %99 : vector<1x32xi32> to vector<1x32xf32>
    %101 = vector.broadcast %100 : vector<1x32xf32> to vector<16x32xf32>
    %102 = arith.mulf %48, %101 : vector<16x32xf32>
    %103 = arith.truncf %102 : vector<16x32xf32> to vector<16x32xbf16>
    %104 = arith.truncf %54 : vector<16x32xf32> to vector<16x32xbf16>
    %cst_28 = arith.constant dense<0.000000e+00> : vector<16x16xf32>
    %105 = tpu.matmul %103, %104, %cst_28 {dimension_numbers = #tpu.dot_dimension_numbers<[1], [1], [0], [0], [0, 0, 1, 0], [], []>} : vector<16x32xbf16>, vector<16x32xbf16>, vector<16x16xf32> -> vector<16x16xf32>
    %cst_29 = arith.constant 2.500000e-01 : f32
    %106 = vector.broadcast %cst_29 : f32 to vector<16x16xf32>
    %107 = arith.mulf %105, %106 : vector<16x16xf32>
    %108 = vector.broadcast %6 : vector<1x16xf32> to vector<16x16xf32>
    %109 = arith.addf %107, %108 : vector<16x16xf32>
    %cst_30 = arith.constant dense<0xFF800000> : vector<16xf32>
    %110 = vector.multi_reduction <maximumf>, %109, %cst_30 [1] : vector<16x16xf32> to vector<16xf32>
    %111 = vector.shape_cast %110 : vector<16xf32> to vector<16x1xf32>
    %112 = vector.broadcast %111 : vector<16x1xf32> to vector<16x16xf32>
    %113 = arith.subf %109, %112 : vector<16x16xf32>
    %114 = math.exp %113 : vector<16x16xf32>
    %cst_31 = arith.constant dense<0.000000e+00> : vector<16xf32>
    %115 = vector.multi_reduction <add>, %114, %cst_31 [1] : vector<16x16xf32> to vector<16xf32>
    %116 = vector.shape_cast %115 : vector<16xf32> to vector<16x1xf32>
    %117 = tpu.reciprocal %116 {approx = true} : vector<16x1xf32> -> vector<16x1xf32>
    %118 = vector.broadcast %117 : vector<16x1xf32> to vector<16x16xf32>
    %119 = arith.mulf %114, %118 : vector<16x16xf32>
    %120 = vector.broadcast %100 : vector<1x32xf32> to vector<16x32xf32>
    %121 = arith.mulf %60, %120 : vector<16x32xf32>
    %122 = arith.truncf %119 : vector<16x16xf32> to vector<16x16xbf16>
    %123 = arith.truncf %121 : vector<16x32xf32> to vector<16x32xbf16>
    %cst_32 = arith.constant dense<0.000000e+00> : vector<16x32xf32>
    %124 = tpu.matmul %122, %123, %cst_32 {dimension_numbers = #tpu.dot_dimension_numbers<[1], [0], [0], [1], [0, 0, 1, 1], [], []>} : vector<16x16xbf16>, vector<16x32xbf16>, vector<16x32xf32> -> vector<16x32xf32>
    %125 = arith.addf %93, %124 : vector<16x32xf32>
    %126 = vector.extract_strided_slice %9 {offsets = [3, 0, 0], sizes = [1, 32, 32], strides = [1, 1, 1]} : vector<4x32x32xbf16> to vector<1x32x32xbf16>
    %127 = vector.shape_cast %126 : vector<1x32x32xbf16> to vector<32x32xbf16>
    %128 = arith.truncf %125 : vector<16x32xf32> to vector<16x32xbf16>
    %cst_33 = arith.constant dense<0.000000e+00> : vector<16x32xf32>
    %129 = tpu.matmul %128, %127, %cst_33 {dimension_numbers = #tpu.dot_dimension_numbers<[1], [0], [0], [1], [0, 0, 1, 1], [], []>} : vector<16x32xbf16>, vector<32x32xbf16>, vector<16x32xf32> -> vector<16x32xf32>
    %130 = vector.broadcast %15 : vector<1x32xf32> to vector<16x32xf32>
    %131 = arith.addf %129, %130 : vector<16x32xf32>
    %132 = vector.broadcast %1 : vector<16x1xf32> to vector<16x32xf32>
    %133 = arith.mulf %131, %132 : vector<16x32xf32>
    %134 = arith.addf %0, %133 : vector<16x32xf32>
    %cst_34 = arith.constant dense<0.000000e+00> : vector<16xf32>
    %135 = vector.multi_reduction <add>, %134, %cst_34 [1] : vector<16x32xf32> to vector<16xf32>
    %136 = vector.shape_cast %135 : vector<16xf32> to vector<16x1xf32>
    %cst_35 = arith.constant 3.200000e+01 : f32
    %137 = vector.broadcast %cst_35 : f32 to vector<16x1xf32>
    %138 = arith.divf %136, %137 : vector<16x1xf32>
    %139 = vector.broadcast %138 : vector<16x1xf32> to vector<16x32xf32>
    %140 = arith.subf %134, %139 : vector<16x32xf32>
    %141 = arith.mulf %140, %140 : vector<16x32xf32>
    %cst_36 = arith.constant dense<0.000000e+00> : vector<16xf32>
    %142 = vector.multi_reduction <add>, %141, %cst_36 [1] : vector<16x32xf32> to vector<16xf32>
    %143 = vector.shape_cast %142 : vector<16xf32> to vector<16x1xf32>
    %cst_37 = arith.constant 3.200000e+01 : f32
    %144 = vector.broadcast %cst_37 : f32 to vector<16x1xf32>
    %145 = arith.divf %143, %144 : vector<16x1xf32>
    %146 = vector.broadcast %138 : vector<16x1xf32> to vector<16x32xf32>
    %147 = arith.subf %134, %146 : vector<16x32xf32>
    %cst_38 = arith.constant 9.99999974E-6 : f32
    %148 = vector.broadcast %cst_38 : f32 to vector<16x1xf32>
    %149 = arith.addf %145, %148 : vector<16x1xf32>
    %150 = math.rsqrt %149 : vector<16x1xf32>
    %151 = vector.broadcast %150 : vector<16x1xf32> to vector<16x32xf32>
    %152 = arith.mulf %147, %151 : vector<16x32xf32>
    %153 = vector.broadcast %18 : vector<1x32xf32> to vector<16x32xf32>
    %154 = arith.mulf %152, %153 : vector<16x32xf32>
    %155 = vector.broadcast %19 : vector<1x32xf32> to vector<16x32xf32>
    %156 = arith.addf %154, %155 : vector<16x32xf32>
    %c0_39 = arith.constant 0 : index
    %c0_40 = arith.constant 0 : index
    %c0_41 = arith.constant 0 : index
    %157 = vector.load %arg5[%c0_39, %c0_40, %c0_41] : memref<2x32x64xbf16, #tpu.memory_space<vmem>>, vector<1x32x64xbf16>
    %158 = vector.shape_cast %157 : vector<1x32x64xbf16> to vector<32x64xbf16>
    %159 = arith.truncf %156 : vector<16x32xf32> to vector<16x32xbf16>
    %cst_42 = arith.constant dense<0.000000e+00> : vector<16x64xf32>
    %160 = tpu.matmul %159, %158, %cst_42 {dimension_numbers = #tpu.dot_dimension_numbers<[1], [0], [0], [1], [0, 0, 1, 1], [], []>} : vector<16x32xbf16>, vector<32x64xbf16>, vector<16x64xf32> -> vector<16x64xf32>
    %c0_43 = arith.constant 0 : index
    %c0_44 = arith.constant 0 : index
    %c0_45 = arith.constant 0 : index
    %161 = vector.load %arg7[%c0_43, %c0_44, %c0_45] : memref<2x1x64xf32, #tpu.memory_space<vmem>>, vector<1x1x64xf32>
    %162 = vector.shape_cast %161 : vector<1x1x64xf32> to vector<1x64xf32>
    %163 = vector.broadcast %162 : vector<1x64xf32> to vector<16x64xf32>
    %164 = arith.addf %160, %163 : vector<16x64xf32>
    %cst_46 = arith.constant 0.000000e+00 : f32
    %165 = vector.broadcast %cst_46 : f32 to vector<16x64xf32>
    %166 = arith.maximumf %164, %165 : vector<16x64xf32>
    %c0_47 = arith.constant 0 : index
    %c0_48 = arith.constant 0 : index
    %c0_49 = arith.constant 0 : index
    %167 = vector.load %arg6[%c0_47, %c0_48, %c0_49] : memref<2x64x32xbf16, #tpu.memory_space<vmem>>, vector<1x64x32xbf16>
    %168 = vector.shape_cast %167 : vector<1x64x32xbf16> to vector<64x32xbf16>
    %169 = arith.truncf %166 : vector<16x64xf32> to vector<16x64xbf16>
    %cst_50 = arith.constant dense<0.000000e+00> : vector<16x32xf32>
    %170 = tpu.matmul %169, %168, %cst_50 {dimension_numbers = #tpu.dot_dimension_numbers<[1], [0], [0], [1], [0, 0, 1, 1], [], []>} : vector<16x64xbf16>, vector<64x32xbf16>, vector<16x32xf32> -> vector<16x32xf32>
    %171 = arith.addf %134, %170 : vector<16x32xf32>
    %172 = vector.broadcast %20 : vector<1x32xf32> to vector<16x32xf32>
    %173 = arith.addf %171, %172 : vector<16x32xf32>
    %174 = vector.broadcast %1 : vector<16x1xf32> to vector<16x32xf32>
    %175 = arith.mulf %173, %174 : vector<16x32xf32>
    %c1 = arith.constant 1 : index
    %c0_51 = arith.constant 0 : index
    %c0_52 = arith.constant 0 : index
    %c0_53 = arith.constant 0 : index
    %176 = vector.load %arg3[%c1, %c0_51, %c0_52, %c0_53] : memref<2x4x32x32xbf16, #tpu.memory_space<vmem>>, vector<1x4x32x32xbf16>
    %177 = vector.shape_cast %176 : vector<1x4x32x32xbf16> to vector<4x32x32xbf16>
    %c1_54 = arith.constant 1 : index
    %c0_55 = arith.constant 0 : index
    %c0_56 = arith.constant 0 : index
    %178 = vector.load %arg4[%c1_54, %c0_55, %c0_56] : memref<2x9x32xf32, #tpu.memory_space<vmem>>, vector<1x9x32xf32>
    %179 = vector.shape_cast %178 : vector<1x9x32xf32> to vector<9x32xf32>
    %180 = vector.extract_strided_slice %179 {offsets = [0, 0], sizes = [1, 32], strides = [1, 1]} : vector<9x32xf32> to vector<1x32xf32>
    %181 = vector.extract_strided_slice %179 {offsets = [1, 0], sizes = [1, 32], strides = [1, 1]} : vector<9x32xf32> to vector<1x32xf32>
    %182 = vector.extract_strided_slice %179 {offsets = [2, 0], sizes = [1, 32], strides = [1, 1]} : vector<9x32xf32> to vector<1x32xf32>
    %183 = vector.extract_strided_slice %179 {offsets = [3, 0], sizes = [1, 32], strides = [1, 1]} : vector<9x32xf32> to vector<1x32xf32>
    %184 = vector.extract_strided_slice %179 {offsets = [4, 0], sizes = [1, 32], strides = [1, 1]} : vector<9x32xf32> to vector<1x32xf32>
    %185 = vector.extract_strided_slice %179 {offsets = [5, 0], sizes = [1, 32], strides = [1, 1]} : vector<9x32xf32> to vector<1x32xf32>
    %186 = vector.extract_strided_slice %179 {offsets = [6, 0], sizes = [1, 32], strides = [1, 1]} : vector<9x32xf32> to vector<1x32xf32>
    %187 = vector.extract_strided_slice %179 {offsets = [7, 0], sizes = [1, 32], strides = [1, 1]} : vector<9x32xf32> to vector<1x32xf32>
    %188 = vector.extract_strided_slice %179 {offsets = [8, 0], sizes = [1, 32], strides = [1, 1]} : vector<9x32xf32> to vector<1x32xf32>
    %cst_57 = arith.constant dense<0.000000e+00> : vector<16xf32>
    %189 = vector.multi_reduction <add>, %175, %cst_57 [1] : vector<16x32xf32> to vector<16xf32>
    %190 = vector.shape_cast %189 : vector<16xf32> to vector<16x1xf32>
    %cst_58 = arith.constant 3.200000e+01 : f32
    %191 = vector.broadcast %cst_58 : f32 to vector<16x1xf32>
    %192 = arith.divf %190, %191 : vector<16x1xf32>
    %193 = vector.broadcast %192 : vector<16x1xf32> to vector<16x32xf32>
    %194 = arith.subf %175, %193 : vector<16x32xf32>
    %195 = arith.mulf %194, %194 : vector<16x32xf32>
    %cst_59 = arith.constant dense<0.000000e+00> : vector<16xf32>
    %196 = vector.multi_reduction <add>, %195, %cst_59 [1] : vector<16x32xf32> to vector<16xf32>
    %197 = vector.shape_cast %196 : vector<16xf32> to vector<16x1xf32>
    %cst_60 = arith.constant 3.200000e+01 : f32
    %198 = vector.broadcast %cst_60 : f32 to vector<16x1xf32>
    %199 = arith.divf %197, %198 : vector<16x1xf32>
    %200 = vector.broadcast %192 : vector<16x1xf32> to vector<16x32xf32>
    %201 = arith.subf %175, %200 : vector<16x32xf32>
    %cst_61 = arith.constant 9.99999974E-6 : f32
    %202 = vector.broadcast %cst_61 : f32 to vector<16x1xf32>
    %203 = arith.addf %199, %202 : vector<16x1xf32>
    %204 = math.rsqrt %203 : vector<16x1xf32>
    %205 = vector.broadcast %204 : vector<16x1xf32> to vector<16x32xf32>
    %206 = arith.mulf %201, %205 : vector<16x32xf32>
    %207 = vector.broadcast %184 : vector<1x32xf32> to vector<16x32xf32>
    %208 = arith.mulf %206, %207 : vector<16x32xf32>
    %209 = vector.broadcast %185 : vector<1x32xf32> to vector<16x32xf32>
    %210 = arith.addf %208, %209 : vector<16x32xf32>
    %211 = vector.extract_strided_slice %177 {offsets = [0, 0, 0], sizes = [1, 32, 32], strides = [1, 1, 1]} : vector<4x32x32xbf16> to vector<1x32x32xbf16>
    %212 = vector.shape_cast %211 : vector<1x32x32xbf16> to vector<32x32xbf16>
    %213 = arith.truncf %210 : vector<16x32xf32> to vector<16x32xbf16>
    %cst_62 = arith.constant dense<0.000000e+00> : vector<16x32xf32>
    %214 = tpu.matmul %213, %212, %cst_62 {dimension_numbers = #tpu.dot_dimension_numbers<[1], [0], [0], [1], [0, 0, 1, 1], [], []>} : vector<16x32xbf16>, vector<32x32xbf16>, vector<16x32xf32> -> vector<16x32xf32>
    %215 = vector.broadcast %180 : vector<1x32xf32> to vector<16x32xf32>
    %216 = arith.addf %214, %215 : vector<16x32xf32>
    %217 = vector.extract_strided_slice %177 {offsets = [1, 0, 0], sizes = [1, 32, 32], strides = [1, 1, 1]} : vector<4x32x32xbf16> to vector<1x32x32xbf16>
    %218 = vector.shape_cast %217 : vector<1x32x32xbf16> to vector<32x32xbf16>
    %219 = arith.truncf %210 : vector<16x32xf32> to vector<16x32xbf16>
    %cst_63 = arith.constant dense<0.000000e+00> : vector<16x32xf32>
    %220 = tpu.matmul %219, %218, %cst_63 {dimension_numbers = #tpu.dot_dimension_numbers<[1], [0], [0], [1], [0, 0, 1, 1], [], []>} : vector<16x32xbf16>, vector<32x32xbf16>, vector<16x32xf32> -> vector<16x32xf32>
    %221 = vector.broadcast %181 : vector<1x32xf32> to vector<16x32xf32>
    %222 = arith.addf %220, %221 : vector<16x32xf32>
    %223 = vector.extract_strided_slice %177 {offsets = [2, 0, 0], sizes = [1, 32, 32], strides = [1, 1, 1]} : vector<4x32x32xbf16> to vector<1x32x32xbf16>
    %224 = vector.shape_cast %223 : vector<1x32x32xbf16> to vector<32x32xbf16>
    %225 = arith.truncf %210 : vector<16x32xf32> to vector<16x32xbf16>
    %cst_64 = arith.constant dense<0.000000e+00> : vector<16x32xf32>
    %226 = tpu.matmul %225, %224, %cst_64 {dimension_numbers = #tpu.dot_dimension_numbers<[1], [0], [0], [1], [0, 0, 1, 1], [], []>} : vector<16x32xbf16>, vector<32x32xbf16>, vector<16x32xf32> -> vector<16x32xf32>
    %227 = vector.broadcast %182 : vector<1x32xf32> to vector<16x32xf32>
    %228 = arith.addf %226, %227 : vector<16x32xf32>
    %cst_65 = arith.constant 0.000000e+00 : f32
    %229 = vector.broadcast %cst_65 : f32 to vector<16x32xf32>
    %c0_i32_66 = arith.constant 0 : i32
    %230 = vector.broadcast %c0_i32_66 : i32 to vector<1x32xi32>
    %231 = arith.cmpi sge, %7, %230 : vector<1x32xi32>
    %c16_i32_67 = arith.constant 16 : i32
    %232 = vector.broadcast %c16_i32_67 : i32 to vector<1x32xi32>
    %233 = arith.cmpi slt, %7, %232 : vector<1x32xi32>
    %234 = arith.andi %231, %233 : vector<1x32xi1>
    %235 = arith.extui %234 : vector<1x32xi1> to vector<1x32xi32>
    %236 = arith.sitofp %235 : vector<1x32xi32> to vector<1x32xf32>
    %237 = vector.broadcast %236 : vector<1x32xf32> to vector<16x32xf32>
    %238 = arith.mulf %216, %237 : vector<16x32xf32>
    %239 = arith.truncf %238 : vector<16x32xf32> to vector<16x32xbf16>
    %240 = arith.truncf %222 : vector<16x32xf32> to vector<16x32xbf16>
    %cst_68 = arith.constant dense<0.000000e+00> : vector<16x16xf32>
    %241 = tpu.matmul %239, %240, %cst_68 {dimension_numbers = #tpu.dot_dimension_numbers<[1], [1], [0], [0], [0, 0, 1, 0], [], []>} : vector<16x32xbf16>, vector<16x32xbf16>, vector<16x16xf32> -> vector<16x16xf32>
    %cst_69 = arith.constant 2.500000e-01 : f32
    %242 = vector.broadcast %cst_69 : f32 to vector<16x16xf32>
    %243 = arith.mulf %241, %242 : vector<16x16xf32>
    %244 = vector.broadcast %6 : vector<1x16xf32> to vector<16x16xf32>
    %245 = arith.addf %243, %244 : vector<16x16xf32>
    %cst_70 = arith.constant dense<0xFF800000> : vector<16xf32>
    %246 = vector.multi_reduction <maximumf>, %245, %cst_70 [1] : vector<16x16xf32> to vector<16xf32>
    %247 = vector.shape_cast %246 : vector<16xf32> to vector<16x1xf32>
    %248 = vector.broadcast %247 : vector<16x1xf32> to vector<16x16xf32>
    %249 = arith.subf %245, %248 : vector<16x16xf32>
    %250 = math.exp %249 : vector<16x16xf32>
    %cst_71 = arith.constant dense<0.000000e+00> : vector<16xf32>
    %251 = vector.multi_reduction <add>, %250, %cst_71 [1] : vector<16x16xf32> to vector<16xf32>
    %252 = vector.shape_cast %251 : vector<16xf32> to vector<16x1xf32>
    %253 = tpu.reciprocal %252 {approx = true} : vector<16x1xf32> -> vector<16x1xf32>
    %254 = vector.broadcast %253 : vector<16x1xf32> to vector<16x16xf32>
    %255 = arith.mulf %250, %254 : vector<16x16xf32>
    %256 = vector.broadcast %236 : vector<1x32xf32> to vector<16x32xf32>
    %257 = arith.mulf %228, %256 : vector<16x32xf32>
    %258 = arith.truncf %255 : vector<16x16xf32> to vector<16x16xbf16>
    %259 = arith.truncf %257 : vector<16x32xf32> to vector<16x32xbf16>
    %cst_72 = arith.constant dense<0.000000e+00> : vector<16x32xf32>
    %260 = tpu.matmul %258, %259, %cst_72 {dimension_numbers = #tpu.dot_dimension_numbers<[1], [0], [0], [1], [0, 0, 1, 1], [], []>} : vector<16x16xbf16>, vector<16x32xbf16>, vector<16x32xf32> -> vector<16x32xf32>
    %261 = arith.addf %229, %260 : vector<16x32xf32>
    %c16_i32_73 = arith.constant 16 : i32
    %262 = vector.broadcast %c16_i32_73 : i32 to vector<1x32xi32>
    %263 = arith.cmpi sge, %7, %262 : vector<1x32xi32>
    %c32_i32_74 = arith.constant 32 : i32
    %264 = vector.broadcast %c32_i32_74 : i32 to vector<1x32xi32>
    %265 = arith.cmpi slt, %7, %264 : vector<1x32xi32>
    %266 = arith.andi %263, %265 : vector<1x32xi1>
    %267 = arith.extui %266 : vector<1x32xi1> to vector<1x32xi32>
    %268 = arith.sitofp %267 : vector<1x32xi32> to vector<1x32xf32>
    %269 = vector.broadcast %268 : vector<1x32xf32> to vector<16x32xf32>
    %270 = arith.mulf %216, %269 : vector<16x32xf32>
    %271 = arith.truncf %270 : vector<16x32xf32> to vector<16x32xbf16>
    %272 = arith.truncf %222 : vector<16x32xf32> to vector<16x32xbf16>
    %cst_75 = arith.constant dense<0.000000e+00> : vector<16x16xf32>
    %273 = tpu.matmul %271, %272, %cst_75 {dimension_numbers = #tpu.dot_dimension_numbers<[1], [1], [0], [0], [0, 0, 1, 0], [], []>} : vector<16x32xbf16>, vector<16x32xbf16>, vector<16x16xf32> -> vector<16x16xf32>
    %cst_76 = arith.constant 2.500000e-01 : f32
    %274 = vector.broadcast %cst_76 : f32 to vector<16x16xf32>
    %275 = arith.mulf %273, %274 : vector<16x16xf32>
    %276 = vector.broadcast %6 : vector<1x16xf32> to vector<16x16xf32>
    %277 = arith.addf %275, %276 : vector<16x16xf32>
    %cst_77 = arith.constant dense<0xFF800000> : vector<16xf32>
    %278 = vector.multi_reduction <maximumf>, %277, %cst_77 [1] : vector<16x16xf32> to vector<16xf32>
    %279 = vector.shape_cast %278 : vector<16xf32> to vector<16x1xf32>
    %280 = vector.broadcast %279 : vector<16x1xf32> to vector<16x16xf32>
    %281 = arith.subf %277, %280 : vector<16x16xf32>
    %282 = math.exp %281 : vector<16x16xf32>
    %cst_78 = arith.constant dense<0.000000e+00> : vector<16xf32>
    %283 = vector.multi_reduction <add>, %282, %cst_78 [1] : vector<16x16xf32> to vector<16xf32>
    %284 = vector.shape_cast %283 : vector<16xf32> to vector<16x1xf32>
    %285 = tpu.reciprocal %284 {approx = true} : vector<16x1xf32> -> vector<16x1xf32>
    %286 = vector.broadcast %285 : vector<16x1xf32> to vector<16x16xf32>
    %287 = arith.mulf %282, %286 : vector<16x16xf32>
    %288 = vector.broadcast %268 : vector<1x32xf32> to vector<16x32xf32>
    %289 = arith.mulf %228, %288 : vector<16x32xf32>
    %290 = arith.truncf %287 : vector<16x16xf32> to vector<16x16xbf16>
    %291 = arith.truncf %289 : vector<16x32xf32> to vector<16x32xbf16>
    %cst_79 = arith.constant dense<0.000000e+00> : vector<16x32xf32>
    %292 = tpu.matmul %290, %291, %cst_79 {dimension_numbers = #tpu.dot_dimension_numbers<[1], [0], [0], [1], [0, 0, 1, 1], [], []>} : vector<16x16xbf16>, vector<16x32xbf16>, vector<16x32xf32> -> vector<16x32xf32>
    %293 = arith.addf %261, %292 : vector<16x32xf32>
    %294 = vector.extract_strided_slice %177 {offsets = [3, 0, 0], sizes = [1, 32, 32], strides = [1, 1, 1]} : vector<4x32x32xbf16> to vector<1x32x32xbf16>
    %295 = vector.shape_cast %294 : vector<1x32x32xbf16> to vector<32x32xbf16>
    %296 = arith.truncf %293 : vector<16x32xf32> to vector<16x32xbf16>
    %cst_80 = arith.constant dense<0.000000e+00> : vector<16x32xf32>
    %297 = tpu.matmul %296, %295, %cst_80 {dimension_numbers = #tpu.dot_dimension_numbers<[1], [0], [0], [1], [0, 0, 1, 1], [], []>} : vector<16x32xbf16>, vector<32x32xbf16>, vector<16x32xf32> -> vector<16x32xf32>
    %298 = vector.broadcast %183 : vector<1x32xf32> to vector<16x32xf32>
    %299 = arith.addf %297, %298 : vector<16x32xf32>
    %300 = vector.broadcast %1 : vector<16x1xf32> to vector<16x32xf32>
    %301 = arith.mulf %299, %300 : vector<16x32xf32>
    %302 = arith.addf %175, %301 : vector<16x32xf32>
    %cst_81 = arith.constant dense<0.000000e+00> : vector<16xf32>
    %303 = vector.multi_reduction <add>, %302, %cst_81 [1] : vector<16x32xf32> to vector<16xf32>
    %304 = vector.shape_cast %303 : vector<16xf32> to vector<16x1xf32>
    %cst_82 = arith.constant 3.200000e+01 : f32
    %305 = vector.broadcast %cst_82 : f32 to vector<16x1xf32>
    %306 = arith.divf %304, %305 : vector<16x1xf32>
    %307 = vector.broadcast %306 : vector<16x1xf32> to vector<16x32xf32>
    %308 = arith.subf %302, %307 : vector<16x32xf32>
    %309 = arith.mulf %308, %308 : vector<16x32xf32>
    %cst_83 = arith.constant dense<0.000000e+00> : vector<16xf32>
    %310 = vector.multi_reduction <add>, %309, %cst_83 [1] : vector<16x32xf32> to vector<16xf32>
    %311 = vector.shape_cast %310 : vector<16xf32> to vector<16x1xf32>
    %cst_84 = arith.constant 3.200000e+01 : f32
    %312 = vector.broadcast %cst_84 : f32 to vector<16x1xf32>
    %313 = arith.divf %311, %312 : vector<16x1xf32>
    %314 = vector.broadcast %306 : vector<16x1xf32> to vector<16x32xf32>
    %315 = arith.subf %302, %314 : vector<16x32xf32>
    %cst_85 = arith.constant 9.99999974E-6 : f32
    %316 = vector.broadcast %cst_85 : f32 to vector<16x1xf32>
    %317 = arith.addf %313, %316 : vector<16x1xf32>
    %318 = math.rsqrt %317 : vector<16x1xf32>
    %319 = vector.broadcast %318 : vector<16x1xf32> to vector<16x32xf32>
    %320 = arith.mulf %315, %319 : vector<16x32xf32>
    %321 = vector.broadcast %186 : vector<1x32xf32> to vector<16x32xf32>
    %322 = arith.mulf %320, %321 : vector<16x32xf32>
    %323 = vector.broadcast %187 : vector<1x32xf32> to vector<16x32xf32>
    %324 = arith.addf %322, %323 : vector<16x32xf32>
    %c1_86 = arith.constant 1 : index
    %c0_87 = arith.constant 0 : index
    %c0_88 = arith.constant 0 : index
    %325 = vector.load %arg5[%c1_86, %c0_87, %c0_88] : memref<2x32x64xbf16, #tpu.memory_space<vmem>>, vector<1x32x64xbf16>
    %326 = vector.shape_cast %325 : vector<1x32x64xbf16> to vector<32x64xbf16>
    %327 = arith.truncf %324 : vector<16x32xf32> to vector<16x32xbf16>
    %cst_89 = arith.constant dense<0.000000e+00> : vector<16x64xf32>
    %328 = tpu.matmul %327, %326, %cst_89 {dimension_numbers = #tpu.dot_dimension_numbers<[1], [0], [0], [1], [0, 0, 1, 1], [], []>} : vector<16x32xbf16>, vector<32x64xbf16>, vector<16x64xf32> -> vector<16x64xf32>
    %c1_90 = arith.constant 1 : index
    %c0_91 = arith.constant 0 : index
    %c0_92 = arith.constant 0 : index
    %329 = vector.load %arg7[%c1_90, %c0_91, %c0_92] : memref<2x1x64xf32, #tpu.memory_space<vmem>>, vector<1x1x64xf32>
    %330 = vector.shape_cast %329 : vector<1x1x64xf32> to vector<1x64xf32>
    %331 = vector.broadcast %330 : vector<1x64xf32> to vector<16x64xf32>
    %332 = arith.addf %328, %331 : vector<16x64xf32>
    %cst_93 = arith.constant 0.000000e+00 : f32
    %333 = vector.broadcast %cst_93 : f32 to vector<16x64xf32>
    %334 = arith.maximumf %332, %333 : vector<16x64xf32>
    %c1_94 = arith.constant 1 : index
    %c0_95 = arith.constant 0 : index
    %c0_96 = arith.constant 0 : index
    %335 = vector.load %arg6[%c1_94, %c0_95, %c0_96] : memref<2x64x32xbf16, #tpu.memory_space<vmem>>, vector<1x64x32xbf16>
    %336 = vector.shape_cast %335 : vector<1x64x32xbf16> to vector<64x32xbf16>
    %337 = arith.truncf %334 : vector<16x64xf32> to vector<16x64xbf16>
    %cst_97 = arith.constant dense<0.000000e+00> : vector<16x32xf32>
    %338 = tpu.matmul %337, %336, %cst_97 {dimension_numbers = #tpu.dot_dimension_numbers<[1], [0], [0], [1], [0, 0, 1, 1], [], []>} : vector<16x64xbf16>, vector<64x32xbf16>, vector<16x32xf32> -> vector<16x32xf32>
    %339 = arith.addf %302, %338 : vector<16x32xf32>
    %340 = vector.broadcast %188 : vector<1x32xf32> to vector<16x32xf32>
    %341 = arith.addf %339, %340 : vector<16x32xf32>
    %342 = vector.broadcast %1 : vector<16x1xf32> to vector<16x32xf32>
    %343 = arith.mulf %341, %342 : vector<16x32xf32>
    %c0_98 = arith.constant 0 : index
    %c0_99 = arith.constant 0 : index
    %344 = vector.load %arg8[%c0_98, %c0_99] : memref<32x32xbf16, #tpu.memory_space<vmem>>, vector<32x32xbf16>
    %345 = arith.truncf %343 : vector<16x32xf32> to vector<16x32xbf16>
    %cst_100 = arith.constant dense<0.000000e+00> : vector<16x32xf32>
    %346 = tpu.matmul %345, %344, %cst_100 {dimension_numbers = #tpu.dot_dimension_numbers<[1], [0], [0], [1], [0, 0, 1, 1], [], []>} : vector<16x32xbf16>, vector<32x32xbf16>, vector<16x32xf32> -> vector<16x32xf32>
    %c0_101 = arith.constant 0 : index
    %c0_102 = arith.constant 0 : index
    %347 = vector.load %arg9[%c0_101, %c0_102] : memref<1x32xf32, #tpu.memory_space<vmem>>, vector<1x32xf32>
    %348 = vector.broadcast %347 : vector<1x32xf32> to vector<16x32xf32>
    %349 = arith.addf %346, %348 : vector<16x32xf32>
    %350 = vector.broadcast %1 : vector<16x1xf32> to vector<16x32xf32>
    %351 = arith.mulf %349, %350 : vector<16x32xf32>
    %c0_103 = arith.constant 0 : index
    %c0_104 = arith.constant 0 : index
    %352 = vector.load %arg14[%c0_103, %c0_104] : memref<16x32xf32, #tpu.memory_space<vmem>>, vector<16x32xf32>
    tpu.vector_store %arg14[%c0_103, %c0_104], %351 {strides = array<i32>} : memref<16x32xf32, #tpu.memory_space<vmem>>, vector<16x32xf32>,
    %353 = vector.broadcast %1 : vector<16x1xf32> to vector<16x32xf32>
    %354 = arith.mulf %343, %353 : vector<16x32xf32>
    %355 = tpu.iota {dimensions = array<i32: 0>} : vector<16x16xi32>
    %356 = tpu.iota {dimensions = array<i32: 1>} : vector<16x16xi32>
    %c1_i32 = arith.constant 1 : i32
    %357 = vector.broadcast %c1_i32 : i32 to vector<16x16xi32>
    %358 = arith.addi %356, %357 : vector<16x16xi32>
    %359 = arith.cmpi eq, %355, %358 : vector<16x16xi32>
    %360 = arith.extui %359 : vector<16x16xi1> to vector<16x16xi32>
    %361 = arith.sitofp %360 : vector<16x16xi32> to vector<16x16xf32>
    %c1_i32_105 = arith.constant 1 : i32
    %362 = vector.broadcast %c1_i32_105 : i32 to vector<16x16xi32>
    %363 = arith.addi %355, %362 : vector<16x16xi32>
    %364 = arith.cmpi eq, %356, %363 : vector<16x16xi32>
    %365 = arith.extui %364 : vector<16x16xi1> to vector<16x16xi32>
    %366 = arith.sitofp %365 : vector<16x16xi32> to vector<16x16xf32>
    %367 = arith.truncf %361 : vector<16x16xf32> to vector<16x16xbf16>
    %368 = arith.truncf %354 : vector<16x32xf32> to vector<16x32xbf16>
    %cst_106 = arith.constant dense<0.000000e+00> : vector<16x32xf32>
    %369 = tpu.matmul %367, %368, %cst_106 {dimension_numbers = #tpu.dot_dimension_numbers<[1], [0], [0], [1], [0, 0, 1, 1], [], []>} : vector<16x16xbf16>, vector<16x32xbf16>, vector<16x32xf32> -> vector<16x32xf32>
    %370 = arith.truncf %366 : vector<16x16xf32> to vector<16x16xbf16>
    %371 = arith.truncf %354 : vector<16x32xf32> to vector<16x32xbf16>
    %cst_107 = arith.constant dense<0.000000e+00> : vector<16x32xf32>
    %372 = tpu.matmul %370, %371, %cst_107 {dimension_numbers = #tpu.dot_dimension_numbers<[1], [0], [0], [1], [0, 0, 1, 1], [], []>} : vector<16x16xbf16>, vector<16x32xbf16>, vector<16x32xf32> -> vector<16x32xf32>
    %c0_108 = arith.constant 0 : index
    %c0_109 = arith.constant 0 : index
    %c0_110 = arith.constant 0 : index
    %373 = vector.load %arg10[%c0_108, %c0_109, %c0_110] : memref<3x32x32xbf16, #tpu.memory_space<vmem>>, vector<1x32x32xbf16>
    %374 = vector.shape_cast %373 : vector<1x32x32xbf16> to vector<32x32xbf16>
    %375 = arith.truncf %369 : vector<16x32xf32> to vector<16x32xbf16>
    %cst_111 = arith.constant dense<0.000000e+00> : vector<16x32xf32>
    %376 = tpu.matmul %375, %374, %cst_111 {dimension_numbers = #tpu.dot_dimension_numbers<[1], [0], [0], [1], [0, 0, 1, 1], [], []>} : vector<16x32xbf16>, vector<32x32xbf16>, vector<16x32xf32> -> vector<16x32xf32>
    %c1_112 = arith.constant 1 : index
    %c0_113 = arith.constant 0 : index
    %c0_114 = arith.constant 0 : index
    %377 = vector.load %arg10[%c1_112, %c0_113, %c0_114] : memref<3x32x32xbf16, #tpu.memory_space<vmem>>, vector<1x32x32xbf16>
    %378 = vector.shape_cast %377 : vector<1x32x32xbf16> to vector<32x32xbf16>
    %379 = arith.truncf %354 : vector<16x32xf32> to vector<16x32xbf16>
    %cst_115 = arith.constant dense<0.000000e+00> : vector<16x32xf32>
    %380 = tpu.matmul %379, %378, %cst_115 {dimension_numbers = #tpu.dot_dimension_numbers<[1], [0], [0], [1], [0, 0, 1, 1], [], []>} : vector<16x32xbf16>, vector<32x32xbf16>, vector<16x32xf32> -> vector<16x32xf32>
    %381 = arith.addf %376, %380 : vector<16x32xf32>
    %c2 = arith.constant 2 : index
    %c0_116 = arith.constant 0 : index
    %c0_117 = arith.constant 0 : index
    %382 = vector.load %arg10[%c2, %c0_116, %c0_117] : memref<3x32x32xbf16, #tpu.memory_space<vmem>>, vector<1x32x32xbf16>
    %383 = vector.shape_cast %382 : vector<1x32x32xbf16> to vector<32x32xbf16>
    %384 = arith.truncf %372 : vector<16x32xf32> to vector<16x32xbf16>
    %cst_118 = arith.constant dense<0.000000e+00> : vector<16x32xf32>
    %385 = tpu.matmul %384, %383, %cst_118 {dimension_numbers = #tpu.dot_dimension_numbers<[1], [0], [0], [1], [0, 0, 1, 1], [], []>} : vector<16x32xbf16>, vector<32x32xbf16>, vector<16x32xf32> -> vector<16x32xf32>
    %386 = arith.addf %381, %385 : vector<16x32xf32>
    %c0_119 = arith.constant 0 : index
    %c0_120 = arith.constant 0 : index
    %387 = vector.load %arg11[%c0_119, %c0_120] : memref<1x32xf32, #tpu.memory_space<vmem>>, vector<1x32xf32>
    %388 = vector.broadcast %387 : vector<1x32xf32> to vector<16x32xf32>
    %389 = arith.addf %386, %388 : vector<16x32xf32>
    %cst_121 = arith.constant 0.000000e+00 : f32
    %390 = vector.broadcast %cst_121 : f32 to vector<16x32xf32>
    %391 = arith.maximumf %389, %390 : vector<16x32xf32>
    %c0_122 = arith.constant 0 : index
    %c0_123 = arith.constant 0 : index
    %392 = vector.load %arg12[%c0_122, %c0_123] : memref<1x32xf32, #tpu.memory_space<vmem>>, vector<1x32xf32>
    %393 = vector.broadcast %392 : vector<1x32xf32> to vector<16x32xf32>
    %394 = arith.mulf %391, %393 : vector<16x32xf32>
    %cst_124 = arith.constant dense<0.000000e+00> : vector<16xf32>
    %395 = vector.multi_reduction <add>, %394, %cst_124 [1] : vector<16x32xf32> to vector<16xf32>
    %396 = vector.shape_cast %395 : vector<16xf32> to vector<16x1xf32>
    %c0_125 = arith.constant 0 : index
    %c0_126 = arith.constant 0 : index
    %397 = vector.load %arg13[%c0_125, %c0_126] : memref<1x1xf32, #tpu.memory_space<vmem>>, vector<1x1xf32>
    %398 = vector.broadcast %397 : vector<1x1xf32> to vector<16x1xf32>
    %399 = arith.addf %396, %398 : vector<16x1xf32>
    %c0_127 = arith.constant 0 : index
    %c0_128 = arith.constant 0 : index
    %400 = vector.load %arg15[%c0_127, %c0_128] : memref<16x1xf32, #tpu.memory_space<vmem>>, vector<16x1xf32>
    tpu.vector_store %arg15[%c0_127, %c0_128], %399 {strides = array<i32>} : memref<16x1xf32, #tpu.memory_space<vmem>>, vector<16x1xf32>,
    return
  }
}

module attributes {stable_mosaic.version = 11 : i64} {
  func.func @_frame_side_kernel(%arg0: memref<64x16xf32, #tpu.memory_space<vmem>>, %arg1: memref<16x32xf32, #tpu.memory_space<vmem>>, %arg2: memref<32x16xbf16, #tpu.memory_space<vmem>>, %arg3: memref<1x16xf32, #tpu.memory_space<vmem>>, %arg4: memref<32x32xbf16, #tpu.memory_space<vmem>>, %arg5: memref<1x32xf32, #tpu.memory_space<vmem>>, %arg6: memref<3x32x64xbf16, #tpu.memory_space<vmem>>, %arg7: memref<1x64xf32, #tpu.memory_space<vmem>>, %arg8: memref<3x64x4xbf16, #tpu.memory_space<vmem>>, %arg9: memref<1x1xf32, #tpu.memory_space<vmem>>, %arg10: memref<64x4xf32, #tpu.memory_space<vmem>>) attributes {dimension_semantics = [], scalar_prefetch = 0 : i64, scratch_operands = 0 : i64, tpu.core_type = #tpu.core_type<tc>} {
    %c0 = arith.constant 0 : index
    %c0_0 = arith.constant 0 : index
    %0 = vector.load %arg0[%c0, %c0_0] : memref<64x16xf32, #tpu.memory_space<vmem>>, vector<64x16xf32>
    %c0_1 = arith.constant 0 : index
    %c0_2 = arith.constant 0 : index
    %1 = vector.load %arg1[%c0_1, %c0_2] : memref<16x32xf32, #tpu.memory_space<vmem>>, vector<16x32xf32>
    %2 = arith.truncf %0 : vector<64x16xf32> to vector<64x16xbf16>
    %3 = arith.truncf %1 : vector<16x32xf32> to vector<16x32xbf16>
    %cst = arith.constant dense<0.000000e+00> : vector<64x32xf32>
    %4 = tpu.matmul %2, %3, %cst {dimension_numbers = #tpu.dot_dimension_numbers<[1], [0], [0], [1], [0, 0, 1, 1], [], []>} : vector<64x16xbf16>, vector<16x32xbf16>, vector<64x32xf32> -> vector<64x32xf32>
    %c0_3 = arith.constant 0 : index
    %c0_4 = arith.constant 0 : index
    %5 = vector.load %arg2[%c0_3, %c0_4] : memref<32x16xbf16, #tpu.memory_space<vmem>>, vector<32x16xbf16>
    %6 = arith.truncf %4 : vector<64x32xf32> to vector<64x32xbf16>
    %cst_5 = arith.constant dense<0.000000e+00> : vector<64x16xf32>
    %7 = tpu.matmul %6, %5, %cst_5 {dimension_numbers = #tpu.dot_dimension_numbers<[1], [0], [0], [1], [0, 0, 1, 1], [], []>} : vector<64x32xbf16>, vector<32x16xbf16>, vector<64x16xf32> -> vector<64x16xf32>
    %c0_6 = arith.constant 0 : index
    %c0_7 = arith.constant 0 : index
    %8 = vector.load %arg3[%c0_6, %c0_7] : memref<1x16xf32, #tpu.memory_space<vmem>>, vector<1x16xf32>
    %9 = vector.broadcast %8 : vector<1x16xf32> to vector<64x16xf32>
    %10 = arith.addf %7, %9 : vector<64x16xf32>
    %11 = math.tanh %10 : vector<64x16xf32>
    %cst_8 = arith.constant 0.000000e+00 : f32
    %12 = vector.broadcast %cst_8 : f32 to vector<64x16xf32>
    %13 = tpu.concatenate %12, %11 in 1 : vector<64x16xf32>, vector<64x16xf32> -> vector<64x32xf32>
    %14 = arith.subf %4, %13 : vector<64x32xf32>
    %c0_9 = arith.constant 0 : index
    %c0_10 = arith.constant 0 : index
    %15 = vector.load %arg4[%c0_9, %c0_10] : memref<32x32xbf16, #tpu.memory_space<vmem>>, vector<32x32xbf16>
    %16 = arith.truncf %14 : vector<64x32xf32> to vector<64x32xbf16>
    %cst_11 = arith.constant dense<0.000000e+00> : vector<64x32xf32>
    %17 = tpu.matmul %16, %15, %cst_11 {dimension_numbers = #tpu.dot_dimension_numbers<[1], [0], [0], [1], [0, 0, 1, 1], [], []>} : vector<64x32xbf16>, vector<32x32xbf16>, vector<64x32xf32> -> vector<64x32xf32>
    %c0_12 = arith.constant 0 : index
    %c0_13 = arith.constant 0 : index
    %18 = vector.load %arg5[%c0_12, %c0_13] : memref<1x32xf32, #tpu.memory_space<vmem>>, vector<1x32xf32>
    %19 = vector.broadcast %18 : vector<1x32xf32> to vector<64x32xf32>
    %20 = arith.addf %17, %19 : vector<64x32xf32>
    %21 = tpu.iota {dimensions = array<i32: 0>} : vector<64x64xi32>
    %22 = tpu.iota {dimensions = array<i32: 1>} : vector<64x64xi32>
    %c1_i32 = arith.constant 1 : i32
    %23 = vector.broadcast %c1_i32 : i32 to vector<64x64xi32>
    %24 = arith.addi %22, %23 : vector<64x64xi32>
    %25 = arith.cmpi eq, %21, %24 : vector<64x64xi32>
    %26 = arith.extui %25 : vector<64x64xi1> to vector<64x64xi32>
    %27 = arith.sitofp %26 : vector<64x64xi32> to vector<64x64xf32>
    %c1_i32_14 = arith.constant 1 : i32
    %28 = vector.broadcast %c1_i32_14 : i32 to vector<64x64xi32>
    %29 = arith.addi %21, %28 : vector<64x64xi32>
    %30 = arith.cmpi eq, %22, %29 : vector<64x64xi32>
    %31 = arith.extui %30 : vector<64x64xi1> to vector<64x64xi32>
    %32 = arith.sitofp %31 : vector<64x64xi32> to vector<64x64xf32>
    %33 = arith.truncf %27 : vector<64x64xf32> to vector<64x64xbf16>
    %34 = arith.truncf %20 : vector<64x32xf32> to vector<64x32xbf16>
    %cst_15 = arith.constant dense<0.000000e+00> : vector<64x32xf32>
    %35 = tpu.matmul %33, %34, %cst_15 {dimension_numbers = #tpu.dot_dimension_numbers<[1], [0], [0], [1], [0, 0, 1, 1], [], []>} : vector<64x64xbf16>, vector<64x32xbf16>, vector<64x32xf32> -> vector<64x32xf32>
    %36 = arith.truncf %32 : vector<64x64xf32> to vector<64x64xbf16>
    %37 = arith.truncf %20 : vector<64x32xf32> to vector<64x32xbf16>
    %cst_16 = arith.constant dense<0.000000e+00> : vector<64x32xf32>
    %38 = tpu.matmul %36, %37, %cst_16 {dimension_numbers = #tpu.dot_dimension_numbers<[1], [0], [0], [1], [0, 0, 1, 1], [], []>} : vector<64x64xbf16>, vector<64x32xbf16>, vector<64x32xf32> -> vector<64x32xf32>
    %c0_17 = arith.constant 0 : index
    %c0_18 = arith.constant 0 : index
    %c0_19 = arith.constant 0 : index
    %39 = vector.load %arg6[%c0_17, %c0_18, %c0_19] : memref<3x32x64xbf16, #tpu.memory_space<vmem>>, vector<1x32x64xbf16>
    %40 = vector.shape_cast %39 : vector<1x32x64xbf16> to vector<32x64xbf16>
    %41 = arith.truncf %35 : vector<64x32xf32> to vector<64x32xbf16>
    %cst_20 = arith.constant dense<0.000000e+00> : vector<64x64xf32>
    %42 = tpu.matmul %41, %40, %cst_20 {dimension_numbers = #tpu.dot_dimension_numbers<[1], [0], [0], [1], [0, 0, 1, 1], [], []>} : vector<64x32xbf16>, vector<32x64xbf16>, vector<64x64xf32> -> vector<64x64xf32>
    %c1 = arith.constant 1 : index
    %c0_21 = arith.constant 0 : index
    %c0_22 = arith.constant 0 : index
    %43 = vector.load %arg6[%c1, %c0_21, %c0_22] : memref<3x32x64xbf16, #tpu.memory_space<vmem>>, vector<1x32x64xbf16>
    %44 = vector.shape_cast %43 : vector<1x32x64xbf16> to vector<32x64xbf16>
    %45 = arith.truncf %20 : vector<64x32xf32> to vector<64x32xbf16>
    %cst_23 = arith.constant dense<0.000000e+00> : vector<64x64xf32>
    %46 = tpu.matmul %45, %44, %cst_23 {dimension_numbers = #tpu.dot_dimension_numbers<[1], [0], [0], [1], [0, 0, 1, 1], [], []>} : vector<64x32xbf16>, vector<32x64xbf16>, vector<64x64xf32> -> vector<64x64xf32>
    %47 = arith.addf %42, %46 : vector<64x64xf32>
    %c2 = arith.constant 2 : index
    %c0_24 = arith.constant 0 : index
    %c0_25 = arith.constant 0 : index
    %48 = vector.load %arg6[%c2, %c0_24, %c0_25] : memref<3x32x64xbf16, #tpu.memory_space<vmem>>, vector<1x32x64xbf16>
    %49 = vector.shape_cast %48 : vector<1x32x64xbf16> to vector<32x64xbf16>
    %50 = arith.truncf %38 : vector<64x32xf32> to vector<64x32xbf16>
    %cst_26 = arith.constant dense<0.000000e+00> : vector<64x64xf32>
    %51 = tpu.matmul %50, %49, %cst_26 {dimension_numbers = #tpu.dot_dimension_numbers<[1], [0], [0], [1], [0, 0, 1, 1], [], []>} : vector<64x32xbf16>, vector<32x64xbf16>, vector<64x64xf32> -> vector<64x64xf32>
    %52 = arith.addf %47, %51 : vector<64x64xf32>
    %c0_27 = arith.constant 0 : index
    %c0_28 = arith.constant 0 : index
    %53 = vector.load %arg7[%c0_27, %c0_28] : memref<1x64xf32, #tpu.memory_space<vmem>>, vector<1x64xf32>
    %54 = vector.broadcast %53 : vector<1x64xf32> to vector<64x64xf32>
    %55 = arith.addf %52, %54 : vector<64x64xf32>
    %cst_29 = arith.constant 0.000000e+00 : f32
    %56 = vector.broadcast %cst_29 : f32 to vector<64x64xf32>
    %57 = arith.cmpf ogt, %55, %56 : vector<64x64xf32>
    %cst_30 = arith.constant 1.000000e-01 : f32
    %58 = vector.broadcast %cst_30 : f32 to vector<64x64xf32>
    %59 = arith.mulf %58, %55 : vector<64x64xf32>
    %60 = arith.select %57, %55, %59 : vector<64x64xi1>, vector<64x64xf32>
    %61 = arith.truncf %27 : vector<64x64xf32> to vector<64x64xbf16>
    %62 = arith.truncf %60 : vector<64x64xf32> to vector<64x64xbf16>
    %cst_31 = arith.constant dense<0.000000e+00> : vector<64x64xf32>
    %63 = tpu.matmul %61, %62, %cst_31 {dimension_numbers = #tpu.dot_dimension_numbers<[1], [0], [0], [1], [0, 0, 1, 1], [], []>} : vector<64x64xbf16>, vector<64x64xbf16>, vector<64x64xf32> -> vector<64x64xf32>
    %64 = arith.truncf %32 : vector<64x64xf32> to vector<64x64xbf16>
    %65 = arith.truncf %60 : vector<64x64xf32> to vector<64x64xbf16>
    %cst_32 = arith.constant dense<0.000000e+00> : vector<64x64xf32>
    %66 = tpu.matmul %64, %65, %cst_32 {dimension_numbers = #tpu.dot_dimension_numbers<[1], [0], [0], [1], [0, 0, 1, 1], [], []>} : vector<64x64xbf16>, vector<64x64xbf16>, vector<64x64xf32> -> vector<64x64xf32>
    %c0_33 = arith.constant 0 : index
    %c0_34 = arith.constant 0 : index
    %c0_35 = arith.constant 0 : index
    %67 = vector.load %arg8[%c0_33, %c0_34, %c0_35] : memref<3x64x4xbf16, #tpu.memory_space<vmem>>, vector<1x64x4xbf16>
    %68 = vector.shape_cast %67 : vector<1x64x4xbf16> to vector<64x4xbf16>
    %69 = arith.truncf %63 : vector<64x64xf32> to vector<64x64xbf16>
    %cst_36 = arith.constant dense<0.000000e+00> : vector<64x4xf32>
    %70 = tpu.matmul %69, %68, %cst_36 {dimension_numbers = #tpu.dot_dimension_numbers<[1], [0], [0], [1], [0, 0, 1, 1], [], []>} : vector<64x64xbf16>, vector<64x4xbf16>, vector<64x4xf32> -> vector<64x4xf32>
    %c1_37 = arith.constant 1 : index
    %c0_38 = arith.constant 0 : index
    %c0_39 = arith.constant 0 : index
    %71 = vector.load %arg8[%c1_37, %c0_38, %c0_39] : memref<3x64x4xbf16, #tpu.memory_space<vmem>>, vector<1x64x4xbf16>
    %72 = vector.shape_cast %71 : vector<1x64x4xbf16> to vector<64x4xbf16>
    %73 = arith.truncf %60 : vector<64x64xf32> to vector<64x64xbf16>
    %cst_40 = arith.constant dense<0.000000e+00> : vector<64x4xf32>
    %74 = tpu.matmul %73, %72, %cst_40 {dimension_numbers = #tpu.dot_dimension_numbers<[1], [0], [0], [1], [0, 0, 1, 1], [], []>} : vector<64x64xbf16>, vector<64x4xbf16>, vector<64x4xf32> -> vector<64x4xf32>
    %75 = arith.addf %70, %74 : vector<64x4xf32>
    %c2_41 = arith.constant 2 : index
    %c0_42 = arith.constant 0 : index
    %c0_43 = arith.constant 0 : index
    %76 = vector.load %arg8[%c2_41, %c0_42, %c0_43] : memref<3x64x4xbf16, #tpu.memory_space<vmem>>, vector<1x64x4xbf16>
    %77 = vector.shape_cast %76 : vector<1x64x4xbf16> to vector<64x4xbf16>
    %78 = arith.truncf %66 : vector<64x64xf32> to vector<64x64xbf16>
    %cst_44 = arith.constant dense<0.000000e+00> : vector<64x4xf32>
    %79 = tpu.matmul %78, %77, %cst_44 {dimension_numbers = #tpu.dot_dimension_numbers<[1], [0], [0], [1], [0, 0, 1, 1], [], []>} : vector<64x64xbf16>, vector<64x4xbf16>, vector<64x4xf32> -> vector<64x4xf32>
    %80 = arith.addf %75, %79 : vector<64x4xf32>
    %c0_45 = arith.constant 0 : index
    %c0_46 = arith.constant 0 : index
    %81 = vector.load %arg9[%c0_45, %c0_46] : memref<1x1xf32, #tpu.memory_space<vmem>>, vector<1x1xf32>
    %82 = vector.broadcast %81 : vector<1x1xf32> to vector<64x4xf32>
    %83 = arith.addf %80, %82 : vector<64x4xf32>
    %84 = math.tanh %83 : vector<64x4xf32>
    %c0_47 = arith.constant 0 : index
    %c0_48 = arith.constant 0 : index
    %85 = vector.load %arg10[%c0_47, %c0_48] : memref<64x4xf32, #tpu.memory_space<vmem>>, vector<64x4xf32>
    tpu.vector_store %arg10[%c0_47, %c0_48], %84 {strides = array<i32>} : memref<64x4xf32, #tpu.memory_space<vmem>>, vector<64x4xf32>,
    return
  }
}

</mosaic_0001>

<bundles_post_ra>
// kernel: vits_forward.2
= control target key start
LH: loop header
LB: loop body
LE: loop exit
PB: predicated region body
PF: predicated region fallthrough
CT: control target
= control target key end

     0   :  { %vm79_vm0 = vcmask 261120   ;;  %v2465_v15 = vmov 0.0   ;;  %vm2466_vm1 = vmmov 0   ;;  %v59_v23 = vlaneseq  ;;  %s3059_s0 = inlined_call_operand.vmem [shape: f32[16,32], index: 0, kind: input, shape index: {}]   ;;  %s3060_s3 = inlined_call_operand.vmem [shape: bf16[2,4,32,32], index: 3, kind: input, shape index: {}]   ;;  %s3061_s4 = inlined_call_operand.vmem [shape: f32[2,9,32], index: 4, kind: input, shape index: {}]   ;;  %s3062_s2 = inlined_call_operand.vmem [shape: f32[1,16], index: 2, kind: input, shape index: {}]   ;;  %s3063_s1 = inlined_call_operand.vmem [shape: f32[16,1], index: 1, kind: input, shape index: {}]   ;;  %s3064_s5 = inlined_call_operand.vmem [shape: bf16[2,32,64], index: 5, kind: input, shape index: {}]   ;;  %s3065_s6 = inlined_call_operand.vmem [shape: bf16[2,64,32], index: 6, kind: input, shape index: {}]   ;;  %s3066_s7 = inlined_call_operand.vmem [shape: f32[2,1,64], index: 7, kind: input, shape index: {}]   ;;  %s3067_s8 = inlined_call_operand.vmem [shape: bf16[32,32], index: 8, kind: input, shape index: {}]   ;;  %s3068_s10 = inlined_call_operand.vmem [shape: bf16[3,32,32], index: 10, kind: input, shape index: {}]   ;;  %s3069_s9 = inlined_call_operand.vmem [shape: f32[1,32], index: 9, kind: input, shape index: {}]   ;;  %s3070_s14 = inlined_call_operand.vmem [shape: f32[16,32], index: 14, kind: output, shape index: {0}]   ;;  %s3071_s13 = inlined_call_operand.<no memory space> [shape: f32[1,1], index: 13, kind: input, shape index: {}]   ;;  %s3072_s11 = inlined_call_operand.vmem [shape: f32[1,32], index: 11, kind: input, shape index: {}]   ;;  %s3073_s12 = inlined_call_operand.vmem [shape: f32[1,32], index: 12, kind: input, shape index: {}]   ;;  %s3074_s15 = inlined_call_operand.vmem [shape: f32[16,1], index: 15, kind: output, shape index: {1}]  }
   0x1   :  { %v2551_v0 = vld [vmem:[%s3059_s0] sm:$0xff]  ;;  %v2556_v1 = vld [vmem:[%s3059_s0 + $0x8] sm:$0xff]  ;;  %2172 = vmatprep.subr.bf16.mxu0 %v2465_v15  ;;  %2180 = vmatprep.subr.bf16.mxu1 %v2465_v15  ;;  %v2382_v16 = vld [vmem:[%s3060_s3 + $0x10] sm:$0xff]   ;;  %vm360_vm6 = vcmask 130048   ;;  %vm773_vm7 = vcmask 523264   ;;  %vm1974_vm12 = vcmask 7168  }
   0x2   :  { %v80_v2 = vsel %vm79_vm0, %v2551_v0, 0.0  ;;  %v83_v3 = vsel %vm79_vm0, %v2556_v1, 0.0  ;;  %v2381_v14 = vld [vmem:[%s3060_s3] sm:$0xff]   ;;  %v2383_v17 = vld [vmem:[%s3060_s3 + $0x8] sm:$0xff]   ;;  %2176 = vmatprep.mubr.msk.bf16.mxu0 %vm2466_vm1, %v2465_v15  ;;  %2181 = vmatpush3.bf16.msra.mxu1 %v2382_v16  ;;  %v2384_v18 = vld [vmem:[%s3060_s3 + $0x18] sm:$0xff]   ;;  %v2588_v26 = vshrl.u32 %v59_v23, 7 }
   0x3   :  { %81 = vadd.xlane.f32.xlu0 %v80_v2  ;;  %2173 = vmatpush3.bf16.msra.mxu0 %v2381_v14  ;;  %v2594_v28 = vld [vmem:[%s3061_s4] sm:$0xff]  ;;  %v2386_v42 = vld [vmem:[%s3060_s3 + $0x28] sm:$0xff]   ;;  %v2620_v43 = vand.u32 127, %v59_v23 }
   0x4   :  { %2174 = vmatprep.subr.bf16.mxu0 %v2465_v15  ;;  %2182 = vmatprep.subr.bf16.mxu1 %v2465_v15  ;;  %v109_v27 = vsub.s32 4, %v2588_v26  ;;  %v115_v32 = vsub.s32 5, %v2588_v26  ;;  %v2385_v40 = vld [vmem:[%s3060_s3 + $0x20] sm:$0xff]   ;;  %v2623_v44 = vsub.s32 0, %v2588_v26  ;;  %v182_v45 = vsub.s32 1, %v2588_v26 }
   0x5   :  { %2184 = vmatprep.mubr.msk.bf16.mxu1 %vm2466_vm1, %v2465_v15  ;;  %vm387_vm2 = vcmp.ge.s32.totalorder %v2620_v43, 16  ;;  %vm388_vm3 = vcmp.lt.s32.totalorder %v2620_v43, 32  ;;  %vm295_vm4 = vcmp.lt.s32.totalorder %v2620_v43, 16  ;;  %v239_v50 = vsub.s32 2, %v2588_v26  ;;  %v56_v23 = vld [vmem:[%s3062_s2] sm:$0x1] }
   0x6   :  { %2183 = vmatpush3.bf16.msra.mxu1 %v2384_v18  ;;  %v110_v31 = vrot.slane %v2594_v28, %v109_v27  ;;  %v116_v36 = vrot.slane %v2594_v28, %v115_v32  ;;  %v123_v46 = vrot.slane %v2594_v28, %v2623_v44  ;;  %vm389_vm5 = vmand %vm387_vm2, %vm388_vm3  ;;  %v183_v47 = vrot.slane %v2594_v28, %v182_v45 }
   0x7   :  { %84 = vadd.xlane.f32.xlu0 %v83_v3  ;;  %2175 = vmatpush3.bf16.msra.mxu0 %v2383_v17  ;;  %v2636_v52 = vsel %vm295_vm4, 1.0, %v2465_v15  ;;  %v2639_v55 = vsel %vm389_vm5, 1.0, %v2465_v15  ;;  %v240_v2 = vrot.slane %v2594_v28, %v239_v50 }
   0x8   :  { %2188 = vmatprep.subr.bf16.mxu0 %v2465_v15  ;;  %2196 = vmatprep.subr.bf16.mxu1 %v2465_v15 }
  0x90   :  { %v82_v4 = vpop.xlane.xlu0 %81 }
  0x91   :  { %v87_v5 = vmul.f32 0.03125, %v82_v4 }
  0x93   :  { %v89_v6 = vsub.f32 %v2551_v0, %v87_v5 }
  0x94   :  { %v85_v7 = vpop.xlane.xlu0 %84 }
  0x95   :  { %v88_v8 = vmul.f32 0.03125, %v85_v7  ;;  %v91_v9 = vmul.f32 %v89_v6, %v89_v6 }
  0x97   :  { %v90_v10 = vsub.f32 %v2556_v1, %v88_v8  ;;  %v93_v11 = vsel %vm79_vm0, %v91_v9, 0.0 }
  0x98   :  { %94 = vadd.xlane.f32.xlu1 %v93_v11 }
  0x99   :  { %v92_v12 = vmul.f32 %v90_v10, %v90_v10 }
  0x9b   :  { %v96_v13 = vsel %vm79_vm0, %v92_v12, 0.0 }
  0x9c   :  { %97 = vadd.xlane.f32.xlu1 %v96_v13 }
 0x125   :  { %v95_v19 = vpop.xlane.xlu1 %94 }
 0x126   :  { %v99_v20 = vmul.f32 0.03125, %v95_v19 }
 0x128   :  { %v101_v21 = vadd.f32 1e-05, %v99_v20 }
 0x129   :  { %v98_v22 = vpop.xlane.xlu1 %97 }
 0x12a   :  { %2417 = vrsqrt.f32 %v101_v21  ;;  %v100_v24 = vmul.f32 0.03125, %v98_v22 }
 0x12c   :  { %v102_v25 = vadd.f32 1e-05, %v100_v24  ;;  %v57_v24 = vsub.f32 1.0, %v56_v23 }
 0x12e   :  { %2419 = vrsqrt.f32 %v102_v25  ;;  %v58_v25 = vmul.f32 -1e+09, %v57_v24 }
 0x134   :  { %v2418_v29 = vpop.eup %2417 }
 0x135   :  { %v105_v30 = vmul.f32 %v2418_v29, %v89_v6  ;;  %v2672_v29 = vrot.slane %v58_v25, %v2623_v44 }
 0x137   :  { %v111_v35 = vmul.f32 %v110_v31, %v105_v30 }
 0x138   :  { %v2420_v33 = vpop.eup %2419 }
 0x139   :  { %v106_v34 = vmul.f32 %v2420_v33, %v90_v10  ;;  %v117_v38 = vadd.f32 %v116_v36, %v111_v35 }
 0x13b   :  { %v112_v37 = vmul.f32 %v110_v31, %v106_v34 }
 0x13d   :  { %v118_v39 = vadd.f32 %v116_v36, %v112_v37 }
 0x13f   :  { %v119_v41 = vpack.c.bf16 %v118_v39, %v117_v38 }
 0x141   :  { %2177 = vmatmul.mubr.msk.bf16.vlgmr.msra.gmra.mrb[0].mxu0 %vm79_vm0, %v119_v41  ;;  %2185 = vmatmul.mubr.msk.bf16.vlgmr.msra.gmra.mrb[0].mxu1 %vm79_vm0, %v119_v41 }
 0x142   :  { %2189 = vmatpush3.bf16.msra.mxu0 %v2385_v40  ;;  %2192 = vmatprep.mubr.msk.bf16.mxu0 %vm2466_vm1, %v2465_v15 }
 0x143   :  { %2190 = vmatprep.subr.bf16.mxu0 %v2465_v15  ;;  %2198 = vmatprep.mubr.msk.bf16.mxu1 %vm2466_vm1, %v2465_v15 }
 0x146   :  { %2191 = vmatpush3.bf16.msra.mxu0 %v2386_v42 }
 0x147   :  { %2202 = vmatprep.subr.bf16.mxu0 %v2465_v15 }
 0x149   :  { %2193 = vmatmul.mubr.msk.bf16.vlgmr.msra.gmra.mrb[4].mxu0 %vm79_vm0, %v119_v41 }
 0x14a   :  { %2204 = vmatprep.mubr.msk.bf16.mxu0 %vm2466_vm1, %v2465_v15 }
 0x214   :  { %v173_v48 = vpop.f32.mrb[0].mxu0  ;;  %v230_v49 = vpop.f32.mrb[0].mxu1 }
 0x215   :  { %v174_v51 = vadd.f32 %v173_v48, %v123_v46  ;;  %v2178_v53 = vpop.f32.mrb[1].mxu0  ;;  %v2186_v54 = vpop.f32.mrb[1].mxu1  ;;  %v231_v58 = vadd.f32 %v230_v49, %v183_v47 }
 0x216   :  { %v176_v56 = vpop.f32.mrb[2].mxu0  ;;  %v233_v57 = vpop.f32.mrb[2].mxu1 }
 0x217   :  { %v177_v59 = vadd.f32 %v176_v56, %v123_v46  ;;  %v234_v60 = vadd.f32 %v233_v57, %v183_v47  ;;  %v2179_v61 = vpop.f32.mrb[3].mxu0  ;;  %v2187_v62 = vpop.f32.mrb[3].mxu1  ;;  %v299_v63 = vmul.f32 %v2636_v52, %v174_v51  ;;  %v392_v3 = vmul.f32 %v2639_v55, %v174_v51 }
 0x219   :  { %v300_v4 = vmul.f32 %v2636_v52, %v177_v59  ;;  %v393_v5 = vmul.f32 %v2639_v55, %v177_v59  ;;  %v302_v6 = vpack.c.bf16 %v234_v60, %v231_v58 }
 0x21b   :  { %v301_v7 = vpack.c.bf16 %v300_v4, %v299_v63  ;;  %v394_v8 = vpack.c.bf16 %v393_v5, %v392_v3  ;;  %v307_v9 = vsel %vm79_vm0, %v302_v6, 0 }
 0x21c   :  { %v287_v10 = vpop.f32.mrb[4].mxu0  ;;  %2197 = vmatpush3.bf16.xpose.msra.mxu1 %v307_v9  ;;  %2203 = vmatpush3.bf16.xpose.msra.mxu0 %v307_v9 }
 0x21d   :  { %v288_v11 = vadd.f32 %v287_v10, %v240_v2  ;;  %v2194_v12 = vpop.f32.mrb[5].mxu0  ;;  %2208 = vmatprep.subr.bf16.mxu1 %v2465_v15  ;;  %2220 = vmatprep.subr.bf16.mxu0 %v2465_v15 }
 0x21e   :  { %v290_v13 = vpop.f32.mrb[6].mxu0 }
 0x21f   :  { %v291_v14 = vadd.f32 %v290_v13, %v240_v2  ;;  %v2195_v16 = vpop.f32.mrb[7].mxu0  ;;  %v2652_v17 = vmul.f32 %v2636_v52, %v288_v11  ;;  %v465_v18 = vmul.f32 %v2639_v55, %v288_v11 }
 0x220   :  { %v2387_v16 = vld [vmem:[%s3060_s3 + $0x30] sm:$0xff]  }
 0x221   :  { %v2656_v19 = vmul.f32 %v2636_v52, %v291_v14  ;;  %v466_v20 = vmul.f32 %v2639_v55, %v291_v14 }
 0x223   :  { %v386_v21 = vpack.c.bf16 %v2656_v19, %v2652_v17  ;;  %v468_v22 = vpack.c.bf16 %v466_v20, %v465_v18  ;;  %2199 = vmatmul.mubr.msk.bf16.vlgmr.msra.gmra.mrb[4].mxu1 %vm79_vm0, %v301_v7  ;;  %2205 = vmatmul.mubr.msk.bf16.vlgmr.msra.gmra.mrb[8].mxu0 %vm79_vm0, %v394_v8  ;;  %v2388_v17 = vld [vmem:[%s3060_s3 + $0x38] sm:$0xff]   ;;  %v2467_v19 = vmov 0  }
 0x224   :  { %2210 = vmatprep.mubr.msk.bf16.mxu1 %vm2466_vm1, %v2465_v15  ;;  %2224 = vmatprep.mubr.msk.bf16.mxu0 %vm2466_vm1, %v2465_v15 }
 0x225   :  { %2209 = vmatpush3.bf16.msra.mxu1 %v468_v22  ;;  %2221 = vmatpush3.bf16.msra.mxu0 %v2387_v16  ;;  %v2391_v16 = vld [vmem:[%s3065_s6] sm:$0xff]  }
 0x226   :  { %2214 = vmatprep.subr.bf16.mxu1 %v2465_v15  ;;  %2222 = vmatprep.subr.bf16.mxu0 %v2465_v15 }
 0x227   :  { %2379 = vset.pattern.permute.xlu0 %v2467_v19  ;;  %2380 = vset.pattern.permute.xlu1 %v2467_v19 }
 0x229   :  { %2223 = vmatpush3.bf16.msra.mxu0 %v2388_v17 }
 0x22a   :  { %2228 = vmatprep.subr.bf16.mxu0 %v2465_v15 }
 0x2f6   :  { %v343_v30 = vpop.f32.mrb[4].mxu1  ;;  %v432_v31 = vpop.f32.mrb[8].mxu0 }
 0x2f7   :  { %v350_v33 = vmul.f32 0.25, %v343_v30  ;;  %v439_v34 = vmul.f32 0.25, %v432_v31  ;;  %v2200_v35 = vpop.f32.mrb[5].mxu1  ;;  %v2206_v36 = vpop.f32.mrb[9].mxu0 }
 0x2f8   :  { %v346_v37 = vpop.f32.mrb[6].mxu1  ;;  %v435_v38 = vpop.f32.mrb[10].mxu0 }
 0x2f9   :  { %v351_v39 = vmul.f32 0.25, %v346_v37  ;;  %v440_v40 = vmul.f32 0.25, %v435_v38  ;;  %v2201_v41 = vpop.f32.mrb[7].mxu1  ;;  %v2207_v42 = vpop.f32.mrb[11].mxu0  ;;  %v441_v46 = vadd.f32 %v439_v34, %v2672_v29  ;;  %v358_v49 = vadd.f32 %v2672_v29, %v350_v33 }
 0x2fb   :  { %v443_v47 = vsel %vm360_vm6, %v441_v46, -inf  ;;  %v442_v48 = vadd.f32 %v440_v40, %v2672_v29  ;;  %v359_v53 = vadd.f32 %v2672_v29, %v351_v39  ;;  %v361_v54 = vsel %vm360_vm6, %v358_v49, -inf  ;;  %v55_v39 = vld [vmem:[%s3063_s1 + $0x8] sm:$0xff] }
 0x2fc   :  { %444 = vmax.xlane.f32.xlu0 %v443_v47 }
 0x2fd   :  { %v446_v51 = vsel %vm360_vm6, %v442_v48, -inf  ;;  %v364_v56 = vsel %vm360_vm6, %v359_v53, -inf }
 0x2fe   :  { %447 = vmax.xlane.f32.xlu1 %v446_v51 }
 0x300   :  { %362 = vmax.xlane.f32.xlu0 %v361_v54 }
 0x302   :  { %365 = vmax.xlane.f32.xlu1 %v364_v56 }
 0x389   :  { %v445_v57 = vpop.xlane.xlu0 %444 }
 0x38a   :  { %v449_v58 = vsub.f32 %v441_v46, %v445_v57 }
 0x38b   :  { %v448_v59 = vpop.xlane.xlu1 %447 }
 0x38c   :  { %v451_v60 = vmul.f32 1.442695, %v449_v58  ;;  %v450_v61 = vsub.f32 %v442_v48, %v448_v59  ;;  %v560_v48 = vsub.s32 3, %v2588_v26 }
 0x38d   :  { %v363_v62 = vpop.xlane.xlu0 %362 }
 0x38e   :  { %2421 = vpow2.f32 %v451_v60  ;;  %v453_v63 = vmul.f32 1.442695, %v450_v61  ;;  %v367_v2 = vsub.f32 %v358_v49, %v363_v62  ;;  %v561_v49 = vrot.slane %v2594_v28, %v560_v48 }
 0x38f   :  { %v366_v3 = vpop.xlane.xlu1 %365 }
 0x390   :  { %2423 = vpow2.f32 %v453_v63  ;;  %v369_v4 = vmul.f32 1.442695, %v367_v2  ;;  %v368_v5 = vsub.f32 %v359_v53, %v366_v3 }
 0x392   :  { %2425 = vpow2.f32 %v369_v4  ;;  %v371_v6 = vmul.f32 1.442695, %v368_v5 }
 0x394   :  { %2427 = vpow2.f32 %v371_v6 }
 0x398   :  { %v2422_v7 = vpop.eup %2421 }
 0x399   :  { %v455_v8 = vsel %vm360_vm6, %v2422_v7, 0.0 }
 0x39a   :  { %v2424_v9 = vpop.eup %2423  ;;  %456 = vadd.xlane.f32.xlu0 %v455_v8 }
 0x39b   :  { %v458_v10 = vsel %vm360_vm6, %v2424_v9, 0.0 }
 0x39c   :  { %v2426_v11 = vpop.eup %2425  ;;  %459 = vadd.xlane.f32.xlu1 %v458_v10 }
 0x39d   :  { %v373_v12 = vsel %vm360_vm6, %v2426_v11, 0.0 }
 0x39e   :  { %v2428_v13 = vpop.eup %2427  ;;  %374 = vadd.xlane.f32.xlu0 %v373_v12 }
 0x39f   :  { %v376_v14 = vsel %vm360_vm6, %v2428_v13, 0.0 }
 0x3a0   :  { %377 = vadd.xlane.f32.xlu1 %v376_v14  ;;  %v2390_v14 = vld [vmem:[%s3064_s5 + $0x8] sm:$0xff]  }
 0x3b1   :  { %625 = vperm.xlu1 %2380, %v55_v39  }
 0x427   :  { %v457_v18 = vpop.xlane.xlu0 %456 }
 0x428   :  { %2429 = vrcp.f32 %v457_v18  ;;  %v2392_v18 = vld [vmem:[%s3065_s6 + $0x8] sm:$0xff]  }
 0x429   :  { %v460_v20 = vpop.xlane.xlu1 %459 }
 0x42a   :  { %2431 = vrcp.f32 %v460_v20 }
 0x42b   :  { %v375_v23 = vpop.xlane.xlu0 %374 }
 0x42d   :  { %v378_v22 = vpop.xlane.xlu1 %377 }
 0x42e   :  { %2433 = vrcp.f32 %v378_v22 }
 0x42f   :  { %2435 = vrcp.f32 %v375_v23 }
 0x431   :  { %v2719_v58 = vpop.permute.xlu1 %625 }
 0x432   :  { %v2430_v24 = vpop.eup %2429 }
 0x433   :  { %v463_v30 = vmul.f32 %v2430_v24, %v2422_v7 }
 0x434   :  { %v2432_v25 = vpop.eup %2431 }
 0x435   :  { %v464_v31 = vmul.f32 %v2432_v25, %v2424_v9 }
 0x437   :  { %v467_v33 = vpack.c.bf16 %v464_v31, %v463_v30  ;;  %v660_v31 = vsub.s32 6, %v2588_v26 }
 0x438   :  { %v2434_v34 = vpop.eup %2433 }
 0x439   :  { %2211 = vmatmul.mubr.msk.bf16.vlgmr.msra.gmra.mrb[8].mxu1 %vm360_vm6, %v467_v33  ;;  %v2436_v35 = vpop.eup %2435  ;;  %v382_v36 = vmul.f32 %v2434_v34, %v2428_v13  ;;  %v2389_v13 = vld [vmem:[%s3064_s5] sm:$0xff]   ;;  %v661_v34 = vrot.slane %v2594_v28, %v660_v31 }
 0x43a   :  { %2215 = vmatpush3.bf16.msra.mxu1 %v386_v21  ;;  %2216 = vmatprep.mubr.msk.bf16.mxu1 %vm2466_vm1, %v2465_v15  ;;  %v381_v37 = vmul.f32 %v2436_v35, %v2426_v11  ;;  %v54_v21 = vld [vmem:[%s3063_s1] sm:$0xff] }
 0x43b   :  { %2236 = vmatprep.subr.bf16.mxu1 %v2465_v15  ;;  %620 = vperm.xlu0 %2379, %v54_v21  }
 0x43c   :  { %v385_v38 = vpack.c.bf16 %v382_v36, %v381_v37  ;;  %v666_v36 = vsub.s32 7, %v2588_v26 }
 0x43e   :  { %v667_v19 = vrot.slane %v2594_v28, %v666_v36  ;;  %v2394_v28 = vld [vmem:[%s3065_s6 + $0x18] sm:$0xff]  }
 0x445   :  { %2217 = vmatmul.mubr.msk.bf16.vlgmr.msra.gmra.mrb[8].mxu1 %vm360_vm6, %v385_v38 }
 0x446   :  { %2244 = vmatprep.mubr.msk.bf16.mxu1 %vm2466_vm1, %v2465_v15  ;;  %2237 = vmatpush3.bf16.msra.mxu1 %v2391_v16 }
 0x447   :  { %2238 = vmatprep.subr.bf16.mxu1 %v2465_v15 }
 0x44a   :  { %2239 = vmatpush3.bf16.msra.mxu1 %v2392_v18 }
 0x44b   :  { %2240 = vmatprep.subr.bf16.mxu1 %v2465_v15 }
 0x4ba   :  { %v2717_v53 = vpop.permute.xlu0 %620 }
 0x518   :  { %v550_v40 = vpop.f32.mrb[8].mxu1 }
 0x519   :  { %v2218_v41 = vpop.f32.mrb[9].mxu1 }
 0x51a   :  { %v553_v42 = vpop.f32.mrb[10].mxu1 }
 0x51b   :  { %v557_v46 = vpack.c.bf16 %v553_v42, %v550_v40  ;;  %v2219_v47 = vpop.f32.mrb[11].mxu1  ;;  %v2393_v42 = vld [vmem:[%s3065_s6 + $0x10] sm:$0xff]  }
 0x51c   :  { %2241 = vmatpush3.bf16.msra.mxu1 %v2393_v42 }
 0x51d   :  { %2225 = vmatmul.mubr.msk.bf16.vlgmr.msra.gmra.mrb[12].mxu0 %vm79_vm0, %v557_v46  ;;  %2242 = vmatprep.subr.bf16.mxu1 %v2465_v15  ;;  %v2003_v46 = vld [vmem:[%s3066_s7] ss:$0 sm:$0xff] }
 0x51e   :  { %2232 = vmatprep.mubr.msk.bf16.mxu0 %vm2466_vm1, %v2465_v15  ;;  %2229 = vmatpush3.bf16.msra.mxu0 %v2389_v13 }
 0x51f   :  { %2230 = vmatprep.subr.bf16.mxu0 %v2465_v15 }
 0x520   :  { %2243 = vmatpush3.bf16.msra.mxu1 %v2394_v28 }
 0x521   :  { %2264 = vmatprep.subr.bf16.mxu1 %v2465_v15 }
 0x522   :  { %2231 = vmatpush3.bf16.msra.mxu0 %v2390_v14 }
 0x523   :  { %2248 = vmatprep.subr.bf16.mxu0 %v2465_v15 }
 0x5f0   :  { %v611_v51 = vpop.f32.mrb[12].mxu0 }
 0x5f1   :  { %v612_v54 = vadd.f32 %v611_v51, %v561_v49  ;;  %v2226_v56 = vpop.f32.mrb[13].mxu0 }
 0x5f2   :  { %v614_v57 = vpop.f32.mrb[14].mxu0 }
 0x5f3   :  { %v615_v59 = vadd.f32 %v614_v57, %v561_v49  ;;  %v2227_v60 = vpop.f32.mrb[15].mxu0  ;;  %v628_v61 = vmul.f32 %v2717_v53, %v612_v54 }
 0x5f5   :  { %v2723_v62 = vadd.f32 %v628_v61, %v2551_v0  ;;  %v629_v63 = vmul.f32 %v2719_v58, %v615_v59 }
 0x5f7   :  { %v632_v2 = vsel %vm79_vm0, %v2723_v62, 0.0  ;;  %v2729_v3 = vadd.f32 %v629_v63, %v2556_v1  ;;  %v2012_v63 = vld [vmem:[%s3061_s4 + $0x8] ss:$0 sm:$0xff] }
 0x5f8   :  { %633 = vadd.xlane.f32.xlu1 %v632_v2 }
 0x5f9   :  { %v635_v4 = vsel %vm79_vm0, %v2729_v3, 0.0 }
 0x5fa   :  { %636 = vadd.xlane.f32.xlu0 %v635_v4 }
 0x685   :  { %v634_v5 = vpop.xlane.xlu1 %633 }
 0x686   :  { %v638_v6 = vmul.f32 0.03125, %v634_v5 }
 0x687   :  { %v637_v7 = vpop.xlane.xlu0 %636 }
 0x688   :  { %v640_v8 = vsub.f32 %v2723_v62, %v638_v6  ;;  %v639_v0 = vmul.f32 0.03125, %v637_v7 }
 0x68a   :  { %v641_v9 = vsub.f32 %v2729_v3, %v639_v0  ;;  %v642_v10 = vmul.f32 %v640_v8, %v640_v8 }
 0x68c   :  { %v644_v11 = vsel %vm79_vm0, %v642_v10, 0.0  ;;  %v643_v12 = vmul.f32 %v641_v9, %v641_v9 }
 0x68d   :  { %645 = vadd.xlane.f32.xlu1 %v644_v11 }
 0x68e   :  { %v647_v1 = vsel %vm79_vm0, %v643_v12, 0.0 }
 0x691   :  { %648 = vadd.xlane.f32.xlu1 %v647_v1 }
 0x71a   :  { %v646_v20 = vpop.xlane.xlu1 %645 }
 0x71b   :  { %v650_v22 = vmul.f32 0.03125, %v646_v20 }
 0x71d   :  { %v652_v23 = vadd.f32 1e-05, %v650_v22 }
 0x71e   :  { %v649_v24 = vpop.xlane.xlu1 %648 }
 0x71f   :  { %2437 = vrsqrt.f32 %v652_v23  ;;  %v651_v25 = vmul.f32 0.03125, %v649_v24 }
 0x721   :  { %v653_v30 = vadd.f32 1e-05, %v651_v25  ;;  %v2395_v25 = vld [vmem:[%s3060_s3 + $0x40] sm:$0xff]  }
 0x723   :  { %2439 = vrsqrt.f32 %v653_v30  ;;  %v2396_v30 = vld [vmem:[%s3060_s3 + $0x60] sm:$0xff]  }
 0x729   :  { %v2438_v33 = vpop.eup %2437 }
 0x72a   :  { %v656_v35 = vmul.f32 %v2438_v33, %v640_v8  ;;  %v2397_v33 = vld [vmem:[%s3060_s3 + $0x48] sm:$0xff]  }
 0x72c   :  { %v662_v38 = vmul.f32 %v661_v34, %v656_v35 }
 0x72d   :  { %v2440_v37 = vpop.eup %2439 }
 0x72e   :  { %v657_v17 = vmul.f32 %v2440_v37, %v641_v9  ;;  %v668_v39 = vadd.f32 %v667_v19, %v662_v38 }
 0x730   :  { %v663_v21 = vmul.f32 %v661_v34, %v657_v17  ;;  %v2398_v34 = vld [vmem:[%s3060_s3 + $0x68] sm:$0xff]  }
 0x732   :  { %v669_v40 = vadd.f32 %v667_v19, %v663_v21 }
 0x734   :  { %v674_v41 = vpack.c.bf16 %v669_v40, %v668_v39  ;;  %v2816_v39 = vld [vmem:[%s3061_s4 + $0x10] sm:$0xff] }
 0x736   :  { %2233 = vmatmul.mubr.msk.bf16.vlgmr.msra.gmra.mrb[16].mxu0 %vm79_vm0, %v674_v41  ;;  %v877_v41 = vrot.slane %v2816_v39, %v109_v27  ;;  %v2400_v27 = vld [vmem:[%s3060_s3 + $0x58] sm:$0xff]  }
 0x737   :  { %2252 = vmatprep.mubr.msk.bf16.mxu0 %vm2466_vm1, %v2465_v15  ;;  %2249 = vmatpush3.bf16.msra.mxu0 %v2395_v25 }
 0x738   :  { %2250 = vmatprep.subr.bf16.mxu0 %v2465_v15 }
 0x73b   :  { %2251 = vmatpush3.bf16.msra.mxu0 %v2397_v33 }
 0x73c   :  { %2256 = vmatprep.subr.bf16.mxu0 %v2465_v15 }
 0x809   :  { %v731_v47 = vpop.f32.mrb[16].mxu0 }
 0x80a   :  { %v732_v49 = vadd.f32 %v2003_v46, %v731_v47  ;;  %v2234_v51 = vpop.f32.mrb[17].mxu0 }
 0x80b   :  { %v734_v54 = vpop.f32.mrb[18].mxu0 }
 0x80c   :  { %v735_v56 = vadd.f32 %v2003_v46, %v734_v54  ;;  %v2235_v57 = vpop.f32.mrb[19].mxu0  ;;  %v738_v59 = vmax.f32 %v732_v49, 0.0  ;;  %v883_v46 = vrot.slane %v2816_v39, %v115_v32  ;;  %v890_v32 = vrot.slane %v2816_v39, %v2623_v44 }
 0x80d   :  { %v2399_v57 = vld [vmem:[%s3060_s3 + $0x50] sm:$0xff]  }
 0x80e   :  { %v739_v60 = vmax.f32 %v735_v56, 0.0 }
 0x810   :  { %v748_v61 = vpack.c.bf16 %v739_v60, %v738_v59  ;;  %v1007_v60 = vrot.slane %v2816_v39, %v239_v50 }
 0x812   :  { %2245 = vmatmul.mubr.msk.bf16.vlgmr.msra.gmra.mrb[12].mxu1 %vm773_vm7, %v748_v61 }
 0x813   :  { %2268 = vmatprep.mubr.msk.bf16.mxu1 %vm2466_vm1, %v2465_v15  ;;  %2265 = vmatpush3.bf16.msra.mxu1 %v2396_v30 }
 0x814   :  { %2266 = vmatprep.subr.bf16.mxu1 %v2465_v15 }
 0x817   :  { %2267 = vmatpush3.bf16.msra.mxu1 %v2398_v34 }
 0x818   :  { %2278 = vmatprep.subr.bf16.mxu1 %v2465_v15 }
 0x8e5   :  { %v811_v2 = vpop.f32.mrb[12].mxu1 }
 0x8e6   :  { %v818_v4 = vadd.f32 %v811_v2, %v2723_v62  ;;  %v2246_v5 = vpop.f32.mrb[13].mxu1 }
 0x8e7   :  { %v814_v6 = vpop.f32.mrb[14].mxu1 }
 0x8e8   :  { %v824_v7 = vadd.f32 %v2012_v63, %v818_v4  ;;  %v819_v8 = vadd.f32 %v814_v6, %v2729_v3  ;;  %v2247_v0 = vpop.f32.mrb[15].mxu1 }
 0x8ea   :  { %v2784_v9 = vmul.f32 %v824_v7, %v2717_v53  ;;  %v825_v10 = vadd.f32 %v2012_v63, %v819_v8 }
 0x8ec   :  { %v2787_v11 = vmul.f32 %v825_v10, %v2719_v58  ;;  %v848_v12 = vsel %vm79_vm0, %v2784_v9, 0.0 }
 0x8ed   :  { %849 = vadd.xlane.f32.xlu1 %v848_v12 }
 0x8ee   :  { %v851_v62 = vsel %vm79_vm0, %v2787_v11, 0.0 }
 0x8f1   :  { %852 = vadd.xlane.f32.xlu1 %v851_v62 }
 0x97a   :  { %v850_v1 = vpop.xlane.xlu1 %849 }
 0x97b   :  { %v854_v13 = vmul.f32 0.03125, %v850_v1 }
 0x97d   :  { %v856_v3 = vsub.f32 %v2784_v9, %v854_v13 }
 0x97e   :  { %v853_v14 = vpop.xlane.xlu1 %852 }
 0x97f   :  { %v855_v16 = vmul.f32 0.03125, %v853_v14  ;;  %v858_v18 = vmul.f32 %v856_v3, %v856_v3 }
 0x981   :  { %v857_v20 = vsub.f32 %v2787_v11, %v855_v16  ;;  %v860_v22 = vsel %vm79_vm0, %v858_v18, 0.0 }
 0x982   :  { %861 = vadd.xlane.f32.xlu1 %v860_v22 }
 0x983   :  { %v859_v23 = vmul.f32 %v857_v20, %v857_v20 }
 0x985   :  { %v863_v24 = vsel %vm79_vm0, %v859_v23, 0.0 }
 0x986   :  { %864 = vadd.xlane.f32.xlu1 %v863_v24 }
 0xa0f   :  { %v862_v35 = vpop.xlane.xlu1 %861 }
 0xa10   :  { %v866_v37 = vmul.f32 0.03125, %v862_v35 }
 0xa12   :  { %v868_v38 = vadd.f32 1e-05, %v866_v37 }
 0xa13   :  { %v865_v17 = vpop.xlane.xlu1 %864 }
 0xa14   :  { %2441 = vrsqrt.f32 %v868_v38  ;;  %v867_v19 = vmul.f32 0.03125, %v865_v17 }
 0xa16   :  { %v869_v21 = vadd.f32 1e-05, %v867_v19 }
 0xa18   :  { %2443 = vrsqrt.f32 %v869_v21 }
 0xa1e   :  { %v2442_v40 = vpop.eup %2441 }
 0xa1f   :  { %v872_v42 = vmul.f32 %v2442_v40, %v856_v3 }
 0xa21   :  { %v878_v47 = vmul.f32 %v877_v41, %v872_v42 }
 0xa22   :  { %v2444_v28 = vpop.eup %2443 }
 0xa23   :  { %v873_v49 = vmul.f32 %v2444_v28, %v857_v20  ;;  %v884_v54 = vadd.f32 %v883_v46, %v878_v47  ;;  %v950_v20 = vrot.slane %v2816_v39, %v182_v45 }
 0xa25   :  { %v879_v51 = vmul.f32 %v877_v41, %v873_v49 }
 0xa27   :  { %v885_v56 = vadd.f32 %v883_v46, %v879_v51 }
 0xa29   :  { %v886_v59 = vpack.c.bf16 %v885_v56, %v884_v54 }
 0xa2b   :  { %2253 = vmatmul.mubr.msk.bf16.vlgmr.msra.gmra.mrb[20].mxu0 %vm79_vm0, %v886_v59  ;;  %2269 = vmatmul.mubr.msk.bf16.vlgmr.msra.gmra.mrb[16].mxu1 %vm79_vm0, %v886_v59 }
 0xa2c   :  { %2257 = vmatpush3.bf16.msra.mxu0 %v2399_v57  ;;  %2260 = vmatprep.mubr.msk.bf16.mxu0 %vm2466_vm1, %v2465_v15 }
 0xa2d   :  { %2258 = vmatprep.subr.bf16.mxu0 %v2465_v15  ;;  %2280 = vmatprep.mubr.msk.bf16.mxu1 %vm2466_vm1, %v2465_v15 }
 0xa30   :  { %2259 = vmatpush3.bf16.msra.mxu0 %v2400_v27 }
 0xa31   :  { %2272 = vmatprep.subr.bf16.mxu0 %v2465_v15 }
 0xa33   :  { %2261 = vmatmul.mubr.msk.bf16.vlgmr.msra.gmra.mrb[24].mxu0 %vm79_vm0, %v886_v59 }
 0xa34   :  { %2274 = vmatprep.mubr.msk.bf16.mxu0 %vm2466_vm1, %v2465_v15 }
 0xafe   :  { %v940_v61 = vpop.f32.mrb[20].mxu0  ;;  %v1054_v63 = vpop.f32.mrb[16].mxu1 }
 0xaff   :  { %v941_v2 = vadd.f32 %v940_v61, %v890_v32  ;;  %v1055_v4 = vadd.f32 %v1054_v63, %v1007_v60  ;;  %v2254_v5 = vpop.f32.mrb[21].mxu0  ;;  %v2270_v6 = vpop.f32.mrb[17].mxu1 }
 0xb00   :  { %v943_v7 = vpop.f32.mrb[22].mxu0  ;;  %v1057_v8 = vpop.f32.mrb[18].mxu1 }
 0xb01   :  { %v2255_v0 = vpop.f32.mrb[23].mxu0  ;;  %v2271_v10 = vpop.f32.mrb[19].mxu1  ;;  %v944_v12 = vadd.f32 %v943_v7, %v890_v32  ;;  %v1058_v62 = vadd.f32 %v1057_v8, %v1007_v60  ;;  %v1061_v1 = vmul.f32 %v2636_v52, %v941_v2  ;;  %v1142_v44 = vmul.f32 %v2639_v55, %v941_v2 }
 0xb02   :  { %v2849_v13 = vmul.f32 %v2636_v52, %v1055_v4  ;;  %v1215_v50 = vmul.f32 %v2639_v55, %v1055_v4 }
 0xb03   :  { %v1062_v3 = vmul.f32 %v2636_v52, %v944_v12  ;;  %v1143_v14 = vmul.f32 %v2639_v55, %v944_v12  ;;  %v2855_v16 = vmul.f32 %v2636_v52, %v1058_v62  ;;  %v1216_v18 = vmul.f32 %v2639_v55, %v1058_v62 }
 0xb05   :  { %v1063_v22 = vpack.c.bf16 %v1062_v3, %v1061_v1  ;;  %v1144_v23 = vpack.c.bf16 %v1143_v14, %v1142_v44  ;;  %v1141_v24 = vpack.c.bf16 %v2855_v16, %v2849_v13  ;;  %v1218_v25 = vpack.c.bf16 %v1216_v18, %v1215_v50  ;;  %v2402_v13 = vld [vmem:[%s3060_s3 + $0x78] sm:$0xff]  }
 0xb06   :  { %v997_v30 = vpop.f32.mrb[24].mxu0 }
 0xb07   :  { %v2262_v33 = vpop.f32.mrb[25].mxu0  ;;  %v998_v35 = vadd.f32 %v997_v30, %v950_v20 }
 0xb08   :  { %v1000_v34 = vpop.f32.mrb[26].mxu0 }
 0xb09   :  { %v1001_v37 = vadd.f32 %v1000_v34, %v950_v20  ;;  %v2263_v38 = vpop.f32.mrb[27].mxu0 }
 0xb0b   :  { %v1064_v52 = vpack.c.bf16 %v1001_v37, %v998_v35 }
 0xb0d   :  { %v1069_v17 = vsel %vm79_vm0, %v1064_v52, 0 }
 0xb0e   :  { %2273 = vmatpush3.bf16.xpose.msra.mxu0 %v1069_v17  ;;  %2279 = vmatpush3.bf16.xpose.msra.mxu1 %v1069_v17 }
 0xb0f   :  { %2284 = vmatprep.subr.bf16.mxu0 %v2465_v15  ;;  %2296 = vmatprep.subr.bf16.mxu1 %v2465_v15 }
 0xb15   :  { %2275 = vmatmul.mubr.msk.bf16.vlgmr.msra.gmra.mrb[28].mxu0 %vm79_vm0, %v1063_v22  ;;  %2281 = vmatmul.mubr.msk.bf16.vlgmr.msra.gmra.mrb[20].mxu1 %vm79_vm0, %v1144_v23  ;;  %v2401_v23 = vld [vmem:[%s3060_s3 + $0x70] sm:$0xff]  }
 0xb16   :  { %2285 = vmatpush3.bf16.msra.mxu0 %v1218_v25  ;;  %2286 = vmatprep.mubr.msk.bf16.mxu0 %vm2466_vm1, %v2465_v15 }
 0xb17   :  { %2290 = vmatprep.subr.bf16.mxu0 %v2465_v15  ;;  %2300 = vmatprep.mubr.msk.bf16.mxu1 %vm2466_vm1, %v2465_v15 }
 0xb18   :  { %2297 = vmatpush3.bf16.msra.mxu1 %v2401_v23 }
 0xb19   :  { %2298 = vmatprep.subr.bf16.mxu1 %v2465_v15 }
 0xb1c   :  { %2299 = vmatpush3.bf16.msra.mxu1 %v2402_v13 }
 0xb1d   :  { %2304 = vmatprep.subr.bf16.mxu1 %v2465_v15 }
 0xbe8   :  { %v1105_v45 = vpop.f32.mrb[28].mxu0  ;;  %v1182_v55 = vpop.f32.mrb[20].mxu1 }
 0xbe9   :  { %v1112_v19 = vmul.f32 0.25, %v1105_v45  ;;  %v1189_v21 = vmul.f32 0.25, %v1182_v55  ;;  %v2276_v40 = vpop.f32.mrb[29].mxu0  ;;  %v2282_v41 = vpop.f32.mrb[21].mxu1 }
 0xbea   :  { %v1108_v42 = vpop.f32.mrb[30].mxu0  ;;  %v1185_v28 = vpop.f32.mrb[22].mxu1 }
 0xbeb   :  { %v1113_v46 = vmul.f32 0.25, %v1108_v42  ;;  %v1190_v47 = vmul.f32 0.25, %v1185_v28  ;;  %v2277_v49 = vpop.f32.mrb[31].mxu0  ;;  %v2283_v51 = vpop.f32.mrb[23].mxu1  ;;  %v1191_v54 = vadd.f32 %v1189_v21, %v2672_v29  ;;  %v1114_v59 = vadd.f32 %v1112_v19, %v2672_v29 }
 0xbed   :  { %v1193_v56 = vsel %vm360_vm6, %v1191_v54, -inf  ;;  %v1192_v57 = vadd.f32 %v1190_v47, %v2672_v29  ;;  %v1115_v32 = vadd.f32 %v1113_v46, %v2672_v29  ;;  %v1116_v60 = vsel %vm360_vm6, %v1114_v59, -inf }
 0xbee   :  { %1194 = vmax.xlane.f32.xlu0 %v1193_v56  ;;  %v1311_v46 = vrot.slane %v2816_v39, %v560_v48 }
 0xbef   :  { %v1196_v27 = vsel %vm360_vm6, %v1192_v57, -inf  ;;  %v1119_v61 = vsel %vm360_vm6, %v1115_v32, -inf }
 0xbf0   :  { %1197 = vmax.xlane.f32.xlu1 %v1196_v27 }
 0xbf2   :  { %1117 = vmax.xlane.f32.xlu0 %v1116_v60 }
 0xbf4   :  { %1120 = vmax.xlane.f32.xlu1 %v1119_v61 }
 0xc7b   :  { %v1195_v63 = vpop.xlane.xlu0 %1194 }
 0xc7c   :  { %v1199_v2 = vsub.f32 %v1191_v54, %v1195_v63 }
 0xc7d   :  { %v1198_v4 = vpop.xlane.xlu1 %1197 }
 0xc7e   :  { %v1201_v5 = vmul.f32 1.442695, %v1199_v2  ;;  %v1200_v6 = vsub.f32 %v1192_v57, %v1198_v4 }
 0xc7f   :  { %v1118_v7 = vpop.xlane.xlu0 %1117 }
 0xc80   :  { %2445 = vpow2.f32 %v1201_v5  ;;  %v1203_v8 = vmul.f32 1.442695, %v1200_v6  ;;  %v1122_v0 = vsub.f32 %v1114_v59, %v1118_v7 }
 0xc81   :  { %v1121_v10 = vpop.xlane.xlu1 %1120 }
 0xc82   :  { %2447 = vpow2.f32 %v1203_v8  ;;  %v1124_v12 = vmul.f32 1.442695, %v1122_v0  ;;  %v1123_v29 = vsub.f32 %v1115_v32, %v1121_v10  ;;  %v2403_v10 = vld [vmem:[%s3064_s5 + $0x10] sm:$0xff]  }
 0xc84   :  { %2449 = vpow2.f32 %v1124_v12  ;;  %v1126_v62 = vmul.f32 1.442695, %v1123_v29  ;;  %v2404_v12 = vld [vmem:[%s3064_s5 + $0x18] sm:$0xff]   ;;  %v2405_v29 = vld [vmem:[%s3065_s6 + $0x20] sm:$0xff]  }
 0xc86   :  { %2451 = vpow2.f32 %v1126_v62  ;;  %v2406_v62 = vld [vmem:[%s3065_s6 + $0x28] sm:$0xff]  }
 0xc8a   :  { %v2446_v1 = vpop.eup %2445 }
 0xc8b   :  { %v1205_v44 = vsel %vm360_vm6, %v2446_v1, 0.0 }
 0xc8c   :  { %v2448_v50 = vpop.eup %2447  ;;  %1206 = vadd.xlane.f32.xlu0 %v1205_v44 }
 0xc8d   :  { %v1208_v3 = vsel %vm360_vm6, %v2448_v50, 0.0 }
 0xc8e   :  { %v2450_v14 = vpop.eup %2449  ;;  %1209 = vadd.xlane.f32.xlu1 %v1208_v3 }
 0xc8f   :  { %v1128_v18 = vsel %vm360_vm6, %v2450_v14, 0.0 }
 0xc90   :  { %v2452_v20 = vpop.eup %2451  ;;  %1129 = vadd.xlane.f32.xlu0 %v1128_v18 }
 0xc91   :  { %v1131_v22 = vsel %vm360_vm6, %v2452_v20, 0.0 }
 0xc92   :  { %1132 = vadd.xlane.f32.xlu1 %v1131_v22 }
 0xd19   :  { %v1207_v25 = vpop.xlane.xlu0 %1206 }
 0xd1a   :  { %2453 = vrcp.f32 %v1207_v25 }
 0xd1b   :  { %v1210_v30 = vpop.xlane.xlu1 %1209 }
 0xd1c   :  { %2455 = vrcp.f32 %v1210_v30 }
 0xd1d   :  { %v1130_v34 = vpop.xlane.xlu0 %1129 }
 0xd1f   :  { %v1133_v33 = vpop.xlane.xlu1 %1132 }
 0xd20   :  { %2457 = vrcp.f32 %v1133_v33 }
 0xd21   :  { %2459 = vrcp.f32 %v1130_v34  ;;  %v1407_v34 = vrot.slane %v2816_v39, %v666_v36  ;;  %v2408_v36 = vld [vmem:[%s3065_s6 + $0x38] sm:$0xff]  }
 0xd24   :  { %v2454_v35 = vpop.eup %2453 }
 0xd25   :  { %v1213_v38 = vmul.f32 %v2454_v35, %v2446_v1 }
 0xd26   :  { %v2456_v37 = vpop.eup %2455 }
 0xd27   :  { %v1214_v52 = vmul.f32 %v2456_v37, %v2448_v50 }
 0xd29   :  { %v1217_v17 = vpack.c.bf16 %v1214_v52, %v1213_v38 }
 0xd2a   :  { %v2458_v45 = vpop.eup %2457 }
 0xd2b   :  { %2287 = vmatmul.mubr.msk.bf16.vlgmr.msra.gmra.mrb[32].mxu0 %vm360_vm6, %v1217_v17  ;;  %v2460_v55 = vpop.eup %2459  ;;  %v1137_v19 = vmul.f32 %v2458_v45, %v2452_v20  ;;  %v1401_v20 = vrot.slane %v2816_v39, %v660_v31  ;;  %v2407_v31 = vld [vmem:[%s3065_s6 + $0x30] sm:$0xff]   ;;  %v2052_v39 = vld [vmem:[%s3066_s7 + $0x1] ss:$0 sm:$0xff] }
 0xd2c   :  { %2291 = vmatpush3.bf16.msra.mxu0 %v1141_v24  ;;  %2292 = vmatprep.mubr.msk.bf16.mxu0 %vm2466_vm1, %v2465_v15  ;;  %v1136_v21 = vmul.f32 %v2460_v55, %v2450_v14 }
 0xd2d   :  { %2312 = vmatprep.subr.bf16.mxu0 %v2465_v15 }
 0xd2e   :  { %v1140_v40 = vpack.c.bf16 %v1137_v19, %v1136_v21 }
 0xd37   :  { %2293 = vmatmul.mubr.msk.bf16.vlgmr.msra.gmra.mrb[32].mxu0 %vm360_vm6, %v1140_v40 }
 0xd38   :  { %2320 = vmatprep.mubr.msk.bf16.mxu0 %vm2466_vm1, %v2465_v15  ;;  %2313 = vmatpush3.bf16.msra.mxu0 %v2405_v29  ;;  %v2414_v29 = vld [vmem:[%s3068_s10] sm:$0xff]  }
 0xd39   :  { %2314 = vmatprep.subr.bf16.mxu0 %v2465_v15 }
 0xd3c   :  { %2315 = vmatpush3.bf16.msra.mxu0 %v2406_v62  ;;  %v2415_v62 = vld [vmem:[%s3068_s10 + $0x28] sm:$0xff]  }
 0xd3d   :  { %2316 = vmatprep.subr.bf16.mxu0 %v2465_v15 }
 0xd40   :  { %2317 = vmatpush3.bf16.msra.mxu0 %v2407_v31 }
 0xd41   :  { %2318 = vmatprep.subr.bf16.mxu0 %v2465_v15 }
 0xd44   :  { %2319 = vmatpush3.bf16.msra.mxu0 %v2408_v36 }
 0xd45   :  { %2338 = vmatprep.subr.bf16.mxu0 %v2465_v15 }
 0xe0a   :  { %v1300_v16 = vpop.f32.mrb[32].mxu0 }
 0xe0b   :  { %v2294_v24 = vpop.f32.mrb[33].mxu0 }
 0xe0c   :  { %v1303_v41 = vpop.f32.mrb[34].mxu0 }
 0xe0d   :  { %v1307_v42 = vpack.c.bf16 %v1303_v41, %v1300_v16  ;;  %v2295_v28 = vpop.f32.mrb[35].mxu0  ;;  %v2409_v41 = vld [vmem:[%s3067_s8] sm:$0xff]  }
 0xe0e   :  { %v1646_v28 = vadd.s32 8, %v2588_v26 }
 0xe0f   :  { %2301 = vmatmul.mubr.msk.bf16.vlgmr.msra.gmra.mrb[24].mxu1 %vm79_vm0, %v1307_v42  ;;  %v2410_v42 = vld [vmem:[%s3067_s8 + $0x8] sm:$0xff]  }
 0xe10   :  { %2308 = vmatprep.mubr.msk.bf16.mxu1 %vm2466_vm1, %v2465_v15  ;;  %2305 = vmatpush3.bf16.msra.mxu1 %v2403_v10  ;;  %v2412_v10 = vld [vmem:[%s3068_s10 + $0x18] sm:$0xff]  }
 0xe11   :  { %2306 = vmatprep.subr.bf16.mxu1 %v2465_v15 }
 0xe14   :  { %2307 = vmatpush3.bf16.msra.mxu1 %v2404_v12  ;;  %v2413_v12 = vld [vmem:[%s3068_s10 + $0x20] sm:$0xff]  }
 0xe15   :  { %2324 = vmatprep.subr.bf16.mxu1 %v2465_v15 }
 0xee2   :  { %v1361_v47 = vpop.f32.mrb[24].mxu1 }
 0xee3   :  { %v1362_v49 = vadd.f32 %v1361_v47, %v1311_v46  ;;  %v2302_v51 = vpop.f32.mrb[25].mxu1 }
 0xee4   :  { %v1364_v54 = vpop.f32.mrb[26].mxu1 }
 0xee5   :  { %v1368_v56 = vmul.f32 %v1362_v49, %v2717_v53  ;;  %v1365_v57 = vadd.f32 %v1364_v54, %v1311_v46  ;;  %v2303_v59 = vpop.f32.mrb[27].mxu1  ;;  %v2069_v46 = vld [vmem:[%s3061_s4 + $0x18] ss:$0 sm:$0xff]  ;;  %v1650_v54 = vadd.s32 1, %v2588_v26 }
 0xee7   :  { %v2911_v27 = vadd.f32 %v1368_v56, %v2784_v9  ;;  %v1369_v32 = vmul.f32 %v1365_v57, %v2719_v58  ;;  %v1651_v56 = vadd.s32 1, %v1646_v28  ;;  %vm1652_vm8 = vcmp.eq.s32.totalorder %v2620_v43, %v1650_v54  ;;  %v2098_v54 = vld [vmem:[%s3073_s12] ss:$0 sm:$0xff] }
 0xee9   :  { %v2915_v60 = vadd.f32 %v1369_v32, %v2787_v11  ;;  %v1372_v61 = vsel %vm79_vm0, %v2911_v27, 0.0  ;;  %vm1653_vm9 = vcmp.eq.s32.totalorder %v2620_v43, %v1651_v56 }
 0xeea   :  { %1373 = vadd.xlane.f32.xlu0 %v1372_v61 }
 0xeeb   :  { %v1375_v48 = vsel %vm79_vm0, %v2915_v60, 0.0 }
 0xeec   :  { %1376 = vadd.xlane.f32.xlu1 %v1375_v48  ;;  %v1647_v48 = vadd.s32 1, %v2620_v43 }
 0xeee   :  { %vm1648_vm10 = vcmp.eq.s32.totalorder %v2588_v26, %v1647_v48  ;;  %vm1649_vm11 = vcmp.eq.s32.totalorder %v1646_v28, %v1647_v48 }
 0xf77   :  { %v1374_v63 = vpop.xlane.xlu0 %1373 }
 0xf78   :  { %v1378_v2 = vmul.f32 0.03125, %v1374_v63 }
 0xf79   :  { %v1377_v4 = vpop.xlane.xlu1 %1376 }
 0xf7a   :  { %v1380_v5 = vsub.f32 %v2911_v27, %v1378_v2  ;;  %v1379_v9 = vmul.f32 0.03125, %v1377_v4  ;;  %v2077_v4 = vsel %vm1652_vm8, 1.0, %v2465_v15 }
 0xf7c   :  { %v1381_v6 = vsub.f32 %v2915_v60, %v1379_v9  ;;  %v1382_v7 = vmul.f32 %v1380_v5, %v1380_v5 }
 0xf7e   :  { %v1384_v11 = vsel %vm79_vm0, %v1382_v7, 0.0  ;;  %v1383_v8 = vmul.f32 %v1381_v6, %v1381_v6 }
 0xf7f   :  { %1385 = vadd.xlane.f32.xlu0 %v1384_v11  ;;  %v2074_v11 = vsel %vm1648_vm10, 1.0, %v2465_v15 }
 0xf80   :  { %v1387_v0 = vsel %vm79_vm0, %v1383_v8, 0.0  ;;  %v2075_v8 = vsel %vm1649_vm11, 1.0, %v2465_v15 }
 0xf81   :  { %1388 = vadd.xlane.f32.xlu1 %v1387_v0  ;;  %v1658_v26 = vpack.c.bf16 %v2075_v8, %v2074_v11  ;;  %v2411_v0 = vld [vmem:[%s3068_s10 + $0x10] sm:$0xff]  }
0x100c   :  { %v1386_v1 = vpop.xlane.xlu0 %1385 }
0x100d   :  { %v1390_v44 = vmul.f32 0.03125, %v1386_v1  ;;  %v2416_v1 = vld [vmem:[%s3068_s10 + $0x8] sm:$0xff]  }
0x100e   :  { %v1389_v50 = vpop.xlane.xlu1 %1388 }
0x100f   :  { %v1392_v3 = vadd.f32 1e-05, %v1390_v44  ;;  %v1391_v14 = vmul.f32 0.03125, %v1389_v50  ;;  %v2070_v44 = vld [vmem:[%s3069_s9] ss:$0 sm:$0xff] }
0x1011   :  { %2461 = vrsqrt.f32 %v1392_v3  ;;  %v1393_v18 = vadd.f32 1e-05, %v1391_v14 }
0x1013   :  { %2463 = vrsqrt.f32 %v1393_v18 }
0x101b   :  { %v2462_v22 = vpop.eup %2461 }
0x101c   :  { %v1396_v23 = vmul.f32 %v2462_v22, %v1380_v5  ;;  %v2078_v5 = vsel %vm1653_vm9, 1.0, %v2465_v15 }
0x101d   :  { %v2464_v25 = vpop.eup %2463  ;;  %v1708_v43 = vpack.c.bf16 %v2078_v5, %v2077_v4 }
0x101e   :  { %v1402_v30 = vmul.f32 %v1401_v20, %v1396_v23  ;;  %v1397_v33 = vmul.f32 %v2464_v25, %v1381_v6 }
0x1020   :  { %v1403_v35 = vmul.f32 %v1401_v20, %v1397_v33  ;;  %v1408_v37 = vadd.f32 %v1407_v34, %v1402_v30 }
0x1022   :  { %v1409_v38 = vadd.f32 %v1407_v34, %v1403_v35 }
0x1024   :  { %v1415_v52 = vpack.c.bf16 %v1409_v38, %v1408_v37 }
0x1026   :  { %2309 = vmatmul.mubr.msk.bf16.vlgmr.msra.gmra.mrb[28].mxu1 %vm79_vm0, %v1415_v52 }
0x1027   :  { %2328 = vmatprep.mubr.msk.bf16.mxu1 %vm2466_vm1, %v2465_v15  ;;  %2325 = vmatpush3.bf16.msra.mxu1 %v2409_v41  ;;  %v2097_v41 = vld [vmem:[%s3072_s11] ss:$0 sm:$0xff] }
0x1028   :  { %2326 = vmatprep.subr.bf16.mxu1 %v2465_v15 }
0x102b   :  { %2327 = vmatpush3.bf16.msra.mxu1 %v2410_v42 }
0x102c   :  { %2332 = vmatprep.subr.bf16.mxu1 %v2465_v15 }
0x10f9   :  { %v1473_v17 = vpop.f32.mrb[28].mxu1 }
0x10fa   :  { %v1474_v45 = vadd.f32 %v2052_v39, %v1473_v17  ;;  %v2310_v55 = vpop.f32.mrb[29].mxu1 }
0x10fb   :  { %v1476_v19 = vpop.f32.mrb[30].mxu1 }
0x10fc   :  { %v1477_v21 = vadd.f32 %v2052_v39, %v1476_v19  ;;  %v2311_v40 = vpop.f32.mrb[31].mxu1  ;;  %v1480_v13 = vmax.f32 %v1474_v45, 0.0  ;;  %v21_v45 = vstv %s3071_s13 }
0x10fd   :  { %22 = vst [vmem:[#allocation2] sm:$0x1] %v21_v45 }
0x10fe   :  { %v1481_v16 = vmax.f32 %v1477_v21, 0.0 }
0x1100   :  { %v1491_v24 = vpack.c.bf16 %v1481_v16, %v1480_v13 }
0x1102   :  { %2321 = vmatmul.mubr.msk.bf16.vlgmr.msra.gmra.mrb[36].mxu0 %vm773_vm7, %v1491_v24 }
0x1103   :  { %2340 = vmatprep.mubr.msk.bf16.mxu0 %vm2466_vm1, %v2465_v15 }
0x11d5   :  { %v1553_v47 = vpop.f32.mrb[36].mxu0 }
0x11d6   :  { %v1560_v49 = vadd.f32 %v1553_v47, %v2911_v27  ;;  %v2322_v51 = vpop.f32.mrb[37].mxu0 }
0x11d7   :  { %v1556_v57 = vpop.f32.mrb[38].mxu0 }
0x11d8   :  { %v1566_v59 = vadd.f32 %v2069_v46, %v1560_v49  ;;  %v1561_v32 = vadd.f32 %v1556_v57, %v2915_v60  ;;  %v2323_v61 = vpop.f32.mrb[39].mxu0 }
0x11da   :  { %v1568_v63 = vmul.f32 %v1566_v59, %v2717_v53  ;;  %v1567_v2 = vadd.f32 %v2069_v46, %v1561_v32 }
0x11dc   :  { %v1569_v27 = vmul.f32 %v1567_v2, %v2719_v58  ;;  %v1642_v60 = vmul.f32 %v1568_v63, %v2717_v53  ;;  %v2099_v2 = vld [vmem:[#allocation2] ss:$0 sm:$0xff] }
0x11de   :  { %v1574_v9 = vpack.c.bf16 %v1569_v27, %v1568_v63  ;;  %v1643_v6 = vmul.f32 %v1569_v27, %v2719_v58 }
0x11e0   :  { %2329 = vmatmul.mubr.msk.bf16.vlgmr.msra.gmra.mrb[32].mxu1 %vm79_vm0, %v1574_v9  ;;  %v1659_v7 = vpack.c.bf16 %v1643_v6, %v1642_v60 }
0x11e1   :  { %2334 = vmatprep.mubr.msk.bf16.mxu1 %vm2466_vm1, %v2465_v15 }
0x11e2   :  { %2333 = vmatpush3.bf16.msra.mxu1 %v1659_v7  ;;  %2339 = vmatpush3.bf16.msra.mxu0 %v1659_v7 }
0x11e3   :  { %2344 = vmatprep.subr.bf16.mxu1 %v2465_v15  ;;  %2352 = vmatprep.subr.bf16.mxu0 %v2465_v15 }
0x11e5   :  { %2341 = vmatmul.mubr.msk.bf16.vlgmr.msra.gmra.mrb[40].mxu0 %vm360_vm6, %v1708_v43 }
0x11e6   :  { %2356 = vmatprep.mubr.msk.bf16.mxu0 %vm2466_vm1, %v2465_v15  ;;  %2353 = vmatpush3.bf16.msra.mxu0 %v2414_v29 }
0x11e7   :  { %2354 = vmatprep.subr.bf16.mxu0 %v2465_v15 }
0x11e8   :  { %2335 = vmatmul.mubr.msk.bf16.vlgmr.msra.gmra.mrb[36].mxu1 %vm360_vm6, %v1658_v26 }
0x11e9   :  { %2345 = vmatpush3.bf16.msra.mxu1 %v2411_v0  ;;  %2348 = vmatprep.mubr.msk.bf16.mxu1 %vm2466_vm1, %v2465_v15 }
0x11ea   :  { %2346 = vmatprep.subr.bf16.mxu1 %v2465_v15  ;;  %2355 = vmatpush3.bf16.msra.mxu0 %v2416_v1 }
0x11ed   :  { %2347 = vmatpush3.bf16.msra.mxu1 %v2412_v10 }
0x11ee   :  { %2360 = vmatprep.subr.bf16.mxu1 %v2465_v15 }
0x11f0   :  { %2349 = vmatmul.mubr.msk.bf16.vlgmr.msra.gmra.mrb[40].mxu1 %vm79_vm0, %v1659_v7 }
0x11f1   :  { %2364 = vmatprep.mubr.msk.bf16.mxu1 %vm2466_vm1, %v2465_v15  ;;  %2361 = vmatpush3.bf16.msra.mxu1 %v2413_v12 }
0x11f2   :  { %2362 = vmatprep.subr.bf16.mxu1 %v2465_v15 }
0x11f5   :  { %2363 = vmatpush3.bf16.msra.mxu1 %v2415_v62 }
0x12b3   :  { %v1631_v50 = vpop.f32.mrb[32].mxu1 }
0x12b4   :  { %v1632_v3 = vadd.f32 %v2070_v44, %v1631_v50  ;;  %v2330_v14 = vpop.f32.mrb[33].mxu1 }
0x12b5   :  { %v1634_v18 = vpop.f32.mrb[34].mxu1 }
0x12b6   :  { %v1638_v20 = vmul.f32 %v1632_v3, %v2717_v53  ;;  %v1635_v22 = vadd.f32 %v2070_v44, %v1634_v18  ;;  %v2331_v23 = vpop.f32.mrb[35].mxu1 }
0x12b8   :  { %1640 = vst.msk [vmem:[%s3070_s14] sm:$0xff] %vm79_vm0, %v1638_v20  ;;  %v1639_v15 = vmul.f32 %v1635_v22, %v2719_v58  ;;  %v1746_v25 = vpop.f32.mrb[40].mxu0 }
0x12b9   :  { %v2342_v30 = vpop.f32.mrb[41].mxu0 }
0x12ba   :  { %1641 = vst.msk [vmem:[%s3070_s14 + $0x8] sm:$0xff] %vm79_vm0, %v1639_v15  ;;  %v1749_v33 = vpop.f32.mrb[42].mxu0 }
0x12bb   :  { %v1697_v34 = vpop.f32.mrb[36].mxu1  ;;  %v1880_v35 = vpack.c.bf16 %v1749_v33, %v1746_v25  ;;  %v2343_v53 = vpop.f32.mrb[43].mxu0 }
0x12bc   :  { %v2336_v37 = vpop.f32.mrb[37].mxu1 }
0x12bd   :  { %v1700_v38 = vpop.f32.mrb[38].mxu1  ;;  %2365 = vmatmul.mubr.msk.bf16.vlgmr.msra.gmra.mrb[44].mxu1 %vm79_vm0, %v1880_v35 }
0x12be   :  { %v1757_v52 = vpack.c.bf16 %v1700_v38, %v1697_v34  ;;  %v2337_v31 = vpop.f32.mrb[39].mxu1 }
0x12c0   :  { %2357 = vmatmul.mubr.msk.bf16.vlgmr.msra.gmra.mrb[44].mxu0 %vm79_vm0, %v1757_v52 }
0x12c3   :  { %v1812_v58 = vpop.f32.mrb[40].mxu1 }
0x12c4   :  { %v2350_v36 = vpop.f32.mrb[41].mxu1 }
0x12c5   :  { %v1815_v39 = vpop.f32.mrb[42].mxu1 }
0x12c6   :  { %v2351_v17 = vpop.f32.mrb[43].mxu1 }
0x1390   :  { %v1930_v55 = vpop.f32.mrb[44].mxu1 }
0x1391   :  { %v2366_v19 = vpop.f32.mrb[45].mxu1 }
0x1392   :  { %v1933_v21 = vpop.f32.mrb[46].mxu1 }
0x1393   :  { %v1868_v40 = vpop.f32.mrb[44].mxu0  ;;  %v2367_v13 = vpop.f32.mrb[47].mxu1 }
0x1394   :  { %v1869_v16 = vadd.f32 %v1868_v40, %v1812_v58  ;;  %v2358_v24 = vpop.f32.mrb[45].mxu0 }
0x1395   :  { %v1871_v42 = vpop.f32.mrb[46].mxu0 }
0x1396   :  { %v1937_v28 = vadd.f32 %v1930_v55, %v1869_v16  ;;  %v1872_v46 = vadd.f32 %v1871_v42, %v1815_v39  ;;  %v2359_v47 = vpop.f32.mrb[47].mxu0 }
0x1398   :  { %v1946_v49 = vadd.f32 %v2097_v41, %v1937_v28  ;;  %v1938_v51 = vadd.f32 %v1933_v21, %v1872_v46 }
0x139a   :  { %v1947_v56 = vadd.f32 %v2097_v41, %v1938_v51  ;;  %v1948_v57 = vmax.f32 %v1946_v49, 0.0 }
0x139c   :  { %v1957_v59 = vmul.f32 %v2098_v54, %v1948_v57  ;;  %v1949_v32 = vmax.f32 %v1947_v56, 0.0 }
0x139e   :  { %v1959_v61 = vsel %vm79_vm0, %v1957_v59, 0.0  ;;  %v1958_v48 = vmul.f32 %v2098_v54, %v1949_v32 }
0x139f   :  { %1960 = vadd.xlane.f32.xlu0 %v1959_v61 }
0x13a0   :  { %v1962_v63 = vsel %vm79_vm0, %v1958_v48, 0.0 }
0x13a1   :  { %1963 = vadd.xlane.f32.xlu1 %v1962_v63 }
0x142c   :  { %v1961_v27 = vpop.xlane.xlu0 %1960 }
0x142d   :  { %v1972_v4 = vadd.f32 %v2099_v2, %v1961_v27 }
0x142e   :  { %v1964_v5 = vpop.xlane.xlu1 %1963 }
0x142f   :  { %1975 = vst.msk [vmem:[%s3074_s15] sm:$0xff] %vm1974_vm12, %v1972_v4  ;;  %v1973_v60 = vadd.f32 %v2099_v2, %v1964_v5 }
0x1431   :  { %1976 = vst.msk [vmem:[%s3074_s15 + $0x8] sm:$0xff] %vm1974_vm12, %v1973_v60 }

// kernel: vits_forward.3
= control target key start
LH: loop header
LB: loop body
LE: loop exit
PB: predicated region body
PF: predicated region fallthrough
CT: control target
= control target key end

     0   :  { %vm53_vm0 = vcmask 130048   ;;  %vm158_vm1 = vcmask 261120   ;;  %vm456_vm6 = vcmask 523264   ;;  %s2303_s1 = inlined_call_operand.vmem [shape: f32[16,32], index: 1, kind: input, shape index: {}]   ;;  %s2304_s0 = inlined_call_operand.vmem [shape: f32[64,16], index: 0, kind: input, shape index: {}]   ;;  %s2305_s2 = inlined_call_operand.vmem [shape: bf16[32,16], index: 2, kind: input, shape index: {}]   ;;  %s2306_s4 = inlined_call_operand.vmem [shape: bf16[32,32], index: 4, kind: input, shape index: {}]   ;;  %s2307_s3 = inlined_call_operand.vmem [shape: f32[1,16], index: 3, kind: input, shape index: {}]   ;;  %s2308_s6 = inlined_call_operand.vmem [shape: bf16[3,32,64], index: 6, kind: input, shape index: {}]   ;;  %s2309_s5 = inlined_call_operand.vmem [shape: f32[1,32], index: 5, kind: input, shape index: {}]   ;;  %s2310_s8 = inlined_call_operand.vmem [shape: bf16[3,64,4], index: 8, kind: input, shape index: {}]   ;;  %s2311_s7 = inlined_call_operand.vmem [shape: f32[1,64], index: 7, kind: input, shape index: {}]   ;;  %s2312_s9 = inlined_call_operand.<no memory space> [shape: f32[1,1], index: 9, kind: input, shape index: {}]   ;;  %s2313_s10 = inlined_call_operand.vmem [shape: f32[64,4], index: 10, kind: output, shape index: {}]  }
   0x1   :  { %v46_v0 = vld [vmem:[%s2303_s1] sm:$0xff]  ;;  %v47_v1 = vld [vmem:[%s2303_s1 + $0x8] sm:$0xff]  ;;  %v40_v5 = vld [vmem:[%s2304_s0 + $0x10] sm:$0xff] }
   0x2   :  { %v38_v2 = vld [vmem:[%s2304_s0] sm:$0xff]  ;;  %v52_v3 = vpack.c.bf16 %v47_v1, %v46_v0  ;;  %v39_v4 = vld [vmem:[%s2304_s0 + $0x8] sm:$0xff]  ;;  %v41_v6 = vld [vmem:[%s2304_s0 + $0x18] sm:$0xff] }
   0x3   :  { %v48_v7 = vpack.c.bf16 %v39_v4, %v38_v2  ;;  %v42_v8 = vld [vmem:[%s2304_s0 + $0x20] sm:$0xff]  ;;  %v43_v9 = vld [vmem:[%s2304_s0 + $0x28] sm:$0xff]  ;;  %v49_v10 = vpack.c.bf16 %v41_v6, %v40_v5  ;;  %v44_v13 = vld [vmem:[%s2304_s0 + $0x30] sm:$0xff] }
   0x4   :  { %1694 = vmatprep.subr.bf16.mxu0 %v52_v3  ;;  %v50_v11 = vpack.c.bf16 %v43_v9, %v42_v8  ;;  %v1920_v12 = vld [vmem:[%s2305_s2] sm:$0xff]   ;;  %v45_v14 = vld [vmem:[%s2304_s0 + $0x38] sm:$0xff]  ;;  %v1921_v16 = vld [vmem:[%s2305_s2 + $0x8] sm:$0xff]  }
   0x5   :  { %1695 = vmatpush3.bf16.msra.mxu0 %v52_v3  ;;  %1696 = vmatprep.mubr.msk.bf16.mxu0 %vm53_vm0, %v48_v7  ;;  %v51_v15 = vpack.c.bf16 %v45_v14, %v44_v13  ;;  %v1922_v29 = vld [vmem:[%s2306_s4] sm:$0xff]   ;;  %v1923_v39 = vld [vmem:[%s2306_s4 + $0x8] sm:$0xff]  }
   0x6   :  { %1704 = vmatprep.subr.bf16.mxu1 %v1920_v12  ;;  %v1489_v30 = vld [vmem:[%s2307_s3] ss:$0 sm:$0xff]  ;;  %s1974_s3 = smov 16  }
   0x7   :  { %1705 = vmatpush3.bf16.msra.mxu1 %v1920_v12 }
   0x8   :  { %1697 = vmatmul.mubr.msk.bf16.vlgmr.msra.gmra.mrb[0].mxu0 %vm53_vm0, %v49_v10  ;;  %1706 = vmatprep.subr.bf16.mxu1 %v1921_v16 }
   0x9   :  { %1700 = vmatprep.mubr.msk.bf16.mxu0 %vm53_vm0, %v50_v11 }
   0xb   :  { %1707 = vmatpush3.bf16.msra.mxu1 %v1921_v16 }
   0xc   :  { %1716 = vmatprep.subr.bf16.mxu1 %v1922_v29 }
  0x10   :  { %1701 = vmatmul.mubr.msk.bf16.gmra.mrb[4].mxu0 %vm53_vm0, %v51_v15 }
  0xdb   :  { %v2072_v17 = vpop.f32.mrb[0].mxu0 }
  0xdc   :  { %v2074_v18 = vpop.f32.mrb[1].mxu0 }
  0xdd   :  { %v2076_v19 = vpop.f32.mrb[2].mxu0 }
  0xde   :  { %v136_v20 = vpack.c.bf16 %v2076_v19, %v2072_v17  ;;  %v2080_v21 = vpop.f32.mrb[3].mxu0 }
  0xdf   :  { %v135_v22 = vpack.c.bf16 %v2080_v21, %v2074_v18 }
  0xe1   :  { %1708 = vmatprep.mubr.msk.bf16.mxu1 %vm158_vm1, %v135_v22 }
  0xe2   :  { %1709 = vmatmul.mubr.msk.bf16.vlgmr.msra.gmra.mrb[0].mxu1 %vm158_vm1, %v136_v20  ;;  %v396_v20 = vlaneseq }
  0xe3   :  { %v2086_v23 = vpop.f32.mrb[4].mxu0  ;;  %1717 = vmatpush3.bf16.msra.mxu1 %v1922_v29  ;;  %v1975_v29 = vmov 0.0  }
  0xe4   :  { %v2088_v24 = vpop.f32.mrb[5].mxu0  ;;  %1718 = vmatprep.subr.bf16.mxu1 %v1923_v39  ;;  %v406_v22 = vand.u32 127, %v396_v20 }
  0xe5   :  { %v2090_v25 = vpop.f32.mrb[6].mxu0 }
  0xe6   :  { %v138_v26 = vpack.c.bf16 %v2090_v25, %v2086_v23  ;;  %v2094_v27 = vpop.f32.mrb[7].mxu0 }
  0xe7   :  { %v137_v28 = vpack.c.bf16 %v2094_v27, %v2088_v24  ;;  %1719 = vmatpush3.bf16.msra.mxu1 %v1923_v39 }
  0xe9   :  { %1712 = vmatprep.mubr.msk.bf16.mxu1 %vm158_vm1, %v137_v28 }
  0xea   :  { %1713 = vmatmul.mubr.msk.bf16.gmra.mrb[4].mxu1 %vm158_vm1, %v138_v26  ;;  %v407_v26 = vadd.s32 1, %v406_v22 }
 0x1b5   :  { %v1710_v31 = vpop.f32.mrb[0].mxu1 }
 0x1b6   :  { %v214_v32 = vadd.f32 %v1710_v31, %v1489_v30  ;;  %v205_v33 = vpop.f32.mrb[1].mxu1 }
 0x1b7   :  { %v206_v34 = vadd.f32 %v1489_v30, %v205_v33  ;;  %v1711_v35 = vpop.f32.mrb[2].mxu1 }
 0x1b8   :  { %1942 = vtanh.f32 %v214_v32  ;;  %v217_v36 = vadd.f32 %v1711_v35, %v1489_v30  ;;  %v208_v37 = vpop.f32.mrb[3].mxu1 }
 0x1b9   :  { %1944 = vtanh.f32 %v206_v34  ;;  %v209_v38 = vadd.f32 %v1489_v30, %v208_v37 }
 0x1ba   :  { %1946 = vtanh.f32 %v217_v36 }
 0x1bb   :  { %1948 = vtanh.f32 %v209_v38 }
 0x1bd   :  { %v1714_v40 = vpop.f32.mrb[4].mxu1 }
 0x1be   :  { %v221_v41 = vpop.f32.mrb[5].mxu1  ;;  %v230_v45 = vadd.f32 %v1714_v40, %v1489_v30 }
 0x1bf   :  { %v222_v42 = vadd.f32 %v1489_v30, %v221_v41  ;;  %v1715_v43 = vpop.f32.mrb[6].mxu1 }
 0x1c0   :  { %v224_v44 = vpop.f32.mrb[7].mxu1  ;;  %v233_v49 = vadd.f32 %v1715_v43, %v1489_v30 }
 0x1c1   :  { %1950 = vtanh.f32 %v222_v42  ;;  %v225_v46 = vadd.f32 %v1489_v30, %v224_v44 }
 0x1c2   :  { %v1943_v47 = vpop.eup %1942 }
 0x1c3   :  { %v1945_v48 = vpop.eup %1944  ;;  %1952 = vtanh.f32 %v225_v46  ;;  %256 = vrot.lane.b32.xlu1 %v1943_v47, %s1974_s3 }
 0x1c4   :  { %252 = vrot.lane.b32.xlu0 %v1945_v48, %s1974_s3  ;;  %1954 = vtanh.f32 %v230_v45  ;;  %v1947_v50 = vpop.eup %1946 }
 0x1c5   :  { %v1949_v51 = vpop.eup %1948  ;;  %1956 = vtanh.f32 %v233_v49 }
 0x1c7   :  { %258 = vrot.lane.b32.xlu1 %v1947_v50, %s1974_s3 }
 0x1c8   :  { %254 = vrot.lane.b32.xlu0 %v1949_v51, %s1974_s3 }
 0x1cb   :  { %v1951_v52 = vpop.eup %1950 }
 0x1cc   :  { %260 = vrot.lane.b32.xlu0 %v1951_v52, %s1974_s3 }
 0x1cd   :  { %v1953_v53 = vpop.eup %1952 }
 0x1ce   :  { %262 = vrot.lane.b32.xlu1 %v1953_v53, %s1974_s3  ;;  %v1955_v54 = vpop.eup %1954 }
 0x1cf   :  { %v1957_v55 = vpop.eup %1956 }
 0x1d0   :  { %264 = vrot.lane.b32.xlu0 %v1955_v54, %s1974_s3 }
 0x1d2   :  { %266 = vrot.lane.b32.xlu1 %v1957_v55, %s1974_s3 }
 0x235   :  { %v257_v56 = vpop.permute.xlu1 %256 }
 0x236   :  { %v253_v57 = vpop.permute.xlu0 %252  ;;  %v278_v58 = vsel %vm53_vm0, 0.0, %v257_v56 }
 0x237   :  { %v276_v59 = vsel %vm53_vm0, 0.0, %v253_v57  ;;  %v286_v63 = vsub.f32 %v2072_v17, %v278_v58 }
 0x238   :  { %v284_v2 = vsub.f32 %v2074_v18, %v276_v59 }
 0x239   :  { %v259_v60 = vpop.permute.xlu1 %258 }
 0x23a   :  { %v279_v61 = vsel %vm53_vm0, 0.0, %v259_v60  ;;  %v255_v62 = vpop.permute.xlu0 %254 }
 0x23b   :  { %v287_v0 = vsub.f32 %v2076_v19, %v279_v61  ;;  %v277_v1 = vsel %vm53_vm0, 0.0, %v255_v62 }
 0x23c   :  { %v285_v3 = vsub.f32 %v2080_v21, %v277_v1  ;;  %v397_v21 = vshrl.u32 %v396_v20, 7  ;;  %v1496_v1 = vld [vmem:[%s2309_s5] ss:$0 sm:$0xff] }
 0x23d   :  { %v297_v4 = vpack.c.bf16 %v287_v0, %v286_v63 }
 0x23e   :  { %v296_v5 = vpack.c.bf16 %v285_v3, %v284_v2  ;;  %v261_v6 = vpop.permute.xlu0 %260  ;;  %v400_v28 = vadd.s32 24, %v397_v21  ;;  %vm408_vm2 = vcmp.eq.s32.totalorder %v397_v21, %v407_v26  ;;  %v401_v34 = vadd.s32 32, %v397_v21 }
 0x23f   :  { %v280_v7 = vsel %vm53_vm0, 0.0, %v261_v6  ;;  %v1503_v30 = vsel %vm408_vm2, 1.0, %v1975_v29  ;;  %v402_v35 = vadd.s32 40, %v397_v21  ;;  %v403_v36 = vadd.s32 48, %v397_v21 }
 0x240   :  { %1720 = vmatprep.mubr.msk.bf16.mxu1 %vm158_vm1, %v296_v5  ;;  %v263_v8 = vpop.permute.xlu1 %262  ;;  %v288_v10 = vsub.f32 %v2088_v24, %v280_v7  ;;  %v398_v24 = vadd.s32 8, %v397_v21  ;;  %vm411_vm5 = vcmp.eq.s32.totalorder %v400_v28, %v407_v26  ;;  %v404_v37 = vadd.s32 56, %v397_v21 }
 0x241   :  { %v281_v9 = vsel %vm53_vm0, 0.0, %v263_v8  ;;  %1721 = vmatmul.mubr.msk.bf16.vlgmr.msra.gmra.mrb[8].mxu1 %vm158_vm1, %v297_v4  ;;  %v1506_v32 = vsel %vm411_vm5, 1.0, %v1975_v29  ;;  %vm412_vm7 = vcmp.eq.s32.totalorder %v401_v34, %v407_v26  ;;  %vm413_vm8 = vcmp.eq.s32.totalorder %v402_v35, %v407_v26 }
 0x242   :  { %v289_v11 = vsub.f32 %v2094_v27, %v281_v9  ;;  %v265_v12 = vpop.permute.xlu0 %264  ;;  %v399_v27 = vadd.s32 16, %v397_v21  ;;  %vm409_vm3 = vcmp.eq.s32.totalorder %v398_v24, %v407_v26  ;;  %v1507_v38 = vsel %vm412_vm7, 1.0, %v1975_v29 }
 0x243   :  { %v282_v13 = vsel %vm53_vm0, 0.0, %v265_v12  ;;  %v1504_v31 = vsel %vm409_vm3, 1.0, %v1975_v29  ;;  %v1508_v39 = vsel %vm413_vm8, 1.0, %v1975_v29  ;;  %vm414_vm9 = vcmp.eq.s32.totalorder %v403_v36, %v407_v26 }
 0x244   :  { %v298_v14 = vpack.c.bf16 %v289_v11, %v288_v10  ;;  %v267_v15 = vpop.permute.xlu1 %266  ;;  %v290_v17 = vsub.f32 %v2086_v23, %v282_v13  ;;  %vm410_vm4 = vcmp.eq.s32.totalorder %v399_v27, %v407_v26  ;;  %v2129_v23 = vpack.c.bf16 %v1504_v31, %v1503_v30 }
 0x245   :  { %v283_v16 = vsel %vm53_vm0, 0.0, %v267_v15  ;;  %vm415_vm10 = vcmp.eq.s32.totalorder %v404_v37, %v407_v26  ;;  %v2135_v40 = vpack.c.bf16 %v1508_v39, %v1507_v38  ;;  %v1509_v41 = vsel %vm414_vm9, 1.0, %v1975_v29  ;;  %v1927_v26 = vld [vmem:[%s2308_s6 + $0x8] sm:$0xff]  }
 0x246   :  { %v291_v18 = vsub.f32 %v2090_v25, %v283_v16  ;;  %1724 = vmatprep.mubr.msk.bf16.mxu1 %vm158_vm1, %v298_v14  ;;  %v1505_v25 = vsel %vm410_vm4, 1.0, %v1975_v29  ;;  %v1510_v42 = vsel %vm415_vm10, 1.0, %v1975_v29  ;;  %v416_v44 = vadd.s32 1, %v397_v21  ;;  %v1924_v21 = vld [vmem:[%s2308_s6 + $0x10] sm:$0xff]   ;;  %v1929_v39 = vld [vmem:[%s2308_s6 + $0x28] sm:$0xff]  }
 0x247   :  { %v2131_v33 = vpack.c.bf16 %v1506_v32, %v1505_v25  ;;  %v2137_v43 = vpack.c.bf16 %v1510_v42, %v1509_v41  ;;  %v417_v45 = vadd.s32 1, %v398_v24  ;;  %v418_v46 = vadd.s32 1, %v399_v27  ;;  %v1926_v24 = vld [vmem:[%s2308_s6] sm:$0xff]  }
 0x248   :  { %v299_v19 = vpack.c.bf16 %v291_v18, %v290_v17  ;;  %vm424_vm11 = vcmp.eq.s32.totalorder %v406_v22, %v416_v44  ;;  %v419_v47 = vadd.s32 1, %v400_v28  ;;  %v420_v54 = vadd.s32 1, %v401_v34  ;;  %v1928_v27 = vld [vmem:[%s2308_s6 + $0x20] sm:$0xff]  }
 0x249   :  { %vm425_vm12 = vcmp.eq.s32.totalorder %v406_v22, %v417_v45  ;;  %v1515_v48 = vsel %vm424_vm11, 1.0, %v1975_v29  ;;  %vm426_vm13 = vcmp.eq.s32.totalorder %v406_v22, %v418_v46  ;;  %v421_v55 = vadd.s32 1, %v402_v35 }
 0x24a   :  { %1725 = vmatmul.mubr.msk.bf16.gmra.mrb[12].mxu1 %vm158_vm1, %v299_v19  ;;  %v1516_v49 = vsel %vm425_vm12, 1.0, %v1975_v29  ;;  %vm427_vm14 = vcmp.eq.s32.totalorder %v406_v22, %v419_v47  ;;  %v1517_v50 = vsel %vm426_vm13, 1.0, %v1975_v29  ;;  %v422_v56 = vadd.s32 1, %v403_v36 }
 0x24b   :  { %1736 = vmatprep.mubr.msk.bf16.mxu1 %vm456_vm6, %v2129_v23  ;;  %v2139_v51 = vpack.c.bf16 %v1516_v49, %v1515_v48  ;;  %v1518_v52 = vsel %vm427_vm14, 1.0, %v1975_v29  ;;  %v423_v57 = vadd.s32 1, %v404_v37  ;;  %vm428_vm15 = vcmp.eq.s32.totalorder %v406_v22, %v420_v54 }
 0x24c   :  { %v2141_v53 = vpack.c.bf16 %v1518_v52, %v1517_v50  ;;  %vm429_vm0 = vcmp.eq.s32.totalorder %v406_v22, %v421_v55  ;;  %v1519_v58 = vsel %vm428_vm15, 1.0, %v1975_v29  ;;  %vm430_vm2 = vcmp.eq.s32.totalorder %v406_v22, %v422_v56  ;;  %v1553_v56 = vld [vmem:[%s2311_s7] ss:$0 sm:$0xff] }
 0x24d   :  { %1752 = vmatprep.mubr.msk.bf16.mxu0 %vm456_vm6, %v2139_v51  ;;  %v1520_v59 = vsel %vm429_vm0, 1.0, %v1975_v29  ;;  %vm431_vm3 = vcmp.eq.s32.totalorder %v406_v22, %v423_v57  ;;  %v1521_v61 = vsel %vm430_vm2, 1.0, %v1975_v29  ;;  %v1925_v22 = vld [vmem:[%s2308_s6 + $0x18] sm:$0xff]  }
 0x24e   :  { %v2145_v60 = vpack.c.bf16 %v1520_v59, %v1519_v58  ;;  %v1522_v62 = vsel %vm431_vm3, 1.0, %v1975_v29 }
 0x24f   :  { %v2147_v63 = vpack.c.bf16 %v1522_v62, %v1521_v61 }
 0x314   :  { %v1722_v0 = vpop.f32.mrb[8].mxu1 }
 0x315   :  { %v365_v2 = vpop.f32.mrb[9].mxu1  ;;  %v374_v4 = vadd.f32 %v1722_v0, %v1496_v1 }
 0x316   :  { %v1723_v3 = vpop.f32.mrb[10].mxu1  ;;  %v366_v7 = vadd.f32 %v1496_v1, %v365_v2 }
 0x317   :  { %v377_v5 = vadd.f32 %v1723_v3, %v1496_v1  ;;  %v368_v6 = vpop.f32.mrb[11].mxu1 }
 0x318   :  { %v369_v8 = vadd.f32 %v1496_v1, %v368_v6 }
 0x319   :  { %v453_v9 = vpack.c.bf16 %v377_v5, %v374_v4 }
 0x31a   :  { %v452_v10 = vpack.c.bf16 %v369_v8, %v366_v7 }
 0x31c   :  { %1728 = vmatprep.subr.bf16.mxu1 %v452_v10  ;;  %1744 = vmatprep.subr.bf16.mxu0 %v452_v10 }
 0x31d   :  { %v1726_v11 = vpop.f32.mrb[12].mxu1  ;;  %1729 = vmatpush3.bf16.msra.mxu1 %v452_v10  ;;  %1745 = vmatpush3.bf16.msra.mxu0 %v452_v10 }
 0x31e   :  { %v381_v12 = vpop.f32.mrb[13].mxu1  ;;  %1730 = vmatprep.subr.bf16.mxu1 %v453_v9  ;;  %1746 = vmatprep.subr.bf16.mxu0 %v453_v9  ;;  %v390_v14 = vadd.f32 %v1726_v11, %v1496_v1 }
 0x31f   :  { %v1727_v13 = vpop.f32.mrb[14].mxu1  ;;  %v382_v17 = vadd.f32 %v1496_v1, %v381_v12 }
 0x320   :  { %v393_v15 = vadd.f32 %v1727_v13, %v1496_v1  ;;  %v384_v16 = vpop.f32.mrb[15].mxu1 }
 0x321   :  { %v385_v18 = vadd.f32 %v1496_v1, %v384_v16  ;;  %1731 = vmatpush3.bf16.msra.mxu1 %v453_v9  ;;  %1747 = vmatpush3.bf16.msra.mxu0 %v453_v9 }
 0x322   :  { %v455_v19 = vpack.c.bf16 %v393_v15, %v390_v14 }
 0x323   :  { %v454_v20 = vpack.c.bf16 %v385_v18, %v382_v17 }
 0x325   :  { %1732 = vmatprep.subr.bf16.mxu1 %v454_v20  ;;  %1748 = vmatprep.subr.bf16.mxu0 %v454_v20 }
 0x326   :  { %1733 = vmatpush3.bf16.msra.mxu1 %v454_v20  ;;  %1749 = vmatpush3.bf16.msra.mxu0 %v454_v20 }
 0x327   :  { %1734 = vmatprep.subr.bf16.mxu1 %v455_v19  ;;  %1750 = vmatprep.subr.bf16.mxu0 %v455_v19 }
 0x32a   :  { %1735 = vmatpush3.bf16.msra.mxu1 %v455_v19  ;;  %1751 = vmatpush3.bf16.msra.mxu0 %v455_v19 }
 0x32b   :  { %1760 = vmatprep.subr.bf16.mxu1 %v1924_v21 }
 0x32d   :  { %1737 = vmatmul.mubr.msk.bf16.vlgmr.msra.gmra.mrb[16].mxu1 %vm456_vm6, %v2131_v33  ;;  %1753 = vmatmul.mubr.msk.bf16.vlgmr.msra.gmra.mrb[8].mxu0 %vm456_vm6, %v2141_v53 }
 0x32e   :  { %1740 = vmatprep.mubr.msk.bf16.mxu1 %vm456_vm6, %v2135_v40  ;;  %1761 = vmatpush3.bf16.msra.mxu1 %v1924_v21 }
 0x32f   :  { %1762 = vmatprep.subr.bf16.mxu1 %v1925_v22  ;;  %1756 = vmatprep.mubr.msk.bf16.mxu0 %vm456_vm6, %v2145_v60 }
 0x332   :  { %1763 = vmatpush3.bf16.msra.mxu1 %v1925_v22 }
 0x333   :  { %1772 = vmatprep.subr.bf16.mxu1 %v1926_v24 }
 0x335   :  { %1741 = vmatmul.mubr.msk.bf16.gmra.mrb[20].mxu1 %vm456_vm6, %v2137_v43  ;;  %1757 = vmatmul.mubr.msk.bf16.gmra.mrb[12].mxu0 %vm456_vm6, %v2147_v63 }
 0x336   :  { %1764 = vmatprep.mubr.msk.bf16.mxu1 %vm158_vm1, %v452_v10  ;;  %1804 = vmatprep.mubr.msk.bf16.mxu0 %vm456_vm6, %v2129_v23 }
 0x33d   :  { %1765 = vmatmul.mubr.msk.bf16.vlgmr.msra.gmra.mrb[24].mxu1 %vm158_vm1, %v453_v9 }
 0x33e   :  { %1768 = vmatprep.mubr.msk.bf16.mxu1 %vm158_vm1, %v454_v20  ;;  %1773 = vmatpush3.bf16.msra.mxu1 %v1926_v24 }
 0x33f   :  { %1774 = vmatprep.subr.bf16.mxu1 %v1927_v26 }
 0x342   :  { %1775 = vmatpush3.bf16.msra.mxu1 %v1927_v26 }
 0x343   :  { %1784 = vmatprep.subr.bf16.mxu1 %v1928_v27 }
 0x345   :  { %1769 = vmatmul.mubr.msk.bf16.gmra.mrb[28].mxu1 %vm158_vm1, %v455_v19 }
 0x400   :  { %v1738_v28 = vpop.f32.mrb[16].mxu1  ;;  %v1754_v29 = vpop.f32.mrb[8].mxu0 }
 0x401   :  { %v503_v30 = vpop.f32.mrb[17].mxu1  ;;  %v600_v31 = vpop.f32.mrb[9].mxu0 }
 0x402   :  { %v1739_v23 = vpop.f32.mrb[18].mxu1  ;;  %v1755_v25 = vpop.f32.mrb[10].mxu0 }
 0x403   :  { %v636_v32 = vpack.c.bf16 %v1739_v23, %v1738_v28  ;;  %v506_v34 = vpop.f32.mrb[19].mxu1  ;;  %v828_v35 = vpack.c.bf16 %v1755_v25, %v1754_v29  ;;  %v603_v36 = vpop.f32.mrb[11].mxu0  ;;  %v1937_v25 = vld [vmem:[%s2310_s8 + $0x18] sm:$0xff]  }
 0x404   :  { %v635_v37 = vpack.c.bf16 %v506_v34, %v503_v30  ;;  %v827_v38 = vpack.c.bf16 %v603_v36, %v600_v31  ;;  %v1939_v34 = vld [vmem:[%s2310_s8 + $0x48] sm:$0xff]   ;;  %v1941_v36 = vld [vmem:[%s2310_s8 + $0x58] sm:$0xff]  }
 0x406   :  { %1776 = vmatprep.mubr.msk.bf16.mxu1 %vm158_vm1, %v635_v37  ;;  %v1976_v37 = vmov 0  }
 0x407   :  { %1777 = vmatmul.mubr.msk.bf16.vlgmr.msra.gmra.mrb[24].mxu1 %vm158_vm1, %v636_v32  ;;  %v1938_v32 = vld [vmem:[%s2310_s8 + $0x40] sm:$0xff]   ;;  %1919 = vset.pattern.permute.xlu0 %v1976_v37 }
 0x408   :  { %v1742_v41 = vpop.f32.mrb[20].mxu1  ;;  %1785 = vmatpush3.bf16.msra.mxu1 %v1928_v27  ;;  %v1758_v42 = vpop.f32.mrb[12].mxu0 }
 0x409   :  { %v519_v44 = vpop.f32.mrb[21].mxu1  ;;  %1786 = vmatprep.subr.bf16.mxu1 %v1929_v39  ;;  %v616_v45 = vpop.f32.mrb[13].mxu0 }
 0x40a   :  { %v1743_v46 = vpop.f32.mrb[22].mxu1  ;;  %v1759_v47 = vpop.f32.mrb[14].mxu0 }
 0x40b   :  { %v638_v48 = vpack.c.bf16 %v1743_v46, %v1742_v41  ;;  %v522_v49 = vpop.f32.mrb[23].mxu1  ;;  %v830_v50 = vpack.c.bf16 %v1759_v47, %v1758_v42  ;;  %v619_v52 = vpop.f32.mrb[15].mxu0 }
 0x40c   :  { %v637_v54 = vpack.c.bf16 %v522_v49, %v519_v44  ;;  %1787 = vmatpush3.bf16.msra.mxu1 %v1929_v39  ;;  %v829_v55 = vpack.c.bf16 %v619_v52, %v616_v45 }
 0x40d   :  { %1876 = vmatprep.subr.bf16.mxu1 %v1938_v32 }
 0x40e   :  { %1780 = vmatprep.mubr.msk.bf16.mxu1 %vm158_vm1, %v637_v54 }
 0x40f   :  { %1781 = vmatmul.mubr.msk.bf16.gmra.mrb[28].mxu1 %vm158_vm1, %v638_v48 }
 0x410   :  { %1788 = vmatprep.mubr.msk.bf16.mxu1 %vm158_vm1, %v827_v38  ;;  %v15_v38 = vstv %s2312_s9 }
 0x411   :  { %16 = vst [vmem:[#allocation2] sm:$0x1] %v15_v38 }
 0x417   :  { %1789 = vmatmul.mubr.msk.bf16.vlgmr.msra.gmra.mrb[24].mxu1 %vm158_vm1, %v828_v35  ;;  %v1940_v35 = vld [vmem:[%s2310_s8 + $0x50] sm:$0xff]  }
 0x418   :  { %1792 = vmatprep.mubr.msk.bf16.mxu1 %vm158_vm1, %v829_v55  ;;  %1880 = vmatpush3.bf16.msra.mxu1 %v1938_v32  ;;  %v1602_v39 = vld [vmem:[#allocation2] ss:$0 sm:$0xff] }
 0x419   :  { %1877 = vmatprep.subr.bf16.mxu1 %v1939_v34  ;;  %1453 = vperm.xlu0 %1919, %v1602_v39  }
 0x41c   :  { %1881 = vmatpush3.bf16.msra.mxu1 %v1939_v34 }
 0x41d   :  { %1878 = vmatprep.subr.bf16.mxu1 %v1940_v35 }
 0x41f   :  { %1793 = vmatmul.mubr.msk.bf16.gmra.mrb[28].mxu1 %vm158_vm1, %v830_v50 }
 0x420   :  { %1882 = vmatpush3.bf16.msra.mxu1 %v1940_v35 }
 0x421   :  { %1879 = vmatprep.subr.bf16.mxu1 %v1941_v36 }
 0x424   :  { %1883 = vmatpush3.bf16.msra.mxu1 %v1941_v36 }
 0x4ea   :  { %v1790_v57 = vpop.f32.mrb[24].mxu1 }
 0x4eb   :  { %v937_v58 = vadd.f32 %v1790_v57, %v1553_v56  ;;  %v889_v59 = vpop.f32.mrb[25].mxu1 }
 0x4ec   :  { %v935_v61 = vadd.f32 %v1553_v56, %v889_v59  ;;  %v1791_v62 = vpop.f32.mrb[26].mxu1 }
 0x4ed   :  { %v953_v0 = vmul.f32 0.1, %v937_v58  ;;  %v938_v1 = vadd.f32 %v1791_v62, %v1553_v56  ;;  %v892_v2 = vpop.f32.mrb[27].mxu1  ;;  %vm945_vm4 = vcmp.gt.f32.partialorder %v937_v58, 0.0 }
 0x4ee   :  { %v951_v3 = vmul.f32 0.1, %v935_v61  ;;  %v936_v4 = vadd.f32 %v1553_v56, %v892_v2  ;;  %vm943_vm5 = vcmp.gt.f32.partialorder %v935_v61, 0.0 }
 0x4ef   :  { %vm946_vm7 = vcmp.gt.f32.partialorder %v938_v1, 0.0  ;;  %v954_v5 = vmul.f32 0.1, %v938_v1  ;;  %v961_v7 = vsel %vm945_vm4, %v937_v58, %v953_v0 }
 0x4f0   :  { %vm944_vm8 = vcmp.gt.f32.partialorder %v936_v4, 0.0  ;;  %v952_v6 = vmul.f32 0.1, %v936_v4  ;;  %v959_v9 = vsel %vm943_vm5, %v935_v61, %v951_v3 }
 0x4f1   :  { %v962_v8 = vsel %vm946_vm7, %v938_v1, %v954_v5 }
 0x4f2   :  { %v2199_v10 = vpack.c.bf16 %v962_v8, %v961_v7  ;;  %v960_v11 = vsel %vm944_vm8, %v936_v4, %v952_v6  ;;  %v1794_v12 = vpop.f32.mrb[28].mxu1 }
 0x4f3   :  { %v967_v13 = vpack.c.bf16 %v960_v11, %v959_v9  ;;  %v941_v14 = vadd.f32 %v1794_v12, %v1553_v56  ;;  %v905_v15 = vpop.f32.mrb[29].mxu1 }
 0x4f4   :  { %v939_v16 = vadd.f32 %v1553_v56, %v905_v15  ;;  %v1795_v17 = vpop.f32.mrb[30].mxu1 }
 0x4f5   :  { %v957_v18 = vmul.f32 0.1, %v941_v14  ;;  %v942_v19 = vadd.f32 %v1795_v17, %v1553_v56  ;;  %v908_v20 = vpop.f32.mrb[31].mxu1  ;;  %1796 = vmatprep.subr.bf16.mxu0 %v967_v13  ;;  %vm949_vm1 = vcmp.gt.f32.partialorder %v941_v14, 0.0 }
 0x4f6   :  { %v955_v21 = vmul.f32 0.1, %v939_v16  ;;  %v940_v22 = vadd.f32 %v1553_v56, %v908_v20  ;;  %1797 = vmatpush3.bf16.msra.mxu0 %v967_v13  ;;  %vm947_vm9 = vcmp.gt.f32.partialorder %v939_v16, 0.0 }
 0x4f7   :  { %vm950_vm10 = vcmp.gt.f32.partialorder %v942_v19, 0.0  ;;  %v958_v24 = vmul.f32 0.1, %v942_v19  ;;  %1798 = vmatprep.subr.bf16.mxu0 %v2199_v10  ;;  %v965_v27 = vsel %vm949_vm1, %v941_v14, %v957_v18 }
 0x4f8   :  { %vm948_vm11 = vcmp.gt.f32.partialorder %v940_v22, 0.0  ;;  %v956_v26 = vmul.f32 0.1, %v940_v22  ;;  %v963_v29 = vsel %vm947_vm9, %v939_v16, %v955_v21 }
 0x4f9   :  { %v966_v28 = vsel %vm950_vm10, %v942_v19, %v958_v24 }
 0x4fa   :  { %v970_v30 = vpack.c.bf16 %v966_v28, %v965_v27  ;;  %v964_v31 = vsel %vm948_vm11, %v940_v22, %v956_v26  ;;  %1799 = vmatpush3.bf16.msra.mxu0 %v2199_v10 }
 0x4fb   :  { %v969_v23 = vpack.c.bf16 %v964_v31, %v963_v29 }
 0x4fd   :  { %1800 = vmatprep.subr.bf16.mxu0 %v969_v23 }
 0x4fe   :  { %1801 = vmatpush3.bf16.msra.mxu0 %v969_v23 }
 0x4ff   :  { %1802 = vmatprep.subr.bf16.mxu0 %v970_v30 }
 0x502   :  { %1803 = vmatpush3.bf16.msra.mxu0 %v970_v30 }
 0x503   :  { %1812 = vmatprep.subr.bf16.mxu0 %v967_v13 }
 0x505   :  { %1805 = vmatmul.mubr.msk.bf16.vlgmr.msra.gmra.mrb[16].mxu0 %vm456_vm6, %v2131_v33  ;;  %v1930_v33 = vld [vmem:[%s2310_s8 + $0x20] sm:$0xff]  }
 0x506   :  { %1813 = vmatpush3.bf16.msra.mxu0 %v967_v13  ;;  %1808 = vmatprep.mubr.msk.bf16.mxu0 %vm456_vm6, %v2135_v40  ;;  %v1931_v40 = vld [vmem:[%s2310_s8 + $0x28] sm:$0xff]  }
 0x507   :  { %1814 = vmatprep.subr.bf16.mxu0 %v2199_v10 }
 0x50a   :  { %1815 = vmatpush3.bf16.msra.mxu0 %v2199_v10 }
 0x50b   :  { %1816 = vmatprep.subr.bf16.mxu0 %v969_v23 }
 0x50d   :  { %1809 = vmatmul.mubr.msk.bf16.gmra.mrb[20].mxu0 %vm456_vm6, %v2137_v43  ;;  %v1932_v43 = vld [vmem:[%s2310_s8 + $0x30] sm:$0xff]  }
 0x50e   :  { %1817 = vmatpush3.bf16.msra.mxu0 %v969_v23  ;;  %1820 = vmatprep.mubr.msk.bf16.mxu0 %vm456_vm6, %v2139_v51  ;;  %v1933_v51 = vld [vmem:[%s2310_s8 + $0x38] sm:$0xff]  }
 0x50f   :  { %1818 = vmatprep.subr.bf16.mxu0 %v970_v30 }
 0x512   :  { %1819 = vmatpush3.bf16.msra.mxu0 %v970_v30 }
 0x513   :  { %1828 = vmatprep.subr.bf16.mxu0 %v1930_v33 }
 0x515   :  { %1821 = vmatmul.mubr.msk.bf16.vlgmr.msra.gmra.mrb[24].mxu0 %vm456_vm6, %v2141_v53  ;;  %v1934_v53 = vld [vmem:[%s2310_s8] sm:$0xff]  }
 0x516   :  { %1829 = vmatpush3.bf16.msra.mxu0 %v1930_v33  ;;  %1824 = vmatprep.mubr.msk.bf16.mxu0 %vm456_vm6, %v2145_v60  ;;  %v1935_v60 = vld [vmem:[%s2310_s8 + $0x8] sm:$0xff]  }
 0x517   :  { %1830 = vmatprep.subr.bf16.mxu0 %v1931_v40 }
 0x51a   :  { %1831 = vmatpush3.bf16.msra.mxu0 %v1931_v40 }
 0x51b   :  { %1832 = vmatprep.subr.bf16.mxu0 %v1932_v43 }
 0x51d   :  { %1825 = vmatmul.mubr.msk.bf16.gmra.mrb[28].mxu0 %vm456_vm6, %v2147_v63  ;;  %v1936_v63 = vld [vmem:[%s2310_s8 + $0x10] sm:$0xff]  }
 0x51e   :  { %1833 = vmatpush3.bf16.msra.mxu0 %v1932_v43  ;;  %1836 = vmatprep.mubr.msk.bf16.mxu0 %vm456_vm6, %v967_v13 }
 0x51f   :  { %1834 = vmatprep.subr.bf16.mxu0 %v1933_v51 }
 0x522   :  { %1835 = vmatpush3.bf16.msra.mxu0 %v1933_v51 }
 0x523   :  { %1844 = vmatprep.subr.bf16.mxu0 %v1934_v53 }
 0x525   :  { %1837 = vmatmul.mubr.msk.bf16.vlgmr.msra.gmra.mrb[32].mxu0 %vm456_vm6, %v2199_v10  ;;  %v1454_v10 = vpop.permute.xlu0 %1453 }
 0x526   :  { %1840 = vmatprep.mubr.msk.bf16.mxu0 %vm456_vm6, %v969_v23  ;;  %1845 = vmatpush3.bf16.msra.mxu0 %v1934_v53 }
 0x527   :  { %1846 = vmatprep.subr.bf16.mxu0 %v1935_v60 }
 0x52a   :  { %1847 = vmatpush3.bf16.msra.mxu0 %v1935_v60 }
 0x52b   :  { %1848 = vmatprep.subr.bf16.mxu0 %v1936_v63 }
 0x52d   :  { %1841 = vmatmul.mubr.msk.bf16.gmra.mrb[36].mxu0 %vm456_vm6, %v970_v30 }
 0x52e   :  { %1849 = vmatpush3.bf16.msra.mxu0 %v1936_v63 }
 0x52f   :  { %1850 = vmatprep.subr.bf16.mxu0 %v1937_v25 }
 0x532   :  { %1851 = vmatpush3.bf16.msra.mxu0 %v1937_v25 }
 0x533   :  { %1860 = vmatprep.subr.bf16.mxu0 %v1938_v32 }
 0x5d8   :  { %v1806_v41 = vpop.f32.mrb[16].mxu0 }
 0x5d9   :  { %v1005_v42 = vpop.f32.mrb[17].mxu0 }
 0x5da   :  { %v1807_v44 = vpop.f32.mrb[18].mxu0 }
 0x5db   :  { %v1110_v45 = vpack.c.bf16 %v1807_v44, %v1806_v41  ;;  %v1008_v46 = vpop.f32.mrb[19].mxu0 }
 0x5dc   :  { %v1109_v47 = vpack.c.bf16 %v1008_v46, %v1005_v42 }
 0x5de   :  { %1852 = vmatprep.mubr.msk.bf16.mxu0 %vm456_vm6, %v1109_v47 }
 0x5df   :  { %1853 = vmatmul.mubr.msk.bf16.vlgmr.msra.gmra.mrb[32].mxu0 %vm456_vm6, %v1110_v45 }
 0x5e0   :  { %v1810_v48 = vpop.f32.mrb[20].mxu0  ;;  %1861 = vmatpush3.bf16.msra.mxu0 %v1938_v32 }
 0x5e1   :  { %v1021_v49 = vpop.f32.mrb[21].mxu0  ;;  %1862 = vmatprep.subr.bf16.mxu0 %v1939_v34 }
 0x5e2   :  { %v1811_v50 = vpop.f32.mrb[22].mxu0 }
 0x5e3   :  { %v1112_v52 = vpack.c.bf16 %v1811_v50, %v1810_v48  ;;  %v1024_v54 = vpop.f32.mrb[23].mxu0 }
 0x5e4   :  { %v1111_v55 = vpack.c.bf16 %v1024_v54, %v1021_v49  ;;  %1863 = vmatpush3.bf16.msra.mxu0 %v1939_v34 }
 0x5e5   :  { %1864 = vmatprep.subr.bf16.mxu0 %v1940_v35 }
 0x5e6   :  { %1856 = vmatprep.mubr.msk.bf16.mxu0 %vm456_vm6, %v1111_v55 }
 0x5e7   :  { %1857 = vmatmul.mubr.msk.bf16.gmra.mrb[36].mxu0 %vm456_vm6, %v1112_v52 }
 0x5e8   :  { %v1822_v56 = vpop.f32.mrb[24].mxu0  ;;  %1865 = vmatpush3.bf16.msra.mxu0 %v1940_v35 }
 0x5e9   :  { %v1070_v57 = vpop.f32.mrb[25].mxu0  ;;  %1866 = vmatprep.subr.bf16.mxu0 %v1941_v36 }
 0x5ea   :  { %v1823_v58 = vpop.f32.mrb[26].mxu0 }
 0x5eb   :  { %v1334_v59 = vpack.c.bf16 %v1823_v58, %v1822_v56  ;;  %v1073_v61 = vpop.f32.mrb[27].mxu0 }
 0x5ec   :  { %v1333_v62 = vpack.c.bf16 %v1073_v61, %v1070_v57  ;;  %1867 = vmatpush3.bf16.msra.mxu0 %v1941_v36 }
 0x5ee   :  { %1868 = vmatprep.mubr.msk.bf16.mxu0 %vm456_vm6, %v1333_v62 }
 0x5ef   :  { %1869 = vmatmul.mubr.msk.bf16.vlgmr.msra.gmra.mrb[32].mxu0 %vm456_vm6, %v1334_v59 }
 0x5f0   :  { %v1826_v0 = vpop.f32.mrb[28].mxu0 }
 0x5f1   :  { %v1086_v1 = vpop.f32.mrb[29].mxu0 }
 0x5f2   :  { %v1827_v2 = vpop.f32.mrb[30].mxu0 }
 0x5f3   :  { %v1336_v3 = vpack.c.bf16 %v1827_v2, %v1826_v0  ;;  %v1089_v4 = vpop.f32.mrb[31].mxu0 }
 0x5f4   :  { %v1335_v5 = vpack.c.bf16 %v1089_v4, %v1086_v1 }
 0x5f6   :  { %1872 = vmatprep.mubr.msk.bf16.mxu1 %vm456_vm6, %v1335_v5 }
 0x5f7   :  { %1873 = vmatmul.mubr.msk.bf16.vlgmr.msra.gmra.mrb[32].mxu1 %vm456_vm6, %v1336_v3  ;;  %vm1472_vm6 = vcmask 31744  }
 0x6ba   :  { %v1858_v6 = vpop.f32.mrb[36].mxu0 }
 0x6bb   :  { %v1309_v7 = vpop.f32.mrb[37].mxu0 }
 0x6bc   :  { %v1859_v8 = vpop.f32.mrb[38].mxu0 }
 0x6bd   :  { %v1312_v9 = vpop.f32.mrb[39].mxu0 }
 0x6c2   :  { %v1870_v11 = vpop.f32.mrb[32].mxu0 }
 0x6c3   :  { %v1458_v12 = vadd.f32 %v1870_v11, %v1454_v10  ;;  %v1407_v13 = vpop.f32.mrb[33].mxu0 }
 0x6c4   :  { %v1456_v14 = vadd.f32 %v1454_v10, %v1407_v13  ;;  %v1871_v15 = vpop.f32.mrb[34].mxu0 }
 0x6c5   :  { %1958 = vtanh.f32 %v1458_v12  ;;  %v1459_v16 = vadd.f32 %v1871_v15, %v1454_v10  ;;  %v1410_v17 = vpop.f32.mrb[35].mxu0 }
 0x6c6   :  { %1960 = vtanh.f32 %v1456_v14  ;;  %v1457_v18 = vadd.f32 %v1454_v10, %v1410_v17 }
 0x6c7   :  { %1962 = vtanh.f32 %v1459_v16 }
 0x6c8   :  { %1964 = vtanh.f32 %v1457_v18 }
 0x6ca   :  { %v1874_v19 = vpop.f32.mrb[32].mxu1 }
 0x6cb   :  { %v1884_v20 = vadd.f32 %v1874_v19, %v1858_v6  ;;  %v1423_v21 = vpop.f32.mrb[33].mxu1 }
 0x6cc   :  { %v1885_v22 = vadd.f32 %v1423_v21, %v1309_v7  ;;  %v1875_v24 = vpop.f32.mrb[34].mxu1 }
 0x6cd   :  { %v1462_v26 = vadd.f32 %v1884_v20, %v1454_v10  ;;  %v1886_v27 = vadd.f32 %v1875_v24, %v1859_v8  ;;  %v1426_v28 = vpop.f32.mrb[35].mxu1 }
 0x6ce   :  { %v1460_v29 = vadd.f32 %v1885_v22, %v1454_v10  ;;  %v1887_v30 = vadd.f32 %v1426_v28, %v1312_v9 }
 0x6cf   :  { %v1959_v31 = vpop.eup %1958  ;;  %1966 = vtanh.f32 %v1462_v26  ;;  %v1463_v23 = vadd.f32 %v1886_v27, %v1454_v10 }
 0x6d0   :  { %v1961_v33 = vpop.eup %1960  ;;  %1475 = vst.msk [vmem:[%s2313_s10 + $0x10] sm:$0xff] %vm1472_vm6, %v1959_v31  ;;  %1968 = vtanh.f32 %v1460_v29  ;;  %v1461_v40 = vadd.f32 %v1887_v30, %v1454_v10 }
 0x6d1   :  { %v1963_v43 = vpop.eup %1962  ;;  %1473 = vst.msk [vmem:[%s2313_s10] sm:$0xff] %vm1472_vm6, %v1961_v33  ;;  %1970 = vtanh.f32 %v1463_v23 }
 0x6d2   :  { %v1965_v51 = vpop.eup %1964  ;;  %1476 = vst.msk [vmem:[%s2313_s10 + $0x18] sm:$0xff] %vm1472_vm6, %v1963_v43  ;;  %1972 = vtanh.f32 %v1461_v40 }
 0x6d3   :  { %1474 = vst.msk [vmem:[%s2313_s10 + $0x8] sm:$0xff] %vm1472_vm6, %v1965_v51 }
 0x6d9   :  { %v1967_v53 = vpop.eup %1966 }
 0x6da   :  { %v1969_v60 = vpop.eup %1968  ;;  %1479 = vst.msk [vmem:[%s2313_s10 + $0x30] sm:$0xff] %vm1472_vm6, %v1967_v53 }
 0x6db   :  { %v1971_v63 = vpop.eup %1970  ;;  %1477 = vst.msk [vmem:[%s2313_s10 + $0x20] sm:$0xff] %vm1472_vm6, %v1969_v60 }
 0x6dc   :  { %v1973_v25 = vpop.eup %1972  ;;  %1480 = vst.msk [vmem:[%s2313_s10 + $0x38] sm:$0xff] %vm1472_vm6, %v1971_v63 }
 0x6dd   :  { %1478 = vst.msk [vmem:[%s2313_s10 + $0x28] sm:$0xff] %vm1472_vm6, %v1973_v25 }

</bundles_post_ra>
